<compile_context>
chip_gen: v5e
topology: v5e:2x2
jax: 0.10.0
libtpu: 0.0.40
codegen_flags: <defaults>
</compile_context>

<pallas_src>
import functools
import numpy as np
import jax
import jax.numpy as jnp
from jax import lax
from jax.experimental import pallas as pl
from jax.experimental.pallas import tpu as pltpu


def _round_up(x, m):
    return ((x + m - 1) // m) * m


def _pad_axis(a, m, axis):
    pad = (-a.shape[axis]) % m
    if pad == 0:
        return a
    cfg = [(0, 0)] * a.ndim
    cfg[axis] = (0, pad)
    return jnp.pad(a, cfg)


@functools.lru_cache(maxsize=None)
def _vmem_limit():
    """Generation-aware scoped-VMEM budget (3/4 of physical, capped)."""
    cap = 64 * 1024 * 1024
    try:
        cap = int(pltpu.get_tpu_info().vmem_capacity_bytes)
    except Exception:
        pass
    return min(int(cap * 3 // 4), 100 * 1024 * 1024)


def _pick_div_tile(d, cap):
    """Largest tile <= cap that is the full dim or divides it on a 128-aligned size."""
    if d <= cap:
        return d
    for t in (cap, 512, 384, 256, 128):
        if t <= cap and d % t == 0:
            return t
    return None


def _pick_m_tile(m, cap=1024):
    """M tile: full extent if it fits, else a divisor of M (no HBM pad of the activation)."""
    if m <= cap:
        return m, m
    t = (cap // 8) * 8
    while t >= 256:
        if m % t == 0:
            return t, m
        t -= 8
    return 512, _round_up(m, 512)          # fallback: pad (costs one XLA copy)


# --------------------------------------------------------------------------- fused matmul
# y = act(x @ w + b [+ residual]); bf16 operands, f32 accumulation, bias folded into init.
def _matmul_kernel(x_ref, w_ref, b_ref, *rest, act, has_res):
    if has_res:
        r_ref, o_ref, acc_ref = rest
    else:
        o_ref, acc_ref = rest
    k = pl.program_id(2)

    @pl.when(k == 0)
    def _():
        acc_ref[...] = jnp.broadcast_to(b_ref[...], acc_ref.shape)   # bias init (f32)

    acc_ref[...] += jnp.dot(x_ref[...], w_ref[...], preferred_element_type=jnp.float32)

    @pl.when(k == pl.num_programs(2) - 1)
    def _():
        y = acc_ref[...]
        if has_res:
            y = y + r_ref[...].astype(jnp.float32)   # fused residual add
        if act:
            y = jnp.maximum(y, 0.0)                  # fused ReLU
        o_ref[...] = y.astype(o_ref.dtype)


def matmul_bias_act(x, w, b, act, residual=None, out_dtype=jnp.bfloat16):
    """x:(M,K) w:(K,N) b:(N,) [residual:(M,N)] -> act(x@w + b + residual)."""
    M, K = x.shape
    N = w.shape[1]

    # N: lane-dense output (>=128); only weights/bias are padded, output sliced outside.
    Np = max(_round_up(N, 128), 128)
    tn = _pick_div_tile(Np, 512)
    if tn is None:
        Np = _round_up(Np, 512)
        tn = 512
    # K: tile that divides K if possible (no HBM pad of the activation).
    tk = _pick_div_tile(K, 512)
    Kp = K
    if tk is None:
        tk = 512
        Kp = _round_up(K, 512)
    # M: full-extent block if it fits, else a divisor of M.
    tm, Mp = _pick_m_tile(M)

    xp = x.astype(jnp.bfloat16)
    if (Mp, Kp) != (M, K):
        xp = jnp.pad(xp, ((0, Mp - M), (0, Kp - K)))
    wp_ = w.astype(jnp.bfloat16)
    if (Kp, Np) != (K, N):
        wp_ = jnp.pad(wp_, ((0, Kp - K), (0, Np - N)))
    bp = b.reshape(1, -1).astype(jnp.float32)
    if Np != N:
        bp = jnp.pad(bp, ((0, 0), (0, Np - N)))

    in_specs = [
        pl.BlockSpec((tm, tk), lambda i, j, k: (i, k)),
        pl.BlockSpec((tk, tn), lambda i, j, k: (k, j)),
        pl.BlockSpec((1, tn), lambda i, j, k: (0, j)),
    ]
    args = [xp, wp_, bp]
    has_res = residual is not None
    if has_res:
        rp = residual.astype(jnp.bfloat16)
        if (Mp, Np) != rp.shape:
            rp = jnp.pad(rp, ((0, Mp - M), (0, Np - N)))
        in_specs.append(pl.BlockSpec((tm, tn), lambda i, j, k: (i, j)))
        args.append(rp)

    grid = (Mp // tm, Np // tn, Kp // tk)
    flops = 2 * Mp * Np * Kp
    bytes_acc = 2 * (Mp * Kp + Kp * Np) + 2 * Mp * Np * (2 if has_res else 1)
    out = pl.pallas_call(
        functools.partial(_matmul_kernel, act=act, has_res=has_res),
        out_shape=jax.ShapeDtypeStruct((Mp, Np), out_dtype),
        grid_spec=pltpu.PrefetchScalarGridSpec(
            num_scalar_prefetch=0,
            grid=grid,
            in_specs=in_specs,
            out_specs=pl.BlockSpec((tm, tn), lambda i, j, k: (i, j)),
            scratch_shapes=[pltpu.VMEM((tm, tn), jnp.float32)],
        ),
        compiler_params=pltpu.CompilerParams(
            dimension_semantics=("parallel", "parallel", "arbitrary"),
            vmem_limit_bytes=_vmem_limit()),
        cost_estimate=pl.CostEstimate(flops=flops, transcendentals=0,
                                      bytes_accessed=bytes_acc),
    )(*args)
    return out[:M, :N]


# ----------------------------------------------------------------- direct conv (no im2col)
def _conv_kernel(x_ref, w_ref, b_ref, o_ref, acc_ref, *, kh, kw, ho, wo, wp8, act):
    c = pl.program_id(2)
    L = ho * wp8

    @pl.when(c == 0)
    def _():
        acc_ref[...] = jnp.broadcast_to(b_ref[...], acc_ref.shape)   # bias init (f32)

    # Tap loop: each tap is a contiguous full-lane-width window of the flattened activation
    # (the kj shift is only a sublane offset), feeding a back-to-back 2-D MXU dot that
    # accumulates into the resident f32 accumulator. No per-tap relayout copies.
    for ki in range(kh):
        for kj in range(kw):
            patch = x_ref[0, pl.ds(ki * wp8 + kj, L), :]
            acc_ref[...] += jnp.dot(patch, w_ref[ki, kj],
                                    preferred_element_type=jnp.float32)

    @pl.when(c == pl.num_programs(2) - 1)
    def _():
        y = acc_ref[...]
        if act:
            y = jnp.maximum(y, 0.0)
        y = y.astype(o_ref.dtype)
        # over-wide (wp8) rows: store only the wo valid columns, row by row (aligned slices)
        for r in range(ho):
            o_ref[0, r] = y[r * wp8:r * wp8 + wo, :]


def _conv_direct(x_p, w, b, act):
    """Stride-1 valid conv on an already halo-padded NHWC input (fused bias + ReLU)."""
    n, hp, wp, cin = x_p.shape
    kh, kw, _, cout = w.shape
    ho, wo = hp - kh + 1, wp - kw + 1
    wp8 = _round_up(wp, 8)
    # width pad to a sublane multiple + one extra row so flattened tap windows stay in bounds
    x_pp = jnp.pad(x_p, ((0, 0), (0, 1), (0, wp8 - wp), (0, 0)))
    Lx = (hp + 1) * wp8
    x_flat = x_pp.reshape(n, Lx, cin).astype(jnp.bfloat16)   # free reshape (contiguous)

    coutp = max(_round_up(cout, 128), 128)                   # lane-dense output
    wk = w.astype(jnp.bfloat16)
    bk = b.astype(jnp.float32).reshape(1, -1)
    if coutp != cout:
        wk = jnp.pad(wk, ((0, 0), (0, 0), (0, 0), (0, coutp - cout)))
        bk = jnp.pad(bk, ((0, 0), (0, coutp - cout)))

    tc = _pick_div_tile(cin, 512) or cin
    tco = _pick_div_tile(coutp, 512) or coutp
    L = ho * wp8
    grid = (n, coutp // tco, cin // tc)

    flops = 2 * n * ho * wo * kh * kw * cin * cout
    bytes_acc = 2 * (n * Lx * cin + kh * kw * cin * coutp + n * ho * wo * coutp)
    out = pl.pallas_call(
        functools.partial(_conv_kernel, kh=kh, kw=kw, ho=ho, wo=wo, wp8=wp8, act=act),
        out_shape=jax.ShapeDtypeStruct((n, ho, wo, coutp), jnp.bfloat16),
        grid_spec=pltpu.PrefetchScalarGridSpec(
            num_scalar_prefetch=0,
            grid=grid,
            in_specs=[
                pl.BlockSpec((1, Lx, tc), lambda bi, j, c: (bi, 0, c)),
                pl.BlockSpec((kh, kw, tc, tco), lambda bi, j, c: (0, 0, c, j)),
                pl.BlockSpec((1, tco), lambda bi, j, c: (0, j)),
            ],
            out_specs=pl.BlockSpec((1, ho, wo, tco), lambda bi, j, c: (bi, 0, 0, j)),
            scratch_shapes=[pltpu.VMEM((L, tco), jnp.float32)],
        ),
        compiler_params=pltpu.CompilerParams(
            dimension_semantics=("parallel", "parallel", "arbitrary"),
            vmem_limit_bytes=_vmem_limit()),
        cost_estimate=pl.CostEstimate(flops=flops, transcendentals=0,
                                      bytes_accessed=bytes_acc),
    )(x_flat, wk, bk)
    return out if coutp == cout else out[..., :cout]


def _space_to_depth_conv_inputs(x_p, w, s):
    """Rewrite a stride-s conv over padded x_p as a stride-1 conv (cheap XLA phase split)."""
    n, hp, wp, cin = x_p.shape
    kh, kw, _, cout = w.shape
    ho = (hp - kh) // s + 1
    wo = (wp - kw) // s + 1
    k2h = (kh + s - 1) // s
    k2w = (kw + s - 1) // s
    lh = ho + k2h - 1
    lw = wo + k2w - 1
    phases = []
    for pi in range(s):
        for pj in range(s):
            ph = x_p[:, pi::s, pj::s, :][:, :lh, :lw, :]
            pad_h, pad_w = lh - ph.shape[1], lw - ph.shape[2]
            if pad_h or pad_w:
                ph = jnp.pad(ph, ((0, 0), (0, pad_h), (0, pad_w), (0, 0)))
            phases.append(ph)
    x_s2d = jnp.concatenate(phases, axis=-1)                 # (N, lh, lw, s*s*cin)
    w_pad = jnp.pad(w, ((0, k2h * s - kh), (0, k2w * s - kw), (0, 0), (0, 0)))
    w2 = (w_pad.reshape(k2h, s, k2w, s, cin, cout)
          .transpose(0, 2, 1, 3, 4, 5)
          .reshape(k2h, k2w, s * s * cin, cout))
    return x_s2d, w2


def conv_bn_act(x, p, stride, pad, act=True, residual=None):
    """x NHWC (bf16). p: {'w':(kh,kw,cin,cout), 's':(cout,), 'b':(cout,)} with BN folded."""
    w = p["w"] * p["s"][None, None, None, :]   # fold BN scale into conv weights
    bias = p["b"]
    kh, kw, cin, cout = w.shape
    if kh == 1 and kw == 1:
        if stride > 1:
            x = x[:, ::stride, ::stride, :]
        n, h, ww_, _ = x.shape
        res2 = None if residual is None else residual.reshape(n * h * ww_, cout)
        y = matmul_bias_act(x.reshape(n * h * ww_, cin), w.reshape(cin, cout),
                            bias, act, residual=res2)
        return y.reshape(n, h, ww_, cout)
    assert residual is None
    x_p = jnp.pad(x, ((0, 0), (pad, pad), (pad, pad), (0, 0)))
    if stride > 1:
        x_p, w = _space_to_depth_conv_inputs(x_p, w, stride)
    return _conv_direct(x_p, w, bias, act)


def conv_im2col(x, p, stride, pad, act=True):
    """kxk conv as explicit XLA im2col + fused Pallas matmul (for tiny-cin convs: the stem)."""
    w = p["w"] * p["s"][None, None, None, :]
    bias = p["b"]
    kh, kw, cin, cout = w.shape
    n, h, wd, _ = x.shape
    ho = (h + 2 * pad - kh) // stride + 1
    wo = (wd + 2 * pad - kw) // stride + 1
    x_p = jnp.pad(x, ((0, 0), (pad, pad), (pad, pad), (0, 0)))
    cols = []
    for ki in range(kh):
        for kj in range(kw):
            cols.append(x_p[:, ki:ki + (ho - 1) * stride + 1:stride,
                            kj:kj + (wo - 1) * stride + 1:stride, :])
    patches = jnp.concatenate(cols, axis=-1)                 # (n, ho, wo, kh*kw*cin)
    y = matmul_bias_act(patches.reshape(n * ho * wo, kh * kw * cin),
                        w.reshape(kh * kw * cin, cout), bias, act)
    return y.reshape(n, ho, wo, cout)


# ----------------------------------------------------------- FC + ReLU + Dropout head kernel
def _head_kernel(x_ref, w_ref, b_ref, u_ref, o_ref, *, p):
    y = jnp.dot(x_ref[...], w_ref[...], preferred_element_type=jnp.float32) + b_ref[...]
    y = jnp.maximum(y, 0.0)                                  # ReLU
    if p > 0.0:                                              # inverted dropout (train mode)
        keep = u_ref[...] >= jnp.float32(p)
        y = jnp.where(keep, y * jnp.float32(1.0 / (1.0 - p)), 0.0)
    o_ref[...] = y


def fc_relu_dropout(feat, w, b, dropout_p, key):
    B, K = feat.shape
    E = w.shape[1]
    Ep = max(_round_up(E, 128), 128)                         # lane-dense internal width
    te = _pick_div_tile(Ep, 512) or Ep
    tb = B if B <= 256 else 256
    Bp = B if B % tb == 0 else _round_up(B, tb)
    wp_ = _pad_axis(w, Ep, 1).astype(jnp.bfloat16)
    bp = _pad_axis(b.reshape(1, -1).astype(jnp.float32), Ep, 1)
    u = jax.random.uniform(key, (Bp, Ep), jnp.float32)       # portable RNG
    xb = feat.astype(jnp.bfloat16)
    if Bp != B:
        xb = _pad_axis(xb, tb, 0)
    out = pl.pallas_call(
        functools.partial(_head_kernel, p=float(dropout_p)),
        out_shape=jax.ShapeDtypeStruct((Bp, Ep), jnp.float32),
        grid_spec=pltpu.PrefetchScalarGridSpec(
            num_scalar_prefetch=0,
            grid=(Bp // tb, Ep // te),
            in_specs=[pl.BlockSpec((tb, K), lambda i, j: (i, 0)),
                      pl.BlockSpec((K, te), lambda i, j: (0, j)),
                      pl.BlockSpec((1, te), lambda i, j: (0, j)),
                      pl.BlockSpec((tb, te), lambda i, j: (i, j))],
            out_specs=pl.BlockSpec((tb, te), lambda i, j: (i, j)),
        ),
        compiler_params=pltpu.CompilerParams(
            dimension_semantics=("parallel", "parallel"),
            vmem_limit_bytes=_vmem_limit()),
    )(xb, wp_, bp, u)
    return out[:B, :E]


# ------------------------------------------------------------------- ResNet50 parameters
CFG = [(3, 64, 1), (4, 128, 2), (6, 256, 2), (3, 512, 2)]  # (blocks, width, stride)


def make_params(key, embedding_size):
    ks = iter(jax.random.split(key, 400))
    nk = lambda: next(ks)

    def conv_bn(kh, kw, cin, cout):
        w = jax.random.normal(nk(), (kh, kw, cin, cout), jnp.float32) * np.sqrt(2.0 / (kh * kw * cin))
        gamma = 1.0 + 0.1 * jax.random.normal(nk(), (cout,), jnp.float32)
        beta = 0.1 * jax.random.normal(nk(), (cout,), jnp.float32)
        mean = 0.1 * jax.random.normal(nk(), (cout,), jnp.float32)
        var = 1.0 + 0.1 * jax.random.uniform(nk(), (cout,), jnp.float32)
        scale = gamma / jnp.sqrt(var + 1e-5)      # fold BN (inference running stats)
        bias = beta - mean * scale
        return dict(w=w, s=scale, b=bias)

    params = {"stem": conv_bn(7, 7, 3, 64)}
    layers = []
    in_ch = 64
    for (nblocks, width, _stride) in CFG:
        blocks = []
        for bi in range(nblocks):
            blk = dict(c1=conv_bn(1, 1, in_ch, width),
                       c2=conv_bn(3, 3, width, width),
                       c3=conv_bn(1, 1, width, width * 4))
            if bi == 0:
                blk["down"] = conv_bn(1, 1, in_ch, width * 4)
            blocks.append(blk)
            in_ch = width * 4
        layers.append(blocks)
    params["layers"] = layers
    params["fc_w"] = jax.random.normal(nk(), (2048, embedding_size), jnp.float32) * np.sqrt(1.0 / 2048)
    params["fc_b"] = 0.01 * jax.random.normal(nk(), (embedding_size,), jnp.float32)
    return params


# ----------------------------------------------------------------------------- forward
def forward(params, images_nchw, dropout_p=0.5, seed=0):
    x = jnp.transpose(images_nchw, (0, 2, 3, 1)).astype(jnp.bfloat16)  # NCHW -> NHWC bf16
    # stem 7x7/2: tiny cin=3, lowered as im2col matmul (K = 147, near-full MXU depth)
    x = conv_im2col(x, params["stem"], stride=2, pad=3, act=True)
    # TODO(synk): the 3x3/2 maxpool stays in XLA (reduce_window); fusing it into the stem
    # epilogue would save one HBM round trip of the largest activation.
    x = lax.reduce_window(x, jnp.array(-jnp.inf, x.dtype), lax.max,
                          (1, 3, 3, 1), (1, 2, 2, 1),
                          ((0, 0), (1, 1), (1, 1), (0, 0)))
    # bottleneck stages
    for li, (nblocks, _width, lstride) in enumerate(CFG):
        for bi in range(nblocks):
            blk = params["layers"][li][bi]
            s = lstride if bi == 0 else 1
            out = conv_bn_act(x, blk["c1"], stride=1, pad=0, act=True)
            out = conv_bn_act(out, blk["c2"], stride=s, pad=1, act=True)
            idn = (conv_bn_act(x, blk["down"], stride=s, pad=0, act=False)
                   if bi == 0 else x)
            # residual add + ReLU fused into the c3 matmul epilogue
            x = conv_bn_act(out, blk["c3"], stride=1, pad=0, act=True, residual=idn)
    feat = jnp.mean(x.astype(jnp.float32), axis=(1, 2))       # GAP -> (B, 2048)
    key = jax.random.PRNGKey(seed)
    # replaces resnet.fc + ReLU + Dropout (training-mode, inverted dropout)
    return fc_relu_dropout(feat, params["fc_w"], params["fc_b"], dropout_p, key)


if __name__ == "__main__":
    key = jax.random.PRNGKey(0)
    kimg, kparam, kchk = jax.random.split(key, 3)
    embedding_size = 32
    images = jax.random.normal(kimg, (2, 3, 64, 64), jnp.float32)  # NCHW, like PyTorch
    params = make_params(kparam, embedding_size)

    # -- self-check of the fused conv kernels against lax.conv (bf16-rounded operands) --
    def conv_ref(x, w, b, stride, pad, act):
        xr = x.astype(jnp.bfloat16).astype(jnp.float32)
        wr = w.astype(jnp.bfloat16).astype(jnp.float32)
        y = lax.conv_general_dilated(xr, wr, (stride, stride),
                                     [(pad, pad), (pad, pad)],
                                     dimension_numbers=("NHWC", "HWIO", "NHWC"))
        y = y + b[None, None, None, :]
        return jnp.maximum(y, 0.0) if act else y

    kx, kw1, kw2 = jax.random.split(kchk, 3)
    xt = jax.random.normal(kx, (2, 16, 16, 32), jnp.float32)
    for (kk, st) in [(3, 1), (3, 2), (7, 2)]:
        wt = jax.random.normal(kw1, (kk, kk, 32, 64), jnp.float32) * 0.1
        bt = jax.random.normal(kw2, (64,), jnp.float32) * 0.1
        pt = dict(w=wt, s=jnp.ones((64,), jnp.float32), b=bt)
        if kk == 7:
            fn = lambda a, _p=pt, _s=st, _k=kk: conv_im2col(
                a.astype(jnp.bfloat16), _p, stride=_s, pad=_k // 2, act=True)
        else:
            fn = lambda a, _p=pt, _s=st, _k=kk: conv_bn_act(
                a.astype(jnp.bfloat16), _p, stride=_s, pad=_k // 2, act=True)
        got = jax.jit(fn)(xt)
        ref = conv_ref(xt, wt, bt, st, kk // 2, True)
        err = float(jnp.max(jnp.abs(got.astype(jnp.float32) - ref)))
        tol = float(3e-2 * (1.0 + jnp.max(jnp.abs(ref))))
        assert err <= tol, (kk, st, err, tol)

    fwd = jax.jit(functools.partial(forward, dropout_p=0.5, seed=0))
    out = fwd(params, images)
    jax.block_until_ready(out)
    assert out.shape == (2, embedding_size)
    assert bool(jnp.all(out >= 0.0))            # ReLU + inverted dropout => non-negative
    assert bool(jnp.all(jnp.isfinite(out)))
    print("KERNEL_OK")
</pallas_src>

<mosaic_0001>
module attributes {stable_mosaic.version = 11 : i64} {
  func.func @_conv_kernel(%arg0: i32, %arg1: i32, %arg2: i32, %arg3: memref<1x456x32xbf16, #tpu.memory_space<vmem>>, %arg4: memref<3x3x32x128xbf16, #tpu.memory_space<vmem>>, %arg5: memref<1x128xf32, #tpu.memory_space<vmem>>, %arg6: memref<1x16x16x128xbf16, #tpu.memory_space<vmem>>, %arg7: memref<384x128xf32, #tpu.memory_space<vmem>>) attributes {dimension_semantics = [#tpu.dimension_semantics<parallel>, #tpu.dimension_semantics<parallel>, #tpu.dimension_semantics<arbitrary>], iteration_bounds = array<i64: 2, 1, 1>, scalar_prefetch = 0 : i64, scratch_operands = 1 : i64, tpu.core_type = #tpu.core_type<tc>, window_params = [{transform_indices = @transform_0, window_bounds = array<i64: 1, 456, 32>}, {transform_indices = @transform_1, window_bounds = array<i64: 3, 3, 32, 128>}, {transform_indices = @transform_2, window_bounds = array<i64: 1, 128>}, {transform_indices = @transform_3, window_bounds = array<i64: 1, 16, 16, 128>}]} {
    %c0_i32 = arith.constant 0 : i32
    %0 = arith.cmpi eq, %arg2, %c0_i32 : i32
    %1 = arith.extui %0 : i1 to i32
    %c0_i32_0 = arith.constant 0 : i32
    %2 = arith.cmpi ne, %1, %c0_i32_0 : i32
    scf.if %2 {
      %c0_101 = arith.constant 0 : index
      %c0_102 = arith.constant 0 : index
      %78 = vector.load %arg5[%c0_101, %c0_102] : memref<1x128xf32, #tpu.memory_space<vmem>>, vector<1x128xf32>
      %79 = vector.shape_cast %78 : vector<1x128xf32> to vector<1x128xf32>
      %80 = vector.broadcast %79 : vector<1x128xf32> to vector<384x128xf32>
      %c0_103 = arith.constant 0 : index
      %c0_104 = arith.constant 0 : index
      %81 = vector.load %arg7[%c0_103, %c0_104] : memref<384x128xf32, #tpu.memory_space<vmem>>, vector<384x128xf32>
      tpu.vector_store %arg7[%c0_103, %c0_104], %80 {strides = array<i32>} : memref<384x128xf32, #tpu.memory_space<vmem>>, vector<384x128xf32>,
    } else {
    }
    %c0 = arith.constant 0 : index
    %c0_1 = arith.constant 0 : index
    %c0_2 = arith.constant 0 : index
    %3 = vector.load %arg3[%c0, %c0_1, %c0_2] : memref<1x456x32xbf16, #tpu.memory_space<vmem>>, vector<1x384x32xbf16>
    %4 = vector.shape_cast %3 : vector<1x384x32xbf16> to vector<384x32xbf16>
    %c0_3 = arith.constant 0 : index
    %c0_4 = arith.constant 0 : index
    %5 = vector.load %arg7[%c0_3, %c0_4] : memref<384x128xf32, #tpu.memory_space<vmem>>, vector<384x128xf32>
    %c0_5 = arith.constant 0 : index
    %c0_6 = arith.constant 0 : index
    %c0_7 = arith.constant 0 : index
    %c0_8 = arith.constant 0 : index
    %6 = vector.load %arg4[%c0_5, %c0_6, %c0_7, %c0_8] : memref<3x3x32x128xbf16, #tpu.memory_space<vmem>>, vector<1x1x32x128xbf16>
    %7 = vector.shape_cast %6 : vector<1x1x32x128xbf16> to vector<32x128xbf16>
    %cst = arith.constant dense<0.000000e+00> : vector<384x128xf32>
    %8 = tpu.matmul %4, %7, %cst {dimension_numbers = #tpu.dot_dimension_numbers<[1], [0], [0], [1], [0, 0, 1, 1], [], []>} : vector<384x32xbf16>, vector<32x128xbf16>, vector<384x128xf32> -> vector<384x128xf32>
    %9 = arith.addf %5, %8 : vector<384x128xf32>
    %c0_9 = arith.constant 0 : index
    %c0_10 = arith.constant 0 : index
    %10 = vector.load %arg7[%c0_9, %c0_10] : memref<384x128xf32, #tpu.memory_space<vmem>>, vector<384x128xf32>
    tpu.vector_store %arg7[%c0_9, %c0_10], %9 {strides = array<i32>} : memref<384x128xf32, #tpu.memory_space<vmem>>, vector<384x128xf32>,
    %c0_11 = arith.constant 0 : index
    %c1 = arith.constant 1 : index
    %c0_12 = arith.constant 0 : index
    %11 = vector.load %arg3[%c0_11, %c1, %c0_12] : memref<1x456x32xbf16, #tpu.memory_space<vmem>>, vector<1x384x32xbf16>
    %12 = vector.shape_cast %11 : vector<1x384x32xbf16> to vector<384x32xbf16>
    %c0_13 = arith.constant 0 : index
    %c0_14 = arith.constant 0 : index
    %13 = vector.load %arg7[%c0_13, %c0_14] : memref<384x128xf32, #tpu.memory_space<vmem>>, vector<384x128xf32>
    %c0_15 = arith.constant 0 : index
    %c1_16 = arith.constant 1 : index
    %c0_17 = arith.constant 0 : index
    %c0_18 = arith.constant 0 : index
    %14 = vector.load %arg4[%c0_15, %c1_16, %c0_17, %c0_18] : memref<3x3x32x128xbf16, #tpu.memory_space<vmem>>, vector<1x1x32x128xbf16>
    %15 = vector.shape_cast %14 : vector<1x1x32x128xbf16> to vector<32x128xbf16>
    %cst_19 = arith.constant dense<0.000000e+00> : vector<384x128xf32>
    %16 = tpu.matmul %12, %15, %cst_19 {dimension_numbers = #tpu.dot_dimension_numbers<[1], [0], [0], [1], [0, 0, 1, 1], [], []>} : vector<384x32xbf16>, vector<32x128xbf16>, vector<384x128xf32> -> vector<384x128xf32>
    %17 = arith.addf %13, %16 : vector<384x128xf32>
    %c0_20 = arith.constant 0 : index
    %c0_21 = arith.constant 0 : index
    %18 = vector.load %arg7[%c0_20, %c0_21] : memref<384x128xf32, #tpu.memory_space<vmem>>, vector<384x128xf32>
    tpu.vector_store %arg7[%c0_20, %c0_21], %17 {strides = array<i32>} : memref<384x128xf32, #tpu.memory_space<vmem>>, vector<384x128xf32>,
    %c0_22 = arith.constant 0 : index
    %c2 = arith.constant 2 : index
    %c0_23 = arith.constant 0 : index
    %19 = vector.load %arg3[%c0_22, %c2, %c0_23] : memref<1x456x32xbf16, #tpu.memory_space<vmem>>, vector<1x384x32xbf16>
    %20 = vector.shape_cast %19 : vector<1x384x32xbf16> to vector<384x32xbf16>
    %c0_24 = arith.constant 0 : index
    %c0_25 = arith.constant 0 : index
    %21 = vector.load %arg7[%c0_24, %c0_25] : memref<384x128xf32, #tpu.memory_space<vmem>>, vector<384x128xf32>
    %c0_26 = arith.constant 0 : index
    %c2_27 = arith.constant 2 : index
    %c0_28 = arith.constant 0 : index
    %c0_29 = arith.constant 0 : index
    %22 = vector.load %arg4[%c0_26, %c2_27, %c0_28, %c0_29] : memref<3x3x32x128xbf16, #tpu.memory_space<vmem>>, vector<1x1x32x128xbf16>
    %23 = vector.shape_cast %22 : vector<1x1x32x128xbf16> to vector<32x128xbf16>
    %cst_30 = arith.constant dense<0.000000e+00> : vector<384x128xf32>
    %24 = tpu.matmul %20, %23, %cst_30 {dimension_numbers = #tpu.dot_dimension_numbers<[1], [0], [0], [1], [0, 0, 1, 1], [], []>} : vector<384x32xbf16>, vector<32x128xbf16>, vector<384x128xf32> -> vector<384x128xf32>
    %25 = arith.addf %21, %24 : vector<384x128xf32>
    %c0_31 = arith.constant 0 : index
    %c0_32 = arith.constant 0 : index
    %26 = vector.load %arg7[%c0_31, %c0_32] : memref<384x128xf32, #tpu.memory_space<vmem>>, vector<384x128xf32>
    tpu.vector_store %arg7[%c0_31, %c0_32], %25 {strides = array<i32>} : memref<384x128xf32, #tpu.memory_space<vmem>>, vector<384x128xf32>,
    %c0_33 = arith.constant 0 : index
    %c24 = arith.constant 24 : index
    %c0_34 = arith.constant 0 : index
    %27 = vector.load %arg3[%c0_33, %c24, %c0_34] : memref<1x456x32xbf16, #tpu.memory_space<vmem>>, vector<1x384x32xbf16>
    %28 = vector.shape_cast %27 : vector<1x384x32xbf16> to vector<384x32xbf16>
    %c0_35 = arith.constant 0 : index
    %c0_36 = arith.constant 0 : index
    %29 = vector.load %arg7[%c0_35, %c0_36] : memref<384x128xf32, #tpu.memory_space<vmem>>, vector<384x128xf32>
    %c1_37 = arith.constant 1 : index
    %c0_38 = arith.constant 0 : index
    %c0_39 = arith.constant 0 : index
    %c0_40 = arith.constant 0 : index
    %30 = vector.load %arg4[%c1_37, %c0_38, %c0_39, %c0_40] : memref<3x3x32x128xbf16, #tpu.memory_space<vmem>>, vector<1x1x32x128xbf16>
    %31 = vector.shape_cast %30 : vector<1x1x32x128xbf16> to vector<32x128xbf16>
    %cst_41 = arith.constant dense<0.000000e+00> : vector<384x128xf32>
    %32 = tpu.matmul %28, %31, %cst_41 {dimension_numbers = #tpu.dot_dimension_numbers<[1], [0], [0], [1], [0, 0, 1, 1], [], []>} : vector<384x32xbf16>, vector<32x128xbf16>, vector<384x128xf32> -> vector<384x128xf32>
    %33 = arith.addf %29, %32 : vector<384x128xf32>
    %c0_42 = arith.constant 0 : index
    %c0_43 = arith.constant 0 : index
    %34 = vector.load %arg7[%c0_42, %c0_43] : memref<384x128xf32, #tpu.memory_space<vmem>>, vector<384x128xf32>
    tpu.vector_store %arg7[%c0_42, %c0_43], %33 {strides = array<i32>} : memref<384x128xf32, #tpu.memory_space<vmem>>, vector<384x128xf32>,
    %c0_44 = arith.constant 0 : index
    %c25 = arith.constant 25 : index
    %c0_45 = arith.constant 0 : index
    %35 = vector.load %arg3[%c0_44, %c25, %c0_45] : memref<1x456x32xbf16, #tpu.memory_space<vmem>>, vector<1x384x32xbf16>
    %36 = vector.shape_cast %35 : vector<1x384x32xbf16> to vector<384x32xbf16>
    %c0_46 = arith.constant 0 : index
    %c0_47 = arith.constant 0 : index
    %37 = vector.load %arg7[%c0_46, %c0_47] : memref<384x128xf32, #tpu.memory_space<vmem>>, vector<384x128xf32>
    %c1_48 = arith.constant 1 : index
    %c1_49 = arith.constant 1 : index
    %c0_50 = arith.constant 0 : index
    %c0_51 = arith.constant 0 : index
    %38 = vector.load %arg4[%c1_48, %c1_49, %c0_50, %c0_51] : memref<3x3x32x128xbf16, #tpu.memory_space<vmem>>, vector<1x1x32x128xbf16>
    %39 = vector.shape_cast %38 : vector<1x1x32x128xbf16> to vector<32x128xbf16>
    %cst_52 = arith.constant dense<0.000000e+00> : vector<384x128xf32>
    %40 = tpu.matmul %36, %39, %cst_52 {dimension_numbers = #tpu.dot_dimension_numbers<[1], [0], [0], [1], [0, 0, 1, 1], [], []>} : vector<384x32xbf16>, vector<32x128xbf16>, vector<384x128xf32> -> vector<384x128xf32>
    %41 = arith.addf %37, %40 : vector<384x128xf32>
    %c0_53 = arith.constant 0 : index
    %c0_54 = arith.constant 0 : index
    %42 = vector.load %arg7[%c0_53, %c0_54] : memref<384x128xf32, #tpu.memory_space<vmem>>, vector<384x128xf32>
    tpu.vector_store %arg7[%c0_53, %c0_54], %41 {strides = array<i32>} : memref<384x128xf32, #tpu.memory_space<vmem>>, vector<384x128xf32>,
    %c0_55 = arith.constant 0 : index
    %c26 = arith.constant 26 : index
    %c0_56 = arith.constant 0 : index
    %43 = vector.load %arg3[%c0_55, %c26, %c0_56] : memref<1x456x32xbf16, #tpu.memory_space<vmem>>, vector<1x384x32xbf16>
    %44 = vector.shape_cast %43 : vector<1x384x32xbf16> to vector<384x32xbf16>
    %c0_57 = arith.constant 0 : index
    %c0_58 = arith.constant 0 : index
    %45 = vector.load %arg7[%c0_57, %c0_58] : memref<384x128xf32, #tpu.memory_space<vmem>>, vector<384x128xf32>
    %c1_59 = arith.constant 1 : index
    %c2_60 = arith.constant 2 : index
    %c0_61 = arith.constant 0 : index
    %c0_62 = arith.constant 0 : index
    %46 = vector.load %arg4[%c1_59, %c2_60, %c0_61, %c0_62] : memref<3x3x32x128xbf16, #tpu.memory_space<vmem>>, vector<1x1x32x128xbf16>
    %47 = vector.shape_cast %46 : vector<1x1x32x128xbf16> to vector<32x128xbf16>
    %cst_63 = arith.constant dense<0.000000e+00> : vector<384x128xf32>
    %48 = tpu.matmul %44, %47, %cst_63 {dimension_numbers = #tpu.dot_dimension_numbers<[1], [0], [0], [1], [0, 0, 1, 1], [], []>} : vector<384x32xbf16>, vector<32x128xbf16>, vector<384x128xf32> -> vector<384x128xf32>
    %49 = arith.addf %45, %48 : vector<384x128xf32>
    %c0_64 = arith.constant 0 : index
    %c0_65 = arith.constant 0 : index
    %50 = vector.load %arg7[%c0_64, %c0_65] : memref<384x128xf32, #tpu.memory_space<vmem>>, vector<384x128xf32>
    tpu.vector_store %arg7[%c0_64, %c0_65], %49 {strides = array<i32>} : memref<384x128xf32, #tpu.memory_space<vmem>>, vector<384x128xf32>,
    %c0_66 = arith.constant 0 : index
    %c48 = arith.constant 48 : index
    %c0_67 = arith.constant 0 : index
    %51 = vector.load %arg3[%c0_66, %c48, %c0_67] : memref<1x456x32xbf16, #tpu.memory_space<vmem>>, vector<1x384x32xbf16>
    %52 = vector.shape_cast %51 : vector<1x384x32xbf16> to vector<384x32xbf16>
    %c0_68 = arith.constant 0 : index
    %c0_69 = arith.constant 0 : index
    %53 = vector.load %arg7[%c0_68, %c0_69] : memref<384x128xf32, #tpu.memory_space<vmem>>, vector<384x128xf32>
    %c2_70 = arith.constant 2 : index
    %c0_71 = arith.constant 0 : index
    %c0_72 = arith.constant 0 : index
    %c0_73 = arith.constant 0 : index
    %54 = vector.load %arg4[%c2_70, %c0_71, %c0_72, %c0_73] : memref<3x3x32x128xbf16, #tpu.memory_space<vmem>>, vector<1x1x32x128xbf16>
    %55 = vector.shape_cast %54 : vector<1x1x32x128xbf16> to vector<32x128xbf16>
    %cst_74 = arith.constant dense<0.000000e+00> : vector<384x128xf32>
    %56 = tpu.matmul %52, %55, %cst_74 {dimension_numbers = #tpu.dot_dimension_numbers<[1], [0], [0], [1], [0, 0, 1, 1], [], []>} : vector<384x32xbf16>, vector<32x128xbf16>, vector<384x128xf32> -> vector<384x128xf32>
    %57 = arith.addf %53, %56 : vector<384x128xf32>
    %c0_75 = arith.constant 0 : index
    %c0_76 = arith.constant 0 : index
    %58 = vector.load %arg7[%c0_75, %c0_76] : memref<384x128xf32, #tpu.memory_space<vmem>>, vector<384x128xf32>
    tpu.vector_store %arg7[%c0_75, %c0_76], %57 {strides = array<i32>} : memref<384x128xf32, #tpu.memory_space<vmem>>, vector<384x128xf32>,
    %c0_77 = arith.constant 0 : index
    %c49 = arith.constant 49 : index
    %c0_78 = arith.constant 0 : index
    %59 = vector.load %arg3[%c0_77, %c49, %c0_78] : memref<1x456x32xbf16, #tpu.memory_space<vmem>>, vector<1x384x32xbf16>
    %60 = vector.shape_cast %59 : vector<1x384x32xbf16> to vector<384x32xbf16>
    %c0_79 = arith.constant 0 : index
    %c0_80 = arith.constant 0 : index
    %61 = vector.load %arg7[%c0_79, %c0_80] : memref<384x128xf32, #tpu.memory_space<vmem>>, vector<384x128xf32>
    %c2_81 = arith.constant 2 : index
    %c1_82 = arith.constant 1 : index
    %c0_83 = arith.constant 0 : index
    %c0_84 = arith.constant 0 : index
    %62 = vector.load %arg4[%c2_81, %c1_82, %c0_83, %c0_84] : memref<3x3x32x128xbf16, #tpu.memory_space<vmem>>, vector<1x1x32x128xbf16>
    %63 = vector.shape_cast %62 : vector<1x1x32x128xbf16> to vector<32x128xbf16>
    %cst_85 = arith.constant dense<0.000000e+00> : vector<384x128xf32>
    %64 = tpu.matmul %60, %63, %cst_85 {dimension_numbers = #tpu.dot_dimension_numbers<[1], [0], [0], [1], [0, 0, 1, 1], [], []>} : vector<384x32xbf16>, vector<32x128xbf16>, vector<384x128xf32> -> vector<384x128xf32>
    %65 = arith.addf %61, %64 : vector<384x128xf32>
    %c0_86 = arith.constant 0 : index
    %c0_87 = arith.constant 0 : index
    %66 = vector.load %arg7[%c0_86, %c0_87] : memref<384x128xf32, #tpu.memory_space<vmem>>, vector<384x128xf32>
    tpu.vector_store %arg7[%c0_86, %c0_87], %65 {strides = array<i32>} : memref<384x128xf32, #tpu.memory_space<vmem>>, vector<384x128xf32>,
    %c0_88 = arith.constant 0 : index
    %c50 = arith.constant 50 : index
    %c0_89 = arith.constant 0 : index
    %67 = vector.load %arg3[%c0_88, %c50, %c0_89] : memref<1x456x32xbf16, #tpu.memory_space<vmem>>, vector<1x384x32xbf16>
    %68 = vector.shape_cast %67 : vector<1x384x32xbf16> to vector<384x32xbf16>
    %c0_90 = arith.constant 0 : index
    %c0_91 = arith.constant 0 : index
    %69 = vector.load %arg7[%c0_90, %c0_91] : memref<384x128xf32, #tpu.memory_space<vmem>>, vector<384x128xf32>
    %c2_92 = arith.constant 2 : index
    %c2_93 = arith.constant 2 : index
    %c0_94 = arith.constant 0 : index
    %c0_95 = arith.constant 0 : index
    %70 = vector.load %arg4[%c2_92, %c2_93, %c0_94, %c0_95] : memref<3x3x32x128xbf16, #tpu.memory_space<vmem>>, vector<1x1x32x128xbf16>
    %71 = vector.shape_cast %70 : vector<1x1x32x128xbf16> to vector<32x128xbf16>
    %cst_96 = arith.constant dense<0.000000e+00> : vector<384x128xf32>
    %72 = tpu.matmul %68, %71, %cst_96 {dimension_numbers = #tpu.dot_dimension_numbers<[1], [0], [0], [1], [0, 0, 1, 1], [], []>} : vector<384x32xbf16>, vector<32x128xbf16>, vector<384x128xf32> -> vector<384x128xf32>
    %73 = arith.addf %69, %72 : vector<384x128xf32>
    %c0_97 = arith.constant 0 : index
    %c0_98 = arith.constant 0 : index
    %74 = vector.load %arg7[%c0_97, %c0_98] : memref<384x128xf32, #tpu.memory_space<vmem>>, vector<384x128xf32>
    tpu.vector_store %arg7[%c0_97, %c0_98], %73 {strides = array<i32>} : memref<384x128xf32, #tpu.memory_space<vmem>>, vector<384x128xf32>,
    %c0_i32_99 = arith.constant 0 : i32
    %75 = arith.cmpi eq, %arg2, %c0_i32_99 : i32
    %76 = arith.extui %75 : i1 to i32
    %c0_i32_100 = arith.constant 0 : i32
    %77 = arith.cmpi ne, %76, %c0_i32_100 : i32
    scf.if %77 {
      %c0_101 = arith.constant 0 : index
      %c0_102 = arith.constant 0 : index
      %78 = vector.load %arg7[%c0_101, %c0_102] : memref<384x128xf32, #tpu.memory_space<vmem>>, vector<384x128xf32>
      %cst_103 = arith.constant 0.000000e+00 : f32
      %79 = vector.broadcast %cst_103 : f32 to vector<384x128xf32>
      %80 = arith.maximumf %78, %79 : vector<384x128xf32>
      %81 = arith.truncf %80 : vector<384x128xf32> to vector<384x128xbf16>
      %82 = vector.extract_strided_slice %81 {offsets = [0, 0], sizes = [16, 128], strides = [1, 1]} : vector<384x128xbf16> to vector<16x128xbf16>
      %c0_104 = arith.constant 0 : index
      %c0_105 = arith.constant 0 : index
      %c0_106 = arith.constant 0 : index
      %c0_107 = arith.constant 0 : index
      %83 = vector.load %arg6[%c0_104, %c0_105, %c0_106, %c0_107] : memref<1x16x16x128xbf16, #tpu.memory_space<vmem>>, vector<1x1x16x128xbf16>
      %84 = vector.shape_cast %83 : vector<1x1x16x128xbf16> to vector<16x128xbf16>
      %85 = vector.shape_cast %82 : vector<16x128xbf16> to vector<1x1x16x128xbf16>
      tpu.vector_store %arg6[%c0_104, %c0_105, %c0_106, %c0_107], %85 {strides = array<i32>} : memref<1x16x16x128xbf16, #tpu.memory_space<vmem>>, vector<1x1x16x128xbf16>,
      %86 = vector.extract_strided_slice %81 {offsets = [24, 0], sizes = [16, 128], strides = [1, 1]} : vector<384x128xbf16> to vector<16x128xbf16>
      %c0_108 = arith.constant 0 : index
      %c1_109 = arith.constant 1 : index
      %c0_110 = arith.constant 0 : index
      %c0_111 = arith.constant 0 : index
      %87 = vector.load %arg6[%c0_108, %c1_109, %c0_110, %c0_111] : memref<1x16x16x128xbf16, #tpu.memory_space<vmem>>, vector<1x1x16x128xbf16>
      %88 = vector.shape_cast %87 : vector<1x1x16x128xbf16> to vector<16x128xbf16>
      %89 = vector.shape_cast %86 : vector<16x128xbf16> to vector<1x1x16x128xbf16>
      tpu.vector_store %arg6[%c0_108, %c1_109, %c0_110, %c0_111], %89 {strides = array<i32>} : memref<1x16x16x128xbf16, #tpu.memory_space<vmem>>, vector<1x1x16x128xbf16>,
      %90 = vector.extract_strided_slice %81 {offsets = [48, 0], sizes = [16, 128], strides = [1, 1]} : vector<384x128xbf16> to vector<16x128xbf16>
      %c0_112 = arith.constant 0 : index
      %c2_113 = arith.constant 2 : index
      %c0_114 = arith.constant 0 : index
      %c0_115 = arith.constant 0 : index
      %91 = vector.load %arg6[%c0_112, %c2_113, %c0_114, %c0_115] : memref<1x16x16x128xbf16, #tpu.memory_space<vmem>>, vector<1x1x16x128xbf16>
      %92 = vector.shape_cast %91 : vector<1x1x16x128xbf16> to vector<16x128xbf16>
      %93 = vector.shape_cast %90 : vector<16x128xbf16> to vector<1x1x16x128xbf16>
      tpu.vector_store %arg6[%c0_112, %c2_113, %c0_114, %c0_115], %93 {strides = array<i32>} : memref<1x16x16x128xbf16, #tpu.memory_space<vmem>>, vector<1x1x16x128xbf16>,
      %94 = vector.extract_strided_slice %81 {offsets = [72, 0], sizes = [16, 128], strides = [1, 1]} : vector<384x128xbf16> to vector<16x128xbf16>
      %c0_116 = arith.constant 0 : index
      %c3 = arith.constant 3 : index
      %c0_117 = arith.constant 0 : index
      %c0_118 = arith.constant 0 : index
      %95 = vector.load %arg6[%c0_116, %c3, %c0_117, %c0_118] : memref<1x16x16x128xbf16, #tpu.memory_space<vmem>>, vector<1x1x16x128xbf16>
      %96 = vector.shape_cast %95 : vector<1x1x16x128xbf16> to vector<16x128xbf16>
      %97 = vector.shape_cast %94 : vector<16x128xbf16> to vector<1x1x16x128xbf16>
      tpu.vector_store %arg6[%c0_116, %c3, %c0_117, %c0_118], %97 {strides = array<i32>} : memref<1x16x16x128xbf16, #tpu.memory_space<vmem>>, vector<1x1x16x128xbf16>,
      %98 = vector.extract_strided_slice %81 {offsets = [96, 0], sizes = [16, 128], strides = [1, 1]} : vector<384x128xbf16> to vector<16x128xbf16>
      %c0_119 = arith.constant 0 : index
      %c4 = arith.constant 4 : index
      %c0_120 = arith.constant 0 : index
      %c0_121 = arith.constant 0 : index
      %99 = vector.load %arg6[%c0_119, %c4, %c0_120, %c0_121] : memref<1x16x16x128xbf16, #tpu.memory_space<vmem>>, vector<1x1x16x128xbf16>
      %100 = vector.shape_cast %99 : vector<1x1x16x128xbf16> to vector<16x128xbf16>
      %101 = vector.shape_cast %98 : vector<16x128xbf16> to vector<1x1x16x128xbf16>
      tpu.vector_store %arg6[%c0_119, %c4, %c0_120, %c0_121], %101 {strides = array<i32>} : memref<1x16x16x128xbf16, #tpu.memory_space<vmem>>, vector<1x1x16x128xbf16>,
      %102 = vector.extract_strided_slice %81 {offsets = [120, 0], sizes = [16, 128], strides = [1, 1]} : vector<384x128xbf16> to vector<16x128xbf16>
      %c0_122 = arith.constant 0 : index
      %c5 = arith.constant 5 : index
      %c0_123 = arith.constant 0 : index
      %c0_124 = arith.constant 0 : index
      %103 = vector.load %arg6[%c0_122, %c5, %c0_123, %c0_124] : memref<1x16x16x128xbf16, #tpu.memory_space<vmem>>, vector<1x1x16x128xbf16>
      %104 = vector.shape_cast %103 : vector<1x1x16x128xbf16> to vector<16x128xbf16>
      %105 = vector.shape_cast %102 : vector<16x128xbf16> to vector<1x1x16x128xbf16>
      tpu.vector_store %arg6[%c0_122, %c5, %c0_123, %c0_124], %105 {strides = array<i32>} : memref<1x16x16x128xbf16, #tpu.memory_space<vmem>>, vector<1x1x16x128xbf16>,
      %106 = vector.extract_strided_slice %81 {offsets = [144, 0], sizes = [16, 128], strides = [1, 1]} : vector<384x128xbf16> to vector<16x128xbf16>
      %c0_125 = arith.constant 0 : index
      %c6 = arith.constant 6 : index
      %c0_126 = arith.constant 0 : index
      %c0_127 = arith.constant 0 : index
      %107 = vector.load %arg6[%c0_125, %c6, %c0_126, %c0_127] : memref<1x16x16x128xbf16, #tpu.memory_space<vmem>>, vector<1x1x16x128xbf16>
      %108 = vector.shape_cast %107 : vector<1x1x16x128xbf16> to vector<16x128xbf16>
      %109 = vector.shape_cast %106 : vector<16x128xbf16> to vector<1x1x16x128xbf16>
      tpu.vector_store %arg6[%c0_125, %c6, %c0_126, %c0_127], %109 {strides = array<i32>} : memref<1x16x16x128xbf16, #tpu.memory_space<vmem>>, vector<1x1x16x128xbf16>,
      %110 = vector.extract_strided_slice %81 {offsets = [168, 0], sizes = [16, 128], strides = [1, 1]} : vector<384x128xbf16> to vector<16x128xbf16>
      %c0_128 = arith.constant 0 : index
      %c7 = arith.constant 7 : index
      %c0_129 = arith.constant 0 : index
      %c0_130 = arith.constant 0 : index
      %111 = vector.load %arg6[%c0_128, %c7, %c0_129, %c0_130] : memref<1x16x16x128xbf16, #tpu.memory_space<vmem>>, vector<1x1x16x128xbf16>
      %112 = vector.shape_cast %111 : vector<1x1x16x128xbf16> to vector<16x128xbf16>
      %113 = vector.shape_cast %110 : vector<16x128xbf16> to vector<1x1x16x128xbf16>
      tpu.vector_store %arg6[%c0_128, %c7, %c0_129, %c0_130], %113 {strides = array<i32>} : memref<1x16x16x128xbf16, #tpu.memory_space<vmem>>, vector<1x1x16x128xbf16>,
      %114 = vector.extract_strided_slice %81 {offsets = [192, 0], sizes = [16, 128], strides = [1, 1]} : vector<384x128xbf16> to vector<16x128xbf16>
      %c0_131 = arith.constant 0 : index
      %c8 = arith.constant 8 : index
      %c0_132 = arith.constant 0 : index
      %c0_133 = arith.constant 0 : index
      %115 = vector.load %arg6[%c0_131, %c8, %c0_132, %c0_133] : memref<1x16x16x128xbf16, #tpu.memory_space<vmem>>, vector<1x1x16x128xbf16>
      %116 = vector.shape_cast %115 : vector<1x1x16x128xbf16> to vector<16x128xbf16>
      %117 = vector.shape_cast %114 : vector<16x128xbf16> to vector<1x1x16x128xbf16>
      tpu.vector_store %arg6[%c0_131, %c8, %c0_132, %c0_133], %117 {strides = array<i32>} : memref<1x16x16x128xbf16, #tpu.memory_space<vmem>>, vector<1x1x16x128xbf16>,
      %118 = vector.extract_strided_slice %81 {offsets = [216, 0], sizes = [16, 128], strides = [1, 1]} : vector<384x128xbf16> to vector<16x128xbf16>
      %c0_134 = arith.constant 0 : index
      %c9 = arith.constant 9 : index
      %c0_135 = arith.constant 0 : index
      %c0_136 = arith.constant 0 : index
      %119 = vector.load %arg6[%c0_134, %c9, %c0_135, %c0_136] : memref<1x16x16x128xbf16, #tpu.memory_space<vmem>>, vector<1x1x16x128xbf16>
      %120 = vector.shape_cast %119 : vector<1x1x16x128xbf16> to vector<16x128xbf16>
      %121 = vector.shape_cast %118 : vector<16x128xbf16> to vector<1x1x16x128xbf16>
      tpu.vector_store %arg6[%c0_134, %c9, %c0_135, %c0_136], %121 {strides = array<i32>} : memref<1x16x16x128xbf16, #tpu.memory_space<vmem>>, vector<1x1x16x128xbf16>,
      %122 = vector.extract_strided_slice %81 {offsets = [240, 0], sizes = [16, 128], strides = [1, 1]} : vector<384x128xbf16> to vector<16x128xbf16>
      %c0_137 = arith.constant 0 : index
      %c10 = arith.constant 10 : index
      %c0_138 = arith.constant 0 : index
      %c0_139 = arith.constant 0 : index
      %123 = vector.load %arg6[%c0_137, %c10, %c0_138, %c0_139] : memref<1x16x16x128xbf16, #tpu.memory_space<vmem>>, vector<1x1x16x128xbf16>
      %124 = vector.shape_cast %123 : vector<1x1x16x128xbf16> to vector<16x128xbf16>
      %125 = vector.shape_cast %122 : vector<16x128xbf16> to vector<1x1x16x128xbf16>
      tpu.vector_store %arg6[%c0_137, %c10, %c0_138, %c0_139], %125 {strides = array<i32>} : memref<1x16x16x128xbf16, #tpu.memory_space<vmem>>, vector<1x1x16x128xbf16>,
      %126 = vector.extract_strided_slice %81 {offsets = [264, 0], sizes = [16, 128], strides = [1, 1]} : vector<384x128xbf16> to vector<16x128xbf16>
      %c0_140 = arith.constant 0 : index
      %c11 = arith.constant 11 : index
      %c0_141 = arith.constant 0 : index
      %c0_142 = arith.constant 0 : index
      %127 = vector.load %arg6[%c0_140, %c11, %c0_141, %c0_142] : memref<1x16x16x128xbf16, #tpu.memory_space<vmem>>, vector<1x1x16x128xbf16>
      %128 = vector.shape_cast %127 : vector<1x1x16x128xbf16> to vector<16x128xbf16>
      %129 = vector.shape_cast %126 : vector<16x128xbf16> to vector<1x1x16x128xbf16>
      tpu.vector_store %arg6[%c0_140, %c11, %c0_141, %c0_142], %129 {strides = array<i32>} : memref<1x16x16x128xbf16, #tpu.memory_space<vmem>>, vector<1x1x16x128xbf16>,
      %130 = vector.extract_strided_slice %81 {offsets = [288, 0], sizes = [16, 128], strides = [1, 1]} : vector<384x128xbf16> to vector<16x128xbf16>
      %c0_143 = arith.constant 0 : index
      %c12 = arith.constant 12 : index
      %c0_144 = arith.constant 0 : index
      %c0_145 = arith.constant 0 : index
      %131 = vector.load %arg6[%c0_143, %c12, %c0_144, %c0_145] : memref<1x16x16x128xbf16, #tpu.memory_space<vmem>>, vector<1x1x16x128xbf16>
      %132 = vector.shape_cast %131 : vector<1x1x16x128xbf16> to vector<16x128xbf16>
      %133 = vector.shape_cast %130 : vector<16x128xbf16> to vector<1x1x16x128xbf16>
      tpu.vector_store %arg6[%c0_143, %c12, %c0_144, %c0_145], %133 {strides = array<i32>} : memref<1x16x16x128xbf16, #tpu.memory_space<vmem>>, vector<1x1x16x128xbf16>,
      %134 = vector.extract_strided_slice %81 {offsets = [312, 0], sizes = [16, 128], strides = [1, 1]} : vector<384x128xbf16> to vector<16x128xbf16>
      %c0_146 = arith.constant 0 : index
      %c13 = arith.constant 13 : index
      %c0_147 = arith.constant 0 : index
      %c0_148 = arith.constant 0 : index
      %135 = vector.load %arg6[%c0_146, %c13, %c0_147, %c0_148] : memref<1x16x16x128xbf16, #tpu.memory_space<vmem>>, vector<1x1x16x128xbf16>
      %136 = vector.shape_cast %135 : vector<1x1x16x128xbf16> to vector<16x128xbf16>
      %137 = vector.shape_cast %134 : vector<16x128xbf16> to vector<1x1x16x128xbf16>
      tpu.vector_store %arg6[%c0_146, %c13, %c0_147, %c0_148], %137 {strides = array<i32>} : memref<1x16x16x128xbf16, #tpu.memory_space<vmem>>, vector<1x1x16x128xbf16>,
      %138 = vector.extract_strided_slice %81 {offsets = [336, 0], sizes = [16, 128], strides = [1, 1]} : vector<384x128xbf16> to vector<16x128xbf16>
      %c0_149 = arith.constant 0 : index
      %c14 = arith.constant 14 : index
      %c0_150 = arith.constant 0 : index
      %c0_151 = arith.constant 0 : index
      %139 = vector.load %arg6[%c0_149, %c14, %c0_150, %c0_151] : memref<1x16x16x128xbf16, #tpu.memory_space<vmem>>, vector<1x1x16x128xbf16>
      %140 = vector.shape_cast %139 : vector<1x1x16x128xbf16> to vector<16x128xbf16>
      %141 = vector.shape_cast %138 : vector<16x128xbf16> to vector<1x1x16x128xbf16>
      tpu.vector_store %arg6[%c0_149, %c14, %c0_150, %c0_151], %141 {strides = array<i32>} : memref<1x16x16x128xbf16, #tpu.memory_space<vmem>>, vector<1x1x16x128xbf16>,
      %142 = vector.extract_strided_slice %81 {offsets = [360, 0], sizes = [16, 128], strides = [1, 1]} : vector<384x128xbf16> to vector<16x128xbf16>
      %c0_152 = arith.constant 0 : index
      %c15 = arith.constant 15 : index
      %c0_153 = arith.constant 0 : index
      %c0_154 = arith.constant 0 : index
      %143 = vector.load %arg6[%c0_152, %c15, %c0_153, %c0_154] : memref<1x16x16x128xbf16, #tpu.memory_space<vmem>>, vector<1x1x16x128xbf16>
      %144 = vector.shape_cast %143 : vector<1x1x16x128xbf16> to vector<16x128xbf16>
      %145 = vector.shape_cast %142 : vector<16x128xbf16> to vector<1x1x16x128xbf16>
      tpu.vector_store %arg6[%c0_152, %c15, %c0_153, %c0_154], %145 {strides = array<i32>} : memref<1x16x16x128xbf16, #tpu.memory_space<vmem>>, vector<1x1x16x128xbf16>,
    } else {
    }
    return
  }
  func.func @transform_0(%arg0: i32, %arg1: i32, %arg2: i32) -> (i32, i32, i32) {
    %c0_i32 = arith.constant 0 : i32
    %c0_i32_0 = arith.constant 0 : i32
    return %arg0, %c0_i32, %arg2 : i32, i32, i32
  }
  func.func @transform_1(%arg0: i32, %arg1: i32, %arg2: i32) -> (i32, i32, i32, i32) {
    %c0_i32 = arith.constant 0 : i32
    %c0_i32_0 = arith.constant 0 : i32
    %c0_i32_1 = arith.constant 0 : i32
    return %c0_i32, %c0_i32_0, %arg2, %arg1 : i32, i32, i32, i32
  }
  func.func @transform_2(%arg0: i32, %arg1: i32, %arg2: i32) -> (i32, i32) {
    %c0_i32 = arith.constant 0 : i32
    %c0_i32_0 = arith.constant 0 : i32
    return %c0_i32, %arg1 : i32, i32
  }
  func.func @transform_3(%arg0: i32, %arg1: i32, %arg2: i32) -> (i32, i32, i32, i32) {
    %c0_i32 = arith.constant 0 : i32
    %c0_i32_0 = arith.constant 0 : i32
    %c0_i32_1 = arith.constant 0 : i32
    return %arg0, %c0_i32, %c0_i32_0, %arg1 : i32, i32, i32, i32
  }
}

</mosaic_0001>

<bundles_post_ra>
// kernel: _lambda_.1
= control target key start
LH: loop header
LB: loop body
LE: loop exit
PB: predicated region body
PF: predicated region fallthrough
CT: control target
= control target key end

     0   :  { %8 = vsyncpa [#allocation4], 0  ;;  %s8831_s0 = inlined_call_operand.vmem [shape: bf16[2,456,32], index: 0, kind: input, shape index: {}]   ;;  %s8832_s1 = inlined_call_operand.vmem [shape: bf16[3,3,32,128], index: 1, kind: input, shape index: {}]   ;;  %s8833_s2 = inlined_call_operand.vmem [shape: f32[1,128], index: 2, kind: input, shape index: {}]   ;;  %s8834_s3 = inlined_call_operand.hbm [shape: bf16[2,16,16,128], index: 3, kind: output, shape index: {}]  }
   0x1   :  { %10 = vsyncpa [#allocation4 + $0x1], 0  ;;  %s7836_s12 = smov 0   ;;  %s7838_s13 = smov 0  }
   0x2   :  { %s7840_s14 = smov 0   ;;  %s7842_s15 = smov 0  }
   0x3   :  { %s7844_s16 = smov 0   ;;  %s7846_s17 = smov 0  }
   0x4 LB: > { %s6110_s18 = sadd.s32 4294967295, %s7812_s17   ;;  %s6111_s19 = sadd.s32 4294967294, %s7812_s17   ;;  %s7812_s17 = sphi %s7846_s17, %s16_s17   ;;  %s7808_s16 = sphi %s7844_s16, %s8841_s16   ;;  %s7804_s15 = sphi %s7842_s15, %s8840_s15   ;;  %s7800_s14 = sphi %s7840_s14, %s8839_s14   ;;  %s7796_s13 = sphi %s7838_s13, %s8838_s13   ;;  %s7792_s12 = sphi %s7836_s12, %s8837_s12  }
   0x5   : > { %s35_s20 = sadd.s32 1, %s7808_s16  ;;  %s126_s21 = sadd.s32 1, %s7800_s14 }
   0x6   : > { %p37_p0 = scmp.ge.s32.totalorder %s35_s20, 2  ;;  %p136_p1 = scmp.ne.s32.totalorder %s7800_s14, %s7796_s13 }
   0x7   : > { %p137_p2 = scmp.eq.s32.totalorder %s6110_s18, 1  ;;  %p142_p3 = scmp.ne.s32.totalorder %s7796_s13, %s7792_s12 }
   0x8   : > { %s8843_s20 = smov (%p37_p0, %s35_s20), 0  ;;  %p143_p5 = scmp.eq.s32.totalorder %s6111_s19, 1 }
   0x9   : > { %p7876_p4 = por %p137_p2, %p136_p1  ;;  %s121_s23 = ssub.s32 %s7808_s16, %s8843_s20 }
   0xa   : > { %p6116_p6 = scmp.ge.s32.totalorder %s7812_s17, 1  ;;  %p124_p7 = scmp.eq.s32.totalorder %s121_s23, 0 }
   0xb   : > { %p7883_p8 = por %p143_p5, %p142_p3  ;;  %p190_p9 = scmp.lt.s32.totalorder %s7812_s17, 3 }
   0xc   : > { %s7889_s25 = scalar_select %p124_p7, %s7800_s14, %s126_s21  }
   0xd   : > { %p191_p10 = pnand %p6116_p6, %p190_p9 }
   0xe   : > { %p228_p11 = scmp.lt.s32.totalorder (!%p191_p10), %s7804_s15, 1  ;;  %s225_s18 = sand.u32 (!%p191_p10), 1, %s7796_s13  }
   0xf   : > { %194 = sbr.rel (%p191_p10) target bundleno = 1022 (0x3fe), region = 32  ;;  %s6117_s19 = sshll.u32 (!%p191_p10), %s225_s18, 7 }
  0x10   : > { %s8592_s21 = scalar_lea.vmem (!%p191_p10), [#allocation3], %s6117_s19  ;;  %s7754_s7 = scalar_lea.hbm (!%p191_p10), %s8834_s3, 256 }
  0x11   : > { %s5996_s28 = sshll.u32 (!%p191_p10), %s8592_s21, 4  ;;  %s5997_s28 = int_to_ptr.vmem [resolvable:$true] %s5996_s28 }
  0x14   : > { %v7363_v0 = vld [vmem:[%s8832_s1 + $0x8] sm:$0xff]  ;;  %v7362_v1 = vld [vmem:[%s8832_s1] sm:$0xff]  ;;  %s229_s30 = scalar_select %p228_p11, %s7804_s15, 1  ;;  %v7441_v3 = vld [vmem:[%s8832_s1 + $0x38] sm:$0xff]  ;;  %vm537_vm0 = vcmask 261120   ;;  %vm1791_vm2 = vcmask 1046528  }
  0x15   : > { %7668 = vmatpush.bf16.msra.mxu1 %v7363_v0  ;;  %7669 = vmatpush.bf16.msra.mxu2 %v7363_v0  ;;  %v7415_v2 = vld [vmem:[%s8832_s1 + $0x28] sm:$0xff]  ;;  %v7389_v4 = vld [vmem:[%s8832_s1 + $0x18] sm:$0xff]  ;;  %v7414_v14 = vld [vmem:[%s8832_s1 + $0x20] sm:$0xff]  ;;  %vm1060_vm1 = vsmask.f32 7424 }
  0x16   : > { %7670 = vmatpush.bf16.msra.mxu3 %v7363_v0  ;;  %616 = vmatpush.bf16.msra.mxu0 %v7363_v0  ;;  %s7674_s4 = smul.u32 228, %s229_s30  ;;  %v7467_v5 = vld [vmem:[%s8832_s1 + $0x48] sm:$0xff]  ;;  %v7440_v15 = vld [vmem:[%s8832_s1 + $0x30] sm:$0xff]  ;;  %v7466_v17 = vld [vmem:[%s8832_s1 + $0x40] sm:$0xff] }
  0x17   : > { %v7388_v16 = vld [vmem:[%s8832_s1 + $0x10] sm:$0xff]  ;;  %v7519_v30 = vld [vmem:[%s8832_s1 + $0x68] sm:$0xff]  ;;  %v7545_v31 = vld [vmem:[%s8832_s1 + $0x78] sm:$0xff] }
  0x18   : > { %s7908_s11 = scalar_lea.vmem %s8831_s0, %s7674_s4  ;;  %v7493_v32 = vld [vmem:[%s8832_s1 + $0x58] sm:$0xff]  ;;  %v7571_v33 = vld [vmem:[%s8832_s1 + $0x88] sm:$0xff] }
  0x19   : > { %7671 = vmatpush.bf16.msra.mxu1 %v7362_v1  ;;  %7672 = vmatpush.bf16.msra.mxu2 %v7362_v1  ;;  %v7344_v6 = vld [vmem:[%s7908_s11 + $0x30] sm:$0xff]  ;;  %v7350_v7 = vld [vmem:[%s7908_s11 + $0x60] sm:$0xff]  ;;  %v7345_v10 = vld [vmem:[%s7908_s11 + $0x38] sm:$0xff] }
  0x1a   : > { %7673 = vmatpush.bf16.msra.mxu3 %v7362_v1  ;;  %617 = vmatpush.bf16.msra.mxu0 %v7362_v1  ;;  %v7356_v8 = vld [vmem:[%s7908_s11 + $0x90] sm:$0xff]  ;;  %v7338_v9 = vld [vmem:[%s7908_s11] sm:$0xff]  ;;  %v7351_v11 = vld [vmem:[%s7908_s11 + $0x68] sm:$0xff] }
  0x1b   : > { %v7357_v12 = vld [vmem:[%s7908_s11 + $0x98] sm:$0xff]  ;;  %v7339_v13 = vld [vmem:[%s7908_s11 + $0x8] sm:$0xff]  ;;  %v7346_v18 = vld [vmem:[%s7908_s11 + $0x40] sm:$0xff] }
  0x1c   : > { %6229 = vmatmul.msk.bf16.vlgmr.msra.gmra.mxu1 %vm537_vm0, %v7344_v6  ;;  %6235 = vmatmul.msk.bf16.vlgmr.msra.gmra.mxu2 %vm537_vm0, %v7350_v7  ;;  %v7352_v19 = vld [vmem:[%s7908_s11 + $0x70] sm:$0xff]  ;;  %v7358_v20 = vld [vmem:[%s7908_s11 + $0xa0] sm:$0xff]  ;;  %v7347_v22 = vld [vmem:[%s7908_s11 + $0x48] sm:$0xff] }
  0x1d   : > { %1931 = vmatpush.bf16.msrb.mxu2 %v7415_v2  ;;  %6241 = vmatmul.msk.bf16.vlgmr.msra.gmra.mxu3 %vm537_vm0, %v7356_v8  ;;  %v7340_v21 = vld [vmem:[%s7908_s11 + $0x10] sm:$0xff]  ;;  %v7353_v23 = vld [vmem:[%s7908_s11 + $0x78] sm:$0xff]  ;;  %v7359_v24 = vld [vmem:[%s7908_s11 + $0xa8] sm:$0xff] }
  0x1e   : > { %2461 = vmatpush.bf16.msrb.mxu3 %v7441_v3  ;;  %6223 = vmatmul.msk.bf16.vlgmr.msra.gmra.mxu0 %vm537_vm0, %v7338_v9  ;;  %v7341_v25 = vld [vmem:[%s7908_s11 + $0x18] sm:$0xff]  ;;  %v7348_v26 = vld [vmem:[%s7908_s11 + $0x50] sm:$0xff]  ;;  %v7354_v27 = vld [vmem:[%s7908_s11 + $0x80] sm:$0xff] }
  0x1f   : > { %1347 = vmatpush.bf16.msrb.mxu1 %v7389_v4  ;;  %3191 = vmatpush.bf16.msrb.mxu0 %v7467_v5  ;;  %v7360_v28 = vld [vmem:[%s7908_s11 + $0xb0] sm:$0xff]  ;;  %v7342_v29 = vld [vmem:[%s7908_s11 + $0x20] sm:$0xff]  ;;  %v7349_v34 = vld [vmem:[%s7908_s11 + $0x58] sm:$0xff] }
  0x20   : > { %v7355_v35 = vld [vmem:[%s7908_s11 + $0x88] sm:$0xff]  ;;  %v7361_v36 = vld [vmem:[%s7908_s11 + $0xb8] sm:$0xff]  ;;  %v7364_v38 = vld [vmem:[%s7908_s11] sm:$0xff] }
  0x21   : > { %1932 = vmatpush.bf16.msrb.mxu2 %v7414_v14  ;;  %v7343_v37 = vld [vmem:[%s7908_s11 + $0x28] sm:$0xff]  ;;  %v1064_v41 = vshll.u32 %v7364_v38, 16  ;;  %v6385_v42 = vld [vmem:[%s7908_s11] sm:$0xe]  ;;  %v7390_v43 = vld [vmem:[%s7908_s11] sm:$0xf0] }
  0x22   : > { %2462 = vmatpush.bf16.msrb.mxu3 %v7440_v15  ;;  %v7442_v39 = vld [vmem:[%s7908_s11 + $0xc] sm:$0xff]  ;;  %v7443_v44 = vld [vmem:[%s7908_s11 + $0x14] sm:$0xff]  ;;  %v1062_v46 = vshrl.u32 %v7364_v38, 16  ;;  %v6386_v50 = vor.u32 %v7390_v43, %v6385_v42  ;;  %v7444_v1 = vld [vmem:[%s7908_s11 + $0x1c] sm:$0xff] }
  0x23   : > { %1348 = vmatpush.bf16.msrb.mxu1 %v7388_v16  ;;  %3192 = vmatpush.bf16.msrb.mxu0 %v7466_v17  ;;  %v7365_v40 = vld [vmem:[%s7908_s11 + $0x8] sm:$0xff]  ;;  %v2908_v45 = vshll.u32 %v7442_v39, 16  ;;  %v1066_v47 = vrot.slane %v1064_v41, 1  ;;  %v2906_v51 = vshrl.u32 %v7442_v39, 16  ;;  %v2913_v53 = vshll.u32 %v7443_v44, 16  ;;  %v7366_v0 = vld [vmem:[%s7908_s11 + $0x10] sm:$0xff] }
  0x24   : > { %v1069_v48 = vshll.u32 %v7365_v40, 16  ;;  %v7391_v49 = vld [vmem:[%s7908_s11 + $0x8] sm:$0xff]  ;;  %v1792_v56 = vrot.slane %v6386_v50, 1  ;;  %v1073_v2 = vshrl.u32 %v7365_v40, 16  ;;  %v1077_v3 = vshll.u32 %v7366_v0, 16  ;;  %v7392_v4 = vld [vmem:[%s7908_s11 + $0x10] sm:$0xff] }
  0x25   : > { %4304 = vmatpush.bf16.msra.mxu2 %v7519_v30  ;;  %v2910_v52 = vrot.slane %v2908_v45, 1  ;;  %v1067_v54 = vor.u32 %v1066_v47, %v1062_v46  ;;  %v1793_v57 = vrot.slane %v7391_v49, 1  ;;  %v2915_v59 = vrot.slane %v2913_v53, 1  ;;  %v7416_v62 = vld [vmem:[%s7908_s11 + $0xc] sm:$0xff]  ;;  %v7417_v14 = vld [vmem:[%s7908_s11 + $0x14] sm:$0xff]  ;;  %v7445_v17 = vld [vmem:[%s7908_s11 + $0x24] sm:$0xff] }
  0x26   : > { %5034 = vmatpush.bf16.msra.mxu3 %v7545_v31  ;;  %v1071_v55 = vrot.slane %v1069_v48, 1  ;;  %v2917_v5 = vshrl.u32 %v7443_v44, 16  ;;  %v2921_v6 = vshll.u32 %v7444_v1, 16  ;;  %v1079_v8 = vrot.slane %v1077_v3, 1  ;;  %v7367_v16 = vld [vmem:[%s7908_s11 + $0x18] sm:$0xff]  ;;  %v7394_v41 = vld [vmem:[%s7908_s11 + $0x20] sm:$0xff] }
  0x27   : > { %3774 = vmatpush.bf16.msra.mxu1 %v7493_v32  ;;  %5617 = vmatpush.bf16.msra.mxu0 %v7571_v33  ;;  %v2911_v58 = vor.u32 %v2910_v52, %v2906_v51  ;;  %v1794_v61 = vsel %vm1791_vm2, %v1792_v56, %v1793_v57  ;;  %v1795_v9 = vrot.slane %v7392_v4, 1  ;;  %v7418_v31 = vld [vmem:[%s7908_s11 + $0x1c] sm:$0xff]  ;;  %v1089_v39 = vshrl.u32 %v7367_v16, 16 }
  0x28   : > { %v1072_v60 = vsel %vm1060_vm1, %v1067_v54, %v1071_v55  ;;  %v1075_v7 = vor.u32 %v1073_v2, %v1071_v55  ;;  %v2933_v43 = vshrl.u32 %v7445_v17, 16  ;;  %v1799_v47 = vrot.slane %v7394_v41, 1  ;;  %v7419_v55 = vld [vmem:[%s7908_s11 + $0x24] sm:$0xff] }
  0x29   : > { %v2916_v63 = vsel %vm1060_vm1, %v2911_v58, %v2915_v59  ;;  %v7369_v58 = vld [vmem:[%s7908_s11 + $0x28] sm:$0xff] }
  0x2c   : > { %6230 = vmatmul.msk.bf16.gmra.mxu1 %vm537_vm0, %v7345_v10  ;;  %6236 = vmatmul.msk.bf16.gmra.mxu2 %vm537_vm0, %v7351_v11  ;;  %v2919_v10 = vor.u32 %v2917_v5, %v2915_v59  ;;  %v2923_v11 = vrot.slane %v2921_v6, 1  ;;  %v7447_v59 = vld [vmem:[%s7908_s11 + $0x34] sm:$0xff] }
  0x2d   : > { %6242 = vmatmul.msk.bf16.gmra.mxu3 %vm537_vm0, %v7357_v12  ;;  %v1080_v12 = vsel %vm1060_vm1, %v1075_v7, %v1079_v8  ;;  %v2945_v4 = vshll.u32 %v7447_v59, 16 }
  0x2e   : > { %6224 = vmatmul.msk.bf16.gmra.mxu0 %vm537_vm0, %v7339_v13  ;;  %v1796_v13 = vsel %vm1791_vm2, %v1793_v57, %v1795_v9  ;;  %v2924_v15 = vsel %vm1060_vm1, %v2919_v10, %v2923_v11 }
  0x3c   : > { %6231 = vmatmul.msk.bf16.gmra.mxu1 %vm537_vm0, %v7346_v18  ;;  %6237 = vmatmul.msk.bf16.gmra.mxu2 %vm537_vm0, %v7352_v19  ;;  %v1081_v18 = vshrl.u32 %v7366_v0, 16  ;;  %v1085_v19 = vshll.u32 %v7367_v16, 16  ;;  %v1101_v0 = vshll.u32 %v7369_v58, 16 }
  0x3d   : > { %6243 = vmatmul.msk.bf16.gmra.mxu3 %vm537_vm0, %v7358_v20  ;;  %v7393_v20 = vld [vmem:[%s7908_s11 + $0x18] sm:$0xff] }
  0x3e   : > { %6225 = vmatmul.msk.bf16.gmra.mxu0 %vm537_vm0, %v7340_v21  ;;  %v2925_v21 = vshrl.u32 %v7444_v1, 16  ;;  %v7395_v1 = vld [vmem:[%s7908_s11 + $0x28] sm:$0xff]  ;;  %v1103_v6 = vrot.slane %v1101_v0, 1 }
  0x3f   : > { %v1801_v7 = vrot.slane %v7395_v1, 1 }
  0x4c   : > { %6232 = vmatmul.msk.bf16.gmra.mxu1 %vm537_vm0, %v7347_v22  ;;  %6238 = vmatmul.msk.bf16.gmra.mxu2 %vm537_vm0, %v7353_v23  ;;  %v2929_v22 = vshll.u32 %v7445_v17, 16  ;;  %v1083_v23 = vor.u32 %v1081_v18, %v1079_v8  ;;  %v7370_v18 = vld [vmem:[%s7908_s11 + $0x30] sm:$0xff] }
  0x4d   : > { %6244 = vmatmul.msk.bf16.gmra.mxu3 %vm537_vm0, %v7359_v24  ;;  %v1087_v24 = vrot.slane %v1085_v19, 1  ;;  %v7448_v19 = vld [vmem:[%s7908_s11 + $0x3c] sm:$0xff] }
  0x4e   : > { %6226 = vmatmul.msk.bf16.gmra.mxu0 %vm537_vm0, %v7341_v25  ;;  %v1797_v25 = vrot.slane %v7393_v20, 1 }
  0x4f   : > { %v1091_v45 = vor.u32 %v1089_v39, %v1087_v24 }
  0x50   : > { %v1798_v30 = vsel %vm1791_vm2, %v1795_v9, %v1797_v25  ;;  %v1800_v54 = vsel %vm1791_vm2, %v1797_v25, %v1799_v47  ;;  %v2947_v9 = vrot.slane %v2945_v4, 1  ;;  %v7396_v25 = vld [vmem:[%s7908_s11 + $0x30] sm:$0xff] }
  0x5c   : > { %6233 = vmatmul.msk.bf16.gmra.mxu1 %vm537_vm0, %v7348_v26  ;;  %6239 = vmatmul.msk.bf16.gmra.mxu2 %vm537_vm0, %v7354_v27  ;;  %v2927_v26 = vor.u32 %v2925_v21, %v2923_v11  ;;  %v2931_v27 = vrot.slane %v2929_v22, 1 }
  0x5d   : > { %6245 = vmatmul.msk.bf16.gmra.mxu3 %vm537_vm0, %v7360_v28 }
  0x5e   : > { %6227 = vmatmul.msk.bf16.gmra.mxu0 %vm537_vm0, %v7342_v29  ;;  %v1088_v29 = vsel %vm1060_vm1, %v1083_v23, %v1087_v24  ;;  %v2932_v33 = vsel %vm1060_vm1, %v2927_v26, %v2931_v27  ;;  %v2935_v48 = vor.u32 %v2933_v43, %v2931_v27  ;;  %v1105_v23 = vshrl.u32 %v7369_v58, 16 }
  0x5f   : > { %v1109_v24 = vshll.u32 %v7370_v18, 16  ;;  %v2949_v27 = vshrl.u32 %v7447_v59, 16  ;;  %v2957_v59 = vshrl.u32 %v7448_v19, 16 }
  0x6c   : > { %6234 = vmatmul.msk.bf16.gmra.mxu1 %vm537_vm0, %v7349_v34  ;;  %6240 = vmatmul.msk.bf16.gmra.mxu2 %vm537_vm0, %v7355_v35  ;;  %v7368_v34 = vld [vmem:[%s7908_s11 + $0x20] sm:$0xff]  ;;  %v7446_v35 = vld [vmem:[%s7908_s11 + $0x2c] sm:$0xff] }
  0x6d   : > { %6246 = vmatmul.msk.bf16.gmra.mxu3 %vm537_vm0, %v7361_v36  ;;  %v1093_v40 = vshll.u32 %v7368_v34, 16  ;;  %v2937_v44 = vshll.u32 %v7446_v35, 16  ;;  %v2941_v3 = vshrl.u32 %v7446_v35, 16 }
  0x6e   : > { %6228 = vmatmul.msk.bf16.gmra.mxu0 %vm537_vm0, %v7343_v37 }
  0x6f   : > { %v1095_v46 = vrot.slane %v1093_v40, 1  ;;  %v2939_v49 = vrot.slane %v2937_v44, 1 }
  0x71   : > { %v1096_v53 = vsel %vm1060_vm1, %v1091_v45, %v1095_v46  ;;  %v2940_v57 = vsel %vm1060_vm1, %v2935_v48, %v2939_v49  ;;  %v2943_v8 = vor.u32 %v2941_v3, %v2939_v49  ;;  %v7421_v45 = vld [vmem:[%s7908_s11 + $0x34] sm:$0xff]  ;;  %v7449_v49 = vld [vmem:[%s7908_s11 + $0x44] sm:$0xff] }
  0x72   : > { %v7371_v48 = vld [vmem:[%s7908_s11 + $0x38] sm:$0xff] }
  0x73   : > { %v2948_v17 = vsel %vm1060_vm1, %v2943_v8, %v2947_v9 }
  0x7c   : > { %6355 = vmatmul.msk.bf16.vlgmr.msrb.gmra.mxu1 %vm537_vm0, %v1072_v60  ;;  %6487 = vmatmul.msk.bf16.vlgmr.msrb.gmra.mxu2 %vm537_vm0, %v1794_v61 }
  0x7d   : > { %6619 = vmatmul.msk.bf16.vlgmr.msrb.gmra.mxu3 %vm537_vm0, %v7416_v62 }
  0x7e   : > { %6751 = vmatmul.msk.bf16.vlgmr.msrb.gmra.mxu0 %vm537_vm0, %v2916_v63  ;;  %v1097_v63 = vshrl.u32 %v7368_v34, 16  ;;  %v2951_v34 = vor.u32 %v2949_v27, %v2947_v9  ;;  %v7422_v9 = vld [vmem:[%s7908_s11 + $0x3c] sm:$0xff]  ;;  %v2965_v27 = vshrl.u32 %v7449_v49, 16 }
  0x80   : > { %v1099_v5 = vor.u32 %v1097_v63, %v1095_v46 }
  0x8c   : > { %6356 = vmatmul.msk.bf16.gmra.mxu1 %vm537_vm0, %v1080_v12  ;;  %6488 = vmatmul.msk.bf16.gmra.mxu2 %vm537_vm0, %v1796_v13  ;;  %v1104_v13 = vsel %vm1060_vm1, %v1099_v5, %v1103_v6 }
  0x8d   : > { %6620 = vmatmul.msk.bf16.gmra.mxu3 %vm537_vm0, %v7417_v14  ;;  %v1802_v14 = vsel %vm1791_vm2, %v1799_v47, %v1801_v7 }
  0x8e   : > { %6752 = vmatmul.msk.bf16.gmra.mxu0 %vm537_vm0, %v2924_v15  ;;  %v7420_v15 = vld [vmem:[%s7908_s11 + $0x2c] sm:$0xff] }
  0x99   : > { %v8017_v28 = vpop.f32.mrf.mxu1 }
  0x9b   : > { %v8022_v32 = vpop.f32.mrf.mxu0 }
  0x9c   : > { %6357 = vmatmul.msk.bf16.gmra.mxu1 %vm537_vm0, %v1088_v29  ;;  %6489 = vmatmul.msk.bf16.gmra.mxu2 %vm537_vm0, %v1798_v30  ;;  %v2953_v29 = vshll.u32 %v7448_v19, 16  ;;  %v1107_v30 = vor.u32 %v1105_v23, %v1103_v6  ;;  %v1121_v23 = vshrl.u32 %v7371_v48, 16 }
  0x9d   : > { %6621 = vmatmul.msk.bf16.gmra.mxu3 %vm537_vm0, %v7418_v31  ;;  %v1111_v31 = vrot.slane %v1109_v24, 1 }
  0x9e   : > { %6753 = vmatmul.msk.bf16.gmra.mxu0 %vm537_vm0, %v2932_v33  ;;  %v1803_v33 = vrot.slane %v7396_v25, 1  ;;  %v2955_v35 = vrot.slane %v2953_v29, 1  ;;  %v7398_v25 = vld [vmem:[%s7908_s11 + $0x40] sm:$0xff] }
  0x9f   : > { %v8031_v36 = vpop.f32.mrf.mxu2  ;;  %v1112_v43 = vsel %vm1060_vm1, %v1107_v30, %v1111_v31 }
  0xa0   : > { %v8033_v37 = vpop.f32.mrf.mxu3  ;;  %v1804_v44 = vsel %vm1791_vm2, %v1801_v7, %v1803_v33  ;;  %v2956_v47 = vsel %vm1060_vm1, %v2951_v34, %v2955_v35  ;;  %v2959_v1 = vor.u32 %v2957_v59, %v2955_v35 }
  0xa1   : > { %v8035_v38 = vpop.f32.mrf.mxu1 }
  0xa3   : > { %v8038_v42 = vpop.f32.mrf.mxu0 }
  0xa7   : > { %v8040_v50 = vpop.f32.mrf.mxu2 }
  0xa8   : > { %v8042_v51 = vpop.f32.mrf.mxu3 }
  0xa9   : > { %v654_v52 = vpop.f32.mrf.mxu1 }
  0xab   : > { %v624_v56 = vpop.f32.mrf.mxu0 }
  0xac   : > { %6358 = vmatmul.msk.bf16.gmra.mxu1 %vm537_vm0, %v1096_v53  ;;  %6490 = vmatmul.msk.bf16.gmra.mxu2 %vm537_vm0, %v1800_v54  ;;  %v1117_v56 = vshll.u32 %v7371_v48, 16 }
  0xad   : > { %6622 = vmatmul.msk.bf16.gmra.mxu3 %vm537_vm0, %v7419_v55  ;;  %v1113_v55 = vshrl.u32 %v7370_v18, 16 }
  0xae   : > { %6754 = vmatmul.msk.bf16.gmra.mxu0 %vm537_vm0, %v2940_v57  ;;  %v7397_v57 = vld [vmem:[%s7908_s11 + $0x38] sm:$0xff]  ;;  %v1119_v63 = vrot.slane %v1117_v56, 1 }
  0xaf   : > { %v684_v60 = vpop.f32.mrf.mxu2  ;;  %v1805_v0 = vrot.slane %v7397_v57, 1  ;;  %v7451_v56 = vld [vmem:[%s7908_s11 + $0x54] sm:$0xff] }
  0xb0   : > { %v714_v61 = vpop.f32.mrf.mxu3  ;;  %v2961_v60 = vshll.u32 %v7449_v49, 16  ;;  %v1123_v30 = vor.u32 %v1121_v23, %v1119_v63 }
  0xb1   : > { %v8054_v62 = vpop.f32.mrf.mxu1  ;;  %v1115_v61 = vor.u32 %v1113_v55, %v1111_v31  ;;  %v1806_v8 = vsel %vm1791_vm2, %v1803_v33, %v1805_v0  ;;  %v1807_v33 = vrot.slane %v7398_v25, 1  ;;  %v7373_v55 = vld [vmem:[%s7908_s11 + $0x48] sm:$0xff] }
  0xb2   : > { %v2963_v3 = vrot.slane %v2961_v60, 1 }
  0xb3   : > { %v8057_v2 = vpop.f32.mrf.mxu0  ;;  %v1120_v7 = vsel %vm1060_vm1, %v1115_v61, %v1119_v63  ;;  %v1133_v63 = vshll.u32 %v7373_v55, 16 }
  0xb4   : > { %v2967_v34 = vor.u32 %v2965_v27, %v2963_v3  ;;  %v7424_v27 = vld [vmem:[%s7908_s11 + $0x4c] sm:$0xff] }
  0xb7   : > { %v8059_v10 = vpop.f32.mrf.mxu2 }
  0xb8   : > { %v8061_v11 = vpop.f32.mrf.mxu3 }
  0xb9   : > { %v8063_v12 = vpop.f32.mrf.mxu1 }
  0xbb   : > { %v8068_v16 = vpop.f32.mrf.mxu0 }
  0xbc   : > { %6359 = vmatmul.msk.bf16.gmra.mxu1 %vm537_vm0, %v1104_v13  ;;  %6491 = vmatmul.msk.bf16.gmra.mxu2 %vm537_vm0, %v1802_v14  ;;  %v2964_v14 = vsel %vm1060_vm1, %v2959_v1, %v2963_v3 }
  0xbd   : > { %6623 = vmatmul.msk.bf16.gmra.mxu3 %vm537_vm0, %v7420_v15  ;;  %v7372_v15 = vld [vmem:[%s7908_s11 + $0x40] sm:$0xff] }
  0xbe   : > { %6755 = vmatmul.msk.bf16.gmra.mxu0 %vm537_vm0, %v2948_v17  ;;  %v7450_v17 = vld [vmem:[%s7908_s11 + $0x4c] sm:$0xff]  ;;  %v1125_v24 = vshll.u32 %v7372_v15, 16  ;;  %v1129_v61 = vshrl.u32 %v7372_v15, 16 }
  0xbf   : > { %v8077_v20 = vpop.f32.mrf.mxu2  ;;  %v2969_v29 = vshll.u32 %v7450_v17, 16  ;;  %v2973_v3 = vshrl.u32 %v7450_v17, 16 }
  0xc0   : > { %v8079_v21 = vpop.f32.mrf.mxu3  ;;  %v1127_v31 = vrot.slane %v1125_v24, 1 }
  0xc1   : > { %v661_v22 = vpop.f32.mrf.mxu1  ;;  %v2971_v35 = vrot.slane %v2969_v29, 1 }
  0xc3   : > { %v631_v26 = vpop.f32.mrf.mxu0  ;;  %v2972_v49 = vsel %vm1060_vm1, %v2967_v34, %v2971_v35  ;;  %v7452_v34 = vld [vmem:[%s7908_s11 + $0x5c] sm:$0xff] }
  0xc7   : > { %v691_v39 = vpop.f32.mrf.mxu2 }
  0xc8   : > { %v721_v40 = vpop.f32.mrf.mxu3 }
  0xc9   : > { %v8082_v41 = vpop.f32.mrf.mxu1 }
  0xcb   : > { %v8087_v46 = vpop.f32.mrf.mxu0 }
  0xcc   : > { %6360 = vmatmul.msk.bf16.gmra.mxu1 %vm537_vm0, %v1112_v43  ;;  %6492 = vmatmul.msk.bf16.gmra.mxu2 %vm537_vm0, %v1804_v44  ;;  %v1128_v44 = vsel %vm1060_vm1, %v1123_v30, %v1127_v31 }
  0xcd   : > { %6624 = vmatmul.msk.bf16.gmra.mxu3 %vm537_vm0, %v7421_v45  ;;  %v1808_v45 = vsel %vm1791_vm2, %v1805_v0, %v1807_v33  ;;  %v7399_v0 = vld [vmem:[%s7908_s11 + $0x48] sm:$0xff] }
  0xce   : > { %6756 = vmatmul.msk.bf16.gmra.mxu0 %vm537_vm0, %v2956_v47  ;;  %v7423_v47 = vld [vmem:[%s7908_s11 + $0x44] sm:$0xff] }
  0xcf   : > { %v8096_v52 = vpop.f32.mrf.mxu2 }
  0xd0   : > { %v8098_v53 = vpop.f32.mrf.mxu3 }
  0xd1   : > { %v8100_v54 = vpop.f32.mrf.mxu1 }
  0xd3   : > { %v8103_v58 = vpop.f32.mrf.mxu0 }
  0xd7   : > { %v8105_v4 = vpop.f32.mrf.mxu2 }
  0xd8   : > { %v8107_v5 = vpop.f32.mrf.mxu3 }
  0xd9   : > { %v669_v6 = vpop.f32.mrf.mxu1 }
  0xda   : > { %v2977_v6 = vshll.u32 %v7451_v56, 16 }
  0xdb   : > { %v639_v13 = vpop.f32.mrf.mxu0 }
  0xdc   : > { %6361 = vmatmul.msk.bf16.gmra.mxu1 %vm537_vm0, %v1120_v7  ;;  %6493 = vmatmul.msk.bf16.gmra.mxu2 %vm537_vm0, %v1806_v8  ;;  %v1131_v7 = vor.u32 %v1129_v61, %v1127_v31  ;;  %v1135_v8 = vrot.slane %v1133_v63, 1  ;;  %v8150_v13 = vld [vmem:[%s8833_s2] ss:$0 sm:$0xff]  ;;  %v7400_v61 = vld [vmem:[%s7908_s11 + $0x50] sm:$0xff] }
  0xdd   : > { %6625 = vmatmul.msk.bf16.gmra.mxu3 %vm537_vm0, %v7422_v9  ;;  %v1809_v9 = vrot.slane %v7399_v0, 1  ;;  %v739_v15 = vadd.f32 %v8150_v13, %v8022_v32  ;;  %v7374_v32 = vld [vmem:[%s7908_s11 + $0x50] sm:$0xff] }
  0xde   : > { %6757 = vmatmul.msk.bf16.gmra.mxu0 %vm537_vm0, %v2964_v14  ;;  %v2975_v14 = vor.u32 %v2973_v3, %v2971_v35  ;;  %v1136_v17 = vsel %vm1060_vm1, %v1131_v7, %v1135_v8  ;;  %v2981_v3 = vshrl.u32 %v7451_v56, 16 }
  0xdf   : > { %v699_v18 = vpop.f32.mrf.mxu2  ;;  %v1810_v25 = vsel %vm1791_vm2, %v1807_v33, %v1809_v9  ;;  %v740_v33 = vadd.f32 %v8150_v13, %v8038_v42 }
  0xe0   : > { %v729_v19 = vpop.f32.mrf.mxu3  ;;  %v2979_v18 = vrot.slane %v2977_v6, 1  ;;  %v2985_v6 = vshll.u32 %v7452_v34, 16 }
  0xe1   : > { %v8119_v22 = vpop.f32.mrf.mxu1 }
  0xe2   : > { %v2980_v31 = vsel %vm1060_vm1, %v2975_v14, %v2979_v18 }
  0xe3   : > { %v8122_v26 = vpop.f32.mrf.mxu0 }
  0xe7   : > { %v8124_v39 = vpop.f32.mrf.mxu2 }
  0xe8   : > { %v8126_v40 = vpop.f32.mrf.mxu3 }
  0xe9   : > { %v8128_v43 = vpop.f32.mrf.mxu1 }
  0xeb   : > { %v8133_v48 = vpop.f32.mrf.mxu0 }
  0xec   : > { %6362 = vmatmul.msk.bf16.gmra.mxu1 %vm537_vm0, %v1128_v44  ;;  %6494 = vmatmul.msk.bf16.gmra.mxu2 %vm537_vm0, %v1808_v45 }
  0xed   : > { %6626 = vmatmul.msk.bf16.gmra.mxu3 %vm537_vm0, %v7423_v47 }
  0xee   : > { %6758 = vmatmul.msk.bf16.gmra.mxu0 %vm537_vm0, %v2972_v49  ;;  %v1137_v49 = vshrl.u32 %v7373_v55, 16 }
  0xef   : > { %v8142_v57 = vpop.f32.mrf.mxu2 }
  0xf0   : > { %v8144_v59 = vpop.f32.mrf.mxu3  ;;  %v1139_v14 = vor.u32 %v1137_v49, %v1135_v8  ;;  %v1145_v49 = vshrl.u32 %v7374_v32, 16 }
  0xf1   : > { %v676_v60 = vpop.f32.mrf.mxu1 }
  0xf2   : > { %v1141_v60 = vshll.u32 %v7374_v32, 16 }
  0xf3   : > { %v646_v1 = vpop.f32.mrf.mxu0 }
  0xf7   : > { %v706_v19 = vpop.f32.mrf.mxu2 }
  0xf8   : > { %v736_v23 = vpop.f32.mrf.mxu3  ;;  %v1143_v19 = vrot.slane %v1141_v60, 1 }
  0xf9   : > { %v1350_v24 = vpop.f32.mrf.mxu1  ;;  %v2983_v23 = vor.u32 %v2981_v3, %v2979_v18 }
  0xfa   : > { %v1470_v29 = vadd.f32 %v1350_v24, %v739_v15  ;;  %v1811_v15 = vrot.slane %v7400_v61, 1  ;;  %v2987_v24 = vrot.slane %v2985_v6, 1  ;;  %v7401_v61 = vld [vmem:[%s7908_s11 + $0x58] sm:$0xff]  ;;  %v1147_v6 = vor.u32 %v1145_v49, %v1143_v19 }
  0xfb   : > { %v3194_v30 = vpop.f32.mrf.mxu0 }
  0xfc   : > { %6363 = vmatmul.msk.bf16.gmra.mxu1 %vm537_vm0, %v1136_v17  ;;  %6495 = vmatmul.msk.bf16.gmra.mxu2 %vm537_vm0, %v1810_v25  ;;  %v2988_v8 = vsel %vm1060_vm1, %v2983_v23, %v2987_v24  ;;  %v1813_v23 = vrot.slane %v7401_v61, 1 }
  0xfd   : > { %6627 = vmatmul.msk.bf16.gmra.mxu3 %vm537_vm0, %v7424_v27  ;;  %v1144_v27 = vsel %vm1060_vm1, %v1139_v14, %v1143_v19 }
  0xfe   : > { %6759 = vmatmul.msk.bf16.gmra.mxu0 %vm537_vm0, %v2980_v31  ;;  %v7425_v31 = vld [vmem:[%s7908_s11 + $0x54] sm:$0xff] }
  0xff   : > { %v1934_v35 = vpop.f32.mrf.mxu2 }
 0x100   : > { %v2054_v44 = vadd.f32 %v1934_v35, %v1470_v29  ;;  %v2464_v45 = vpop.f32.mrf.mxu3  ;;  %v1812_v29 = vsel %vm1791_vm2, %v1809_v9, %v1811_v15  ;;  %v7375_v35 = vld [vmem:[%s7908_s11 + $0x58] sm:$0xff]  ;;  %v742_v9 = vadd.f32 %v8150_v13, %v8057_v2 }
 0x101   : > { %v1352_v47 = vpop.f32.mrf.mxu1  ;;  %v1149_v60 = vshll.u32 %v7375_v35, 16 }
 0x102   : > { %v2584_v63 = vadd.f32 %v2464_v45, %v2054_v44  ;;  %v1471_v0 = vadd.f32 %v1352_v47, %v740_v33  ;;  %v7453_v33 = vld [vmem:[%s7908_s11 + $0x64] sm:$0xff] }
 0x103   : > { %v3196_v1 = vpop.f32.mrf.mxu0  ;;  %v2993_v3 = vshll.u32 %v7453_v33, 16  ;;  %v1151_v14 = vrot.slane %v1149_v60, 1  ;;  %v7492_v60 = vld [vmem:[%s8832_s1 + $0x50] sm:$0xff] }
 0x104   : > { %v8167_v7 = vadd.f32 %v3194_v30, %v2584_v63  ;;  %3775 = vmatpush.bf16.msra.mxu1 %v7492_v60 }
 0x107   : > { %v1936_v42 = vpop.f32.mrf.mxu2 }
 0x108   : > { %v2055_v17 = vadd.f32 %v1936_v42, %v1471_v0  ;;  %v2466_v55 = vpop.f32.mrf.mxu3 }
 0x109   : > { %v1355_v25 = vpop.f32.mrf.mxu1 }
 0x10a   : > { %v2585_v56 = vadd.f32 %v2466_v55, %v2055_v17  ;;  %v2995_v17 = vrot.slane %v2993_v3, 1  ;;  %v743_v25 = vadd.f32 %v8150_v13, %v8068_v16 }
 0x10b   : > { %v3199_v30 = vpop.f32.mrf.mxu0 }
 0x10c   : > { %6364 = vmatmul.msk.bf16.gmra.mxu1 %vm537_vm0, %v1144_v27  ;;  %6496 = vmatmul.msk.bf16.gmra.mxu2 %vm537_vm0, %v1812_v29  ;;  %v8175_v18 = vadd.f32 %v3196_v1, %v2585_v56  ;;  %v2989_v1 = vshrl.u32 %v7452_v34, 16  ;;  %v1152_v29 = vsel %vm1060_vm1, %v1147_v6, %v1151_v14  ;;  %v7426_v34 = vld [vmem:[%s7908_s11 + $0x5c] sm:$0xff] }
 0x10d   : > { %6628 = vmatmul.msk.bf16.gmra.mxu3 %vm537_vm0, %v7425_v31  ;;  %v1814_v31 = vsel %vm1791_vm2, %v1811_v15, %v1813_v23  ;;  %v7518_v15 = vld [vmem:[%s8832_s1 + $0x60] sm:$0xff] }
 0x10e   : > { %6760 = vmatmul.msk.bf16.gmra.mxu0 %vm537_vm0, %v2988_v8  ;;  %v2991_v42 = vor.u32 %v2989_v1, %v2987_v24  ;;  %v7376_v8 = vld [vmem:[%s7908_s11 + $0x60] sm:$0xff]  ;;  %4305 = vmatpush.bf16.msra.mxu2 %v7518_v15 }
 0x10f   : > { %v1939_v44 = vpop.f32.mrf.mxu2  ;;  %v7402_v1 = vld [vmem:[%s7908_s11 + $0x60] sm:$0xff] }
 0x110   : > { %v2469_v45 = vpop.f32.mrf.mxu3  ;;  %v2996_v24 = vsel %vm1060_vm1, %v2991_v42, %v2995_v17  ;;  %v7544_v44 = vld [vmem:[%s8832_s1 + $0x70] sm:$0xff]  ;;  %v2997_v42 = vshrl.u32 %v7453_v33, 16  ;;  %v745_v33 = vadd.f32 %v8150_v13, %v8087_v46  ;;  %v7377_v46 = vld [vmem:[%s7908_s11 + $0x68] sm:$0xff] }
 0x111   : > { %v1357_v47 = vpop.f32.mrf.mxu1  ;;  %5035 = vmatpush.bf16.msra.mxu3 %v7544_v44  ;;  %v7427_v44 = vld [vmem:[%s7908_s11 + $0x64] sm:$0xff] }
 0x112   : > { %v1473_v63 = vadd.f32 %v1357_v47, %v742_v9  ;;  %v7454_v9 = vld [vmem:[%s7908_s11 + $0x6c] sm:$0xff] }
 0x113   : > { %v3201_v0 = vpop.f32.mrf.mxu0 }
 0x117   : > { %v1941_v55 = vpop.f32.mrf.mxu2 }
 0x118   : > { %v2057_v2 = vadd.f32 %v1941_v55, %v1473_v63  ;;  %v2471_v27 = vpop.f32.mrf.mxu3  ;;  %v1153_v63 = vshrl.u32 %v7375_v35, 16  ;;  %v3001_v55 = vshll.u32 %v7454_v9, 16 }
 0x119   : > { %v1360_v32 = vpop.f32.mrf.mxu1 }
 0x11a   : > { %v2587_v56 = vadd.f32 %v2471_v27, %v2057_v2  ;;  %v1474_v19 = vadd.f32 %v1360_v32, %v743_v25  ;;  %v7570_v25 = vld [vmem:[%s8832_s1 + $0x80] sm:$0xff]  ;;  %v1155_v27 = vor.u32 %v1153_v63, %v1151_v14  ;;  %v3003_v35 = vrot.slane %v3001_v55, 1 }
 0x11b   : > { %v3204_v30 = vpop.f32.mrf.mxu0  ;;  %5618 = vmatpush.bf16.msra.mxu0 %v7570_v25  ;;  %v1161_v63 = vshrl.u32 %v7376_v8, 16  ;;  %v3005_v55 = vshrl.u32 %v7454_v9, 16 }
 0x11c   : > { %6365 = vmatmul.msk.bf16.gmra.mxu1 %vm537_vm0, %v1152_v29  ;;  %6497 = vmatmul.msk.bf16.gmra.mxu2 %vm537_vm0, %v1814_v31  ;;  %v8192_v16 = vadd.f32 %v3201_v0, %v2587_v56  ;;  %v1157_v0 = vshll.u32 %v7376_v8, 16  ;;  %v1815_v29 = vrot.slane %v7402_v1, 1  ;;  %v2999_v31 = vor.u32 %v2997_v42, %v2995_v17  ;;  %v7455_v17 = vld [vmem:[%s7908_s11 + $0x74] sm:$0xff]  ;;  %v7403_v1 = vld [vmem:[%s7908_s11 + $0x68] sm:$0xff] }
 0x11d   : > { %6629 = vmatmul.msk.bf16.gmra.mxu3 %vm537_vm0, %v7426_v34  ;;  %v3009_v25 = vshll.u32 %v7455_v17, 16 }
 0x11e   : > { %6761 = vmatmul.msk.bf16.gmra.mxu0 %vm537_vm0, %v2996_v24  ;;  %v1159_v32 = vrot.slane %v1157_v0, 1  ;;  %v1816_v15 = vsel %vm1791_vm2, %v1813_v23, %v1815_v29  ;;  %v746_v23 = vadd.f32 %v8150_v13, %v8103_v58  ;;  %v1165_v0 = vshll.u32 %v7377_v46, 16 }
 0x11f   : > { %v1944_v45 = vpop.f32.mrf.mxu2 }
 0x120   : > { %v2058_v47 = vadd.f32 %v1944_v45, %v1474_v19  ;;  %v2474_v49 = vpop.f32.mrf.mxu3  ;;  %v1160_v24 = vsel %vm1060_vm1, %v1155_v27, %v1159_v32  ;;  %v3004_v45 = vsel %vm1060_vm1, %v2999_v31, %v3003_v35  ;;  %v1163_v31 = vor.u32 %v1161_v63, %v1159_v32 }
 0x121   : > { %v1362_v61 = vpop.f32.mrf.mxu1  ;;  %v1169_v63 = vshrl.u32 %v7377_v46, 16 }
 0x122   : > { %v2588_v3 = vadd.f32 %v2474_v49, %v2058_v47 }
 0x123   : > { %v3206_v6 = vpop.f32.mrf.mxu0 }
 0x124   : > { %v8211_v2 = vadd.f32 %v3204_v30, %v2588_v3 }
 0x127   : > { %v1946_v34 = vpop.f32.mrf.mxu2 }
 0x128   : > { %v2476_v56 = vpop.f32.mrf.mxu3  ;;  %v1167_v34 = vrot.slane %v1165_v0, 1 }
 0x129   : > { %v1365_v19 = vpop.f32.mrf.mxu1  ;;  %v3007_v56 = vor.u32 %v3005_v55, %v3003_v35 }
 0x12a   : > { %v1476_v30 = vadd.f32 %v1365_v19, %v745_v33  ;;  %v1817_v33 = vrot.slane %v7403_v1, 1  ;;  %v3011_v19 = vrot.slane %v3009_v25, 1  ;;  %v7404_v1 = vld [vmem:[%s7908_s11 + $0x70] sm:$0xff]  ;;  %v1171_v25 = vor.u32 %v1169_v63, %v1167_v34 }
 0x12b   : > { %v3209_v14 = vpop.f32.mrf.mxu0 }
 0x12c   : > { %6366 = vmatmul.msk.bf16.gmra.mxu1 %vm537_vm0, %v1160_v24  ;;  %6498 = vmatmul.msk.bf16.gmra.mxu2 %vm537_vm0, %v1816_v15  ;;  %v3012_v32 = vsel %vm1060_vm1, %v3007_v56, %v3011_v19  ;;  %v1819_v56 = vrot.slane %v7404_v1, 1  ;;  %v7405_v1 = vld [vmem:[%s7908_s11 + $0x78] sm:$0xff] }
 0x12d   : > { %6630 = vmatmul.msk.bf16.gmra.mxu3 %vm537_vm0, %v7427_v44  ;;  %v1168_v44 = vsel %vm1060_vm1, %v1163_v31, %v1167_v34 }
 0x12e   : > { %6762 = vmatmul.msk.bf16.gmra.mxu0 %vm537_vm0, %v3004_v45  ;;  %v7428_v45 = vld [vmem:[%s7908_s11 + $0x6c] sm:$0xff] }
 0x12f   : > { %v1949_v47 = vpop.f32.mrf.mxu2 }
 0x130   : > { %v2060_v49 = vadd.f32 %v1949_v47, %v1476_v30  ;;  %v2479_v60 = vpop.f32.mrf.mxu3  ;;  %v1818_v30 = vsel %vm1791_vm2, %v1815_v29, %v1817_v33  ;;  %v7378_v47 = vld [vmem:[%s7908_s11 + $0x70] sm:$0xff]  ;;  %v748_v29 = vadd.f32 %v8150_v13, %v8122_v26 }
 0x131   : > { %v1367_v61 = vpop.f32.mrf.mxu1  ;;  %v1173_v0 = vshll.u32 %v7378_v47, 16  ;;  %v1177_v63 = vshrl.u32 %v7378_v47, 16  ;;  %v751_v47 = vadd.f32 %v8150_v13, %v8017_v28  ;;  %v7380_v28 = vld [vmem:[%s7908_s11 + $0x80] sm:$0xff] }
 0x132   : > { %v2590_v3 = vadd.f32 %v2479_v60, %v2060_v49  ;;  %v1477_v6 = vadd.f32 %v1367_v61, %v746_v23  ;;  %v7456_v23 = vld [vmem:[%s7908_s11 + $0x7c] sm:$0xff] }
 0x133   : > { %v3211_v42 = vpop.f32.mrf.mxu0  ;;  %v3017_v55 = vshll.u32 %v7456_v23, 16  ;;  %v1175_v31 = vrot.slane %v1173_v0, 1 }
 0x134   : > { %v8228_v27 = vadd.f32 %v3209_v14, %v2590_v3 }
 0x137   : > { %v1951_v58 = vpop.f32.mrf.mxu2 }
 0x138   : > { %v2061_v24 = vadd.f32 %v1951_v58, %v1477_v6  ;;  %v2481_v8 = vpop.f32.mrf.mxu3 }
 0x139   : > { %v1370_v15 = vpop.f32.mrf.mxu1 }
 0x13a   : > { %v2591_v9 = vadd.f32 %v2481_v8, %v2061_v24  ;;  %v3019_v24 = vrot.slane %v3017_v55, 1  ;;  %v749_v15 = vadd.f32 %v8150_v13, %v8133_v48  ;;  %v3021_v55 = vshrl.u32 %v7456_v23, 16 }
 0x13b   : > { %v3214_v14 = vpop.f32.mrf.mxu0 }
 0x13c   : > { %6367 = vmatmul.msk.bf16.gmra.mxu1 %vm537_vm0, %v1168_v44  ;;  %6499 = vmatmul.msk.bf16.gmra.mxu2 %vm537_vm0, %v1818_v30  ;;  %v8236_v35 = vadd.f32 %v3211_v42, %v2591_v9  ;;  %v3013_v42 = vshrl.u32 %v7455_v17, 16  ;;  %v1176_v30 = vsel %vm1060_vm1, %v1171_v25, %v1175_v31  ;;  %v7429_v17 = vld [vmem:[%s7908_s11 + $0x74] sm:$0xff] }
 0x13d   : > { %6631 = vmatmul.msk.bf16.gmra.mxu3 %vm537_vm0, %v7428_v45  ;;  %v1820_v45 = vsel %vm1791_vm2, %v1817_v33, %v1819_v56 }
 0x13e   : > { %6763 = vmatmul.msk.bf16.gmra.mxu0 %vm537_vm0, %v3012_v32  ;;  %v3015_v58 = vor.u32 %v3013_v42, %v3011_v19  ;;  %v7379_v32 = vld [vmem:[%s7908_s11 + $0x78] sm:$0xff] }
 0x13f   : > { %v1954_v49 = vpop.f32.mrf.mxu2  ;;  %v1181_v0 = vshll.u32 %v7379_v32, 16 }
 0x140   : > { %v2484_v60 = vpop.f32.mrf.mxu3  ;;  %v3020_v19 = vsel %vm1060_vm1, %v3015_v58, %v3019_v24  ;;  %v7457_v49 = vld [vmem:[%s7908_s11 + $0x84] sm:$0xff]  ;;  %v1179_v58 = vor.u32 %v1177_v63, %v1175_v31  ;;  %v1189_v63 = vshll.u32 %v7380_v28, 16 }
 0x141   : > { %v1372_v61 = vpop.f32.mrf.mxu1  ;;  %v3025_v25 = vshll.u32 %v7457_v49, 16 }
 0x142   : > { %v1479_v3 = vadd.f32 %v1372_v61, %v748_v29 }
 0x143   : > { %v3216_v6 = vpop.f32.mrf.mxu0 }
 0x147   : > { %v1956_v8 = vpop.f32.mrf.mxu2 }
 0x148   : > { %v2063_v26 = vadd.f32 %v1956_v8, %v1479_v3  ;;  %v2486_v46 = vpop.f32.mrf.mxu3  ;;  %v1183_v8 = vrot.slane %v1181_v0, 1  ;;  %v7406_v0 = vld [vmem:[%s7908_s11 + $0x80] sm:$0xff] }
 0x149   : > { %v1375_v44 = vpop.f32.mrf.mxu1 }
 0x14a   : > { %v2593_v9 = vadd.f32 %v2486_v46, %v2063_v26  ;;  %v1480_v34 = vadd.f32 %v1375_v44, %v749_v15  ;;  %v1821_v15 = vrot.slane %v7405_v1, 1  ;;  %v3023_v26 = vor.u32 %v3021_v55, %v3019_v24  ;;  %v7458_v24 = vld [vmem:[%s7908_s11 + $0x8c] sm:$0xff] }
 0x14b   : > { %v3219_v14 = vpop.f32.mrf.mxu0  ;;  %v3027_v46 = vrot.slane %v3025_v25, 1  ;;  %v3029_v55 = vshrl.u32 %v7457_v49, 16  ;;  %v3033_v25 = vshll.u32 %v7458_v24, 16 }
 0x14c   : > { %6368 = vmatmul.msk.bf16.gmra.mxu1 %vm537_vm0, %v1176_v30  ;;  %6500 = vmatmul.msk.bf16.gmra.mxu2 %vm537_vm0, %v1820_v45  ;;  %v8253_v48 = vadd.f32 %v3216_v6, %v2593_v9  ;;  %v1822_v23 = vsel %vm1791_vm2, %v1819_v56, %v1821_v15  ;;  %v7430_v9 = vld [vmem:[%s7908_s11 + $0x7c] sm:$0xff]  ;;  %v752_v56 = vadd.f32 %v8150_v13, %v8035_v38 }
 0x14d   : > { %6632 = vmatmul.msk.bf16.gmra.mxu3 %vm537_vm0, %v7429_v17  ;;  %v1184_v17 = vsel %vm1060_vm1, %v1179_v58, %v1183_v8 }
 0x14e   : > { %6764 = vmatmul.msk.bf16.gmra.mxu0 %vm537_vm0, %v3020_v19 }
 0x14f   : > { %v1959_v33 = vpop.f32.mrf.mxu2 }
 0x150   : > { %v2064_v29 = vadd.f32 %v1959_v33, %v1480_v34  ;;  %v2489_v60 = vpop.f32.mrf.mxu3 }
 0x151   : > { %v1377_v61 = vpop.f32.mrf.mxu1 }
 0x152   : > { %v2594_v3 = vadd.f32 %v2489_v60, %v2064_v29  ;;  %v1185_v61 = vshrl.u32 %v7379_v32, 16 }
 0x153   : > { %v3221_v42 = vpop.f32.mrf.mxu0 }
 0x154   : > { %v8260_v6 = vadd.f32 %v3219_v14, %v2594_v3  ;;  %v3028_v14 = vsel %vm1060_vm1, %v3023_v26, %v3027_v46  ;;  %v1187_v26 = vor.u32 %v1185_v61, %v1183_v8  ;;  %v1193_v61 = vshrl.u32 %v7380_v28, 16 }
 0x157   : > { %v1961_v44 = vpop.f32.mrf.mxu2 }
 0x158   : > { %v2491_v30 = vpop.f32.mrf.mxu3  ;;  %v1191_v44 = vrot.slane %v1189_v63, 1 }
 0x159   : > { %v1380_v45 = vpop.f32.mrf.mxu1  ;;  %v3031_v30 = vor.u32 %v3029_v55, %v3027_v46 }
 0x15a   : > { %v1482_v34 = vadd.f32 %v1380_v45, %v751_v47  ;;  %v1823_v47 = vrot.slane %v7406_v0, 1  ;;  %v3035_v45 = vrot.slane %v3033_v25, 1  ;;  %v7407_v0 = vld [vmem:[%s7908_s11 + $0x88] sm:$0xff]  ;;  %v1195_v25 = vor.u32 %v1193_v61, %v1191_v44 }
 0x15b   : > { %v3224_v31 = vpop.f32.mrf.mxu0 }
 0x15c   : > { %6369 = vmatmul.msk.bf16.gmra.mxu1 %vm537_vm0, %v1184_v17  ;;  %6501 = vmatmul.msk.bf16.gmra.mxu2 %vm537_vm0, %v1822_v23  ;;  %v3036_v8 = vsel %vm1060_vm1, %v3031_v30, %v3035_v45  ;;  %v1825_v30 = vrot.slane %v7407_v0, 1  ;;  %v7408_v0 = vld [vmem:[%s7908_s11 + $0x90] sm:$0xff] }
 0x15d   : > { %6633 = vmatmul.msk.bf16.gmra.mxu3 %vm537_vm0, %v7430_v9  ;;  %v1192_v9 = vsel %vm1060_vm1, %v1187_v26, %v1191_v44 }
 0x15e   : > { %6765 = vmatmul.msk.bf16.gmra.mxu0 %vm537_vm0, %v3028_v14  ;;  %v7431_v14 = vld [vmem:[%s7908_s11 + $0x84] sm:$0xff] }
 0x15f   : > { %v1964_v19 = vpop.f32.mrf.mxu2 }
 0x160   : > { %v2066_v33 = vadd.f32 %v1964_v19, %v1482_v34  ;;  %v2494_v29 = vpop.f32.mrf.mxu3  ;;  %v1824_v34 = vsel %vm1791_vm2, %v1821_v15, %v1823_v47  ;;  %v7381_v19 = vld [vmem:[%s7908_s11 + $0x88] sm:$0xff]  ;;  %v754_v15 = vadd.f32 %v8150_v13, %v8054_v62 }
 0x161   : > { %v1382_v60 = vpop.f32.mrf.mxu1  ;;  %v1197_v63 = vshll.u32 %v7381_v19, 16  ;;  %v1201_v61 = vshrl.u32 %v7381_v19, 16  ;;  %v757_v19 = vadd.f32 %v8150_v13, %v8082_v41  ;;  %v7383_v41 = vld [vmem:[%s7908_s11 + $0x98] sm:$0xff] }
 0x162   : > { %v2596_v1 = vadd.f32 %v2494_v29, %v2066_v33  ;;  %v1483_v3 = vadd.f32 %v1382_v60, %v752_v56  ;;  %v7459_v56 = vld [vmem:[%s7908_s11 + $0x94] sm:$0xff] }
 0x163   : > { %v3226_v42 = vpop.f32.mrf.mxu0  ;;  %v3041_v55 = vshll.u32 %v7459_v56, 16  ;;  %v1199_v26 = vrot.slane %v1197_v63, 1 }
 0x164   : > { %v8277_v58 = vadd.f32 %v3224_v31, %v2596_v1 }
 0x167   : > { %v1966_v38 = vpop.f32.mrf.mxu2 }
 0x168   : > { %v2067_v17 = vadd.f32 %v1966_v38, %v1483_v3  ;;  %v2496_v32 = vpop.f32.mrf.mxu3 }
 0x169   : > { %v1385_v23 = vpop.f32.mrf.mxu1 }
 0x16a   : > { %v2597_v49 = vadd.f32 %v2496_v32, %v2067_v17  ;;  %v3043_v17 = vrot.slane %v3041_v55, 1  ;;  %v755_v23 = vadd.f32 %v8150_v13, %v8063_v12  ;;  %v3045_v55 = vshrl.u32 %v7459_v56, 16 }
 0x16b   : > { %v3229_v31 = vpop.f32.mrf.mxu0 }
 0x16c   : > { %6370 = vmatmul.msk.bf16.gmra.mxu1 %vm537_vm0, %v1192_v9  ;;  %6502 = vmatmul.msk.bf16.gmra.mxu2 %vm537_vm0, %v1824_v34  ;;  %v8285_v46 = vadd.f32 %v3226_v42, %v2597_v49  ;;  %v3037_v42 = vshrl.u32 %v7458_v24, 16  ;;  %v1200_v34 = vsel %vm1060_vm1, %v1195_v25, %v1199_v26  ;;  %v7432_v24 = vld [vmem:[%s7908_s11 + $0x8c] sm:$0xff] }
 0x16d   : > { %6634 = vmatmul.msk.bf16.gmra.mxu3 %vm537_vm0, %v7431_v14  ;;  %v1826_v14 = vsel %vm1791_vm2, %v1823_v47, %v1825_v30 }
 0x16e   : > { %6766 = vmatmul.msk.bf16.gmra.mxu0 %vm537_vm0, %v3036_v8  ;;  %v3039_v38 = vor.u32 %v3037_v42, %v3035_v45  ;;  %v7382_v8 = vld [vmem:[%s7908_s11 + $0x90] sm:$0xff] }
 0x16f   : > { %v1969_v33 = vpop.f32.mrf.mxu2  ;;  %v1205_v63 = vshll.u32 %v7382_v8, 16 }
 0x170   : > { %v2499_v29 = vpop.f32.mrf.mxu3  ;;  %v3044_v45 = vsel %vm1060_vm1, %v3039_v38, %v3043_v17  ;;  %v7460_v33 = vld [vmem:[%s7908_s11 + $0x9c] sm:$0xff]  ;;  %v1203_v38 = vor.u32 %v1201_v61, %v1199_v26  ;;  %v1213_v61 = vshll.u32 %v7383_v41, 16 }
 0x171   : > { %v1387_v60 = vpop.f32.mrf.mxu1  ;;  %v3049_v25 = vshll.u32 %v7460_v33, 16 }
 0x172   : > { %v1485_v1 = vadd.f32 %v1387_v60, %v754_v15 }
 0x173   : > { %v3231_v3 = vpop.f32.mrf.mxu0 }
 0x177   : > { %v1971_v32 = vpop.f32.mrf.mxu2 }
 0x178   : > { %v2069_v62 = vadd.f32 %v1971_v32, %v1485_v1  ;;  %v2501_v28 = vpop.f32.mrf.mxu3  ;;  %v1207_v32 = vrot.slane %v1205_v63, 1  ;;  %v7409_v63 = vld [vmem:[%s7908_s11 + $0x98] sm:$0xff] }
 0x179   : > { %v1390_v9 = vpop.f32.mrf.mxu1 }
 0x17a   : > { %v2599_v49 = vadd.f32 %v2501_v28, %v2069_v62  ;;  %v1486_v44 = vadd.f32 %v1390_v9, %v755_v23  ;;  %v1827_v23 = vrot.slane %v7408_v0, 1  ;;  %v3047_v62 = vor.u32 %v3045_v55, %v3043_v17  ;;  %v7461_v17 = vld [vmem:[%s7908_s11 + $0xa4] sm:$0xff] }
 0x17b   : > { %v3234_v31 = vpop.f32.mrf.mxu0  ;;  %v3051_v28 = vrot.slane %v3049_v25, 1  ;;  %v3053_v55 = vshrl.u32 %v7460_v33, 16  ;;  %v3057_v25 = vshll.u32 %v7461_v17, 16 }
 0x17c   : > { %6371 = vmatmul.msk.bf16.gmra.mxu1 %vm537_vm0, %v1200_v34  ;;  %6503 = vmatmul.msk.bf16.gmra.mxu2 %vm537_vm0, %v1826_v14  ;;  %v8302_v12 = vadd.f32 %v3231_v3, %v2599_v49  ;;  %v1828_v56 = vsel %vm1791_vm2, %v1825_v30, %v1827_v23  ;;  %v7433_v49 = vld [vmem:[%s7908_s11 + $0x94] sm:$0xff]  ;;  %v758_v30 = vadd.f32 %v8150_v13, %v8100_v54 }
 0x17d   : > { %6635 = vmatmul.msk.bf16.gmra.mxu3 %vm537_vm0, %v7432_v24  ;;  %v1208_v24 = vsel %vm1060_vm1, %v1203_v38, %v1207_v32 }
 0x17e   : > { %6767 = vmatmul.msk.bf16.gmra.mxu0 %vm537_vm0, %v3044_v45 }
 0x17f   : > { %v1974_v47 = vpop.f32.mrf.mxu2 }
 0x180   : > { %v2070_v15 = vadd.f32 %v1974_v47, %v1486_v44  ;;  %v2504_v29 = vpop.f32.mrf.mxu3 }
 0x181   : > { %v1392_v60 = vpop.f32.mrf.mxu1 }
 0x182   : > { %v2600_v1 = vadd.f32 %v2504_v29, %v2070_v15  ;;  %v1209_v60 = vshrl.u32 %v7382_v8, 16 }
 0x183   : > { %v3236_v42 = vpop.f32.mrf.mxu0 }
 0x184   : > { %v8309_v3 = vadd.f32 %v3234_v31, %v2600_v1  ;;  %v3052_v31 = vsel %vm1060_vm1, %v3047_v62, %v3051_v28  ;;  %v1211_v62 = vor.u32 %v1209_v60, %v1207_v32  ;;  %v1217_v60 = vshrl.u32 %v7383_v41, 16 }
 0x187   : > { %v1976_v9 = vpop.f32.mrf.mxu2 }
 0x188   : > { %v2506_v34 = vpop.f32.mrf.mxu3  ;;  %v1215_v9 = vrot.slane %v1213_v61, 1 }
 0x189   : > { %v1395_v14 = vpop.f32.mrf.mxu1  ;;  %v3055_v34 = vor.u32 %v3053_v55, %v3051_v28 }
 0x18a   : > { %v1488_v44 = vadd.f32 %v1395_v14, %v757_v19  ;;  %v1829_v19 = vrot.slane %v7409_v63, 1  ;;  %v3059_v14 = vrot.slane %v3057_v25, 1  ;;  %v7410_v63 = vld [vmem:[%s7908_s11 + $0xa0] sm:$0xff]  ;;  %v1219_v25 = vor.u32 %v1217_v60, %v1215_v9 }
 0x18b   : > { %v3239_v26 = vpop.f32.mrf.mxu0 }
 0x18c   : > { %6372 = vmatmul.msk.bf16.gmra.mxu1 %vm537_vm0, %v1208_v24  ;;  %6504 = vmatmul.msk.bf16.gmra.mxu2 %vm537_vm0, %v1828_v56  ;;  %v3060_v32 = vsel %vm1060_vm1, %v3055_v34, %v3059_v14  ;;  %v1831_v34 = vrot.slane %v7410_v63, 1  ;;  %v7411_v63 = vld [vmem:[%s7908_s11 + $0xa8] sm:$0xff] }
 0x18d   : > { %6636 = vmatmul.msk.bf16.gmra.mxu3 %vm537_vm0, %v7433_v49  ;;  %v1216_v49 = vsel %vm1060_vm1, %v1211_v62, %v1215_v9 }
 0x18e   : > { %6768 = vmatmul.msk.bf16.gmra.mxu0 %vm537_vm0, %v3052_v31  ;;  %v7434_v31 = vld [vmem:[%s7908_s11 + $0x9c] sm:$0xff] }
 0x18f   : > { %v1979_v45 = vpop.f32.mrf.mxu2 }
 0x190   : > { %v2072_v47 = vadd.f32 %v1979_v45, %v1488_v44  ;;  %v2509_v15 = vpop.f32.mrf.mxu3  ;;  %v1830_v44 = vsel %vm1791_vm2, %v1827_v23, %v1829_v19  ;;  %v7384_v45 = vld [vmem:[%s7908_s11 + $0xa0] sm:$0xff]  ;;  %v760_v23 = vadd.f32 %v8150_v13, %v8119_v22 }
 0x191   : > { %v1397_v29 = vpop.f32.mrf.mxu1  ;;  %v1221_v61 = vshll.u32 %v7384_v45, 16  ;;  %v1225_v60 = vshrl.u32 %v7384_v45, 16  ;;  %v763_v45 = vadd.f32 %v8150_v13, %v8031_v36  ;;  %v7386_v36 = vld [vmem:[%s7908_s11 + $0xb0] sm:$0xff] }
 0x192   : > { %v2602_v0 = vadd.f32 %v2509_v15, %v2072_v47  ;;  %v1489_v1 = vadd.f32 %v1397_v29, %v758_v30  ;;  %v7462_v30 = vld [vmem:[%s7908_s11 + $0xac] sm:$0xff] }
 0x193   : > { %v3241_v42 = vpop.f32.mrf.mxu0  ;;  %v3065_v55 = vshll.u32 %v7462_v30, 16  ;;  %v1223_v62 = vrot.slane %v1221_v61, 1 }
 0x194   : > { %v8326_v38 = vadd.f32 %v3239_v26, %v2602_v0 }
 0x197   : > { %v1981_v54 = vpop.f32.mrf.mxu2 }
 0x198   : > { %v2073_v24 = vadd.f32 %v1981_v54, %v1489_v1  ;;  %v2511_v8 = vpop.f32.mrf.mxu3 }
 0x199   : > { %v1400_v56 = vpop.f32.mrf.mxu1 }
 0x19a   : > { %v2603_v33 = vadd.f32 %v2511_v8, %v2073_v24  ;;  %v3067_v24 = vrot.slane %v3065_v55, 1  ;;  %v761_v56 = vadd.f32 %v8150_v13, %v8128_v43  ;;  %v3069_v55 = vshrl.u32 %v7462_v30, 16 }
 0x19b   : > { %v3244_v26 = vpop.f32.mrf.mxu0 }
 0x19c   : > { %6373 = vmatmul.msk.bf16.gmra.mxu1 %vm537_vm0, %v1216_v49  ;;  %6505 = vmatmul.msk.bf16.gmra.mxu2 %vm537_vm0, %v1830_v44  ;;  %v8334_v28 = vadd.f32 %v3241_v42, %v2603_v33  ;;  %v3061_v42 = vshrl.u32 %v7461_v17, 16  ;;  %v1224_v44 = vsel %vm1060_vm1, %v1219_v25, %v1223_v62  ;;  %v7435_v17 = vld [vmem:[%s7908_s11 + $0xa4] sm:$0xff] }
 0x19d   : > { %6637 = vmatmul.msk.bf16.gmra.mxu3 %vm537_vm0, %v7434_v31  ;;  %v1832_v31 = vsel %vm1791_vm2, %v1829_v19, %v1831_v34 }
 0x19e   : > { %6769 = vmatmul.msk.bf16.gmra.mxu0 %vm537_vm0, %v3060_v32  ;;  %v3063_v54 = vor.u32 %v3061_v42, %v3059_v14  ;;  %v7385_v32 = vld [vmem:[%s7908_s11 + $0xa8] sm:$0xff] }
 0x19f   : > { %v1984_v47 = vpop.f32.mrf.mxu2  ;;  %v1229_v61 = vshll.u32 %v7385_v32, 16 }
 0x1a0   : > { %v2514_v15 = vpop.f32.mrf.mxu3  ;;  %v3068_v14 = vsel %vm1060_vm1, %v3063_v54, %v3067_v24  ;;  %v7463_v47 = vld [vmem:[%s7908_s11 + $0xb4] sm:$0xff]  ;;  %v1227_v54 = vor.u32 %v1225_v60, %v1223_v62  ;;  %v1237_v60 = vshll.u32 %v7386_v36, 16 }
 0x1a1   : > { %v1402_v29 = vpop.f32.mrf.mxu1  ;;  %v3073_v25 = vshll.u32 %v7463_v47, 16 }
 0x1a2   : > { %v1491_v0 = vadd.f32 %v1402_v29, %v760_v23 }
 0x1a3   : > { %v3246_v1 = vpop.f32.mrf.mxu0 }
 0x1a7   : > { %v1986_v8 = vpop.f32.mrf.mxu2 }
 0x1a8   : > { %v2075_v22 = vadd.f32 %v1986_v8, %v1491_v0  ;;  %v2516_v41 = vpop.f32.mrf.mxu3  ;;  %v1231_v8 = vrot.slane %v1229_v61, 1  ;;  %v7412_v61 = vld [vmem:[%s7908_s11 + $0xb0] sm:$0xff] }
 0x1a9   : > { %v1405_v49 = vpop.f32.mrf.mxu1 }
 0x1aa   : > { %v2605_v33 = vadd.f32 %v2516_v41, %v2075_v22  ;;  %v1492_v9 = vadd.f32 %v1405_v49, %v761_v56  ;;  %v1833_v56 = vrot.slane %v7411_v63, 1  ;;  %v3071_v22 = vor.u32 %v3069_v55, %v3067_v24  ;;  %v7464_v24 = vld [vmem:[%s7908_s11 + $0xbc] sm:$0xff] }
 0x1ab   : > { %v3249_v26 = vpop.f32.mrf.mxu0  ;;  %v3075_v41 = vrot.slane %v3073_v25, 1  ;;  %v3077_v55 = vshrl.u32 %v7463_v47, 16  ;;  %v3081_v25 = vshll.u32 %v7464_v24, 16 }
 0x1ac   : > { %6374 = vmatmul.msk.bf16.gmra.mxu1 %vm537_vm0, %v1224_v44  ;;  %6506 = vmatmul.msk.bf16.gmra.mxu2 %vm537_vm0, %v1832_v31  ;;  %v8351_v43 = vadd.f32 %v3246_v1, %v2605_v33  ;;  %v1834_v30 = vsel %vm1791_vm2, %v1831_v34, %v1833_v56  ;;  %v7436_v33 = vld [vmem:[%s7908_s11 + $0xac] sm:$0xff]  ;;  %v764_v34 = vadd.f32 %v8150_v13, %v8040_v50 }
 0x1ad   : > { %6638 = vmatmul.msk.bf16.gmra.mxu3 %vm537_vm0, %v7435_v17  ;;  %v1232_v17 = vsel %vm1060_vm1, %v1227_v54, %v1231_v8 }
 0x1ae   : > { %6770 = vmatmul.msk.bf16.gmra.mxu0 %vm537_vm0, %v3068_v14 }
 0x1af   : > { %v1989_v19 = vpop.f32.mrf.mxu2 }
 0x1b0   : > { %v2076_v23 = vadd.f32 %v1989_v19, %v1492_v9  ;;  %v2519_v15 = vpop.f32.mrf.mxu3 }
 0x1b1   : > { %v1407_v29 = vpop.f32.mrf.mxu1 }
 0x1b2   : > { %v2606_v0 = vadd.f32 %v2519_v15, %v2076_v23  ;;  %v1233_v29 = vshrl.u32 %v7385_v32, 16 }
 0x1b3   : > { %v3251_v42 = vpop.f32.mrf.mxu0 }
 0x1b4   : > { %v8358_v1 = vadd.f32 %v3249_v26, %v2606_v0  ;;  %v3076_v26 = vsel %vm1060_vm1, %v3071_v22, %v3075_v41  ;;  %v1235_v22 = vor.u32 %v1233_v29, %v1231_v8  ;;  %v1241_v29 = vshrl.u32 %v7386_v36, 16 }
 0x1b7   : > { %v1991_v49 = vpop.f32.mrf.mxu2 }
 0x1b8   : > { %v2521_v44 = vpop.f32.mrf.mxu3  ;;  %v1239_v49 = vrot.slane %v1237_v60, 1 }
 0x1b9   : > { %v1410_v31 = vpop.f32.mrf.mxu1  ;;  %v3079_v44 = vor.u32 %v3077_v55, %v3075_v41 }
 0x1ba   : > { %v1494_v9 = vadd.f32 %v1410_v31, %v763_v45  ;;  %v1835_v45 = vrot.slane %v7412_v61, 1  ;;  %v3083_v31 = vrot.slane %v3081_v25, 1  ;;  %v7413_v61 = vld [vmem:[%s7908_s11 + $0xb8] sm:$0xff]  ;;  %v1243_v25 = vor.u32 %v1241_v29, %v1239_v49 }
 0x1bb   : > { %v3254_v62 = vpop.f32.mrf.mxu0 }
 0x1bc   : > { %6375 = vmatmul.msk.bf16.gmra.mxu1 %vm537_vm0, %v1232_v17  ;;  %6507 = vmatmul.msk.bf16.gmra.mxu2 %vm537_vm0, %v1834_v30  ;;  %v3084_v8 = vsel %vm1060_vm1, %v3079_v44, %v3083_v31  ;;  %v1837_v44 = vrot.slane %v7413_v61, 1 }
 0x1bd   : > { %6639 = vmatmul.msk.bf16.gmra.mxu3 %vm537_vm0, %v7436_v33  ;;  %v1240_v33 = vsel %vm1060_vm1, %v1235_v22, %v1239_v49 }
 0x1be   : > { %6771 = vmatmul.msk.bf16.gmra.mxu0 %vm537_vm0, %v3076_v26  ;;  %v7437_v26 = vld [vmem:[%s7908_s11 + $0xb4] sm:$0xff] }
 0x1bf   : > { %v1994_v14 = vpop.f32.mrf.mxu2 }
 0x1c0   : > { %v2078_v19 = vadd.f32 %v1994_v14, %v1494_v9  ;;  %v2524_v23 = vpop.f32.mrf.mxu3  ;;  %v1836_v9 = vsel %vm1791_vm2, %v1833_v56, %v1835_v45  ;;  %v7387_v14 = vld [vmem:[%s7908_s11 + $0xb8] sm:$0xff]  ;;  %v766_v56 = vadd.f32 %v8150_v13, %v8059_v10  ;;  %v2728_v10 = vld [vmem:[%s7908_s11 + $0xcc] sm:$0x1] }
 0x1c1   : > { %v1412_v15 = vpop.f32.mrf.mxu1  ;;  %v1245_v60 = vshll.u32 %v7387_v14, 16 }
 0x1c2   : > { %v2608_v63 = vadd.f32 %v2524_v23, %v2078_v19  ;;  %v1495_v0 = vadd.f32 %v1412_v15, %v764_v34  ;;  %v7465_v34 = vld [vmem:[%s7908_s11 + $0xc4] sm:$0xff] }
 0x1c3   : > { %v3256_v42 = vpop.f32.mrf.mxu0  ;;  %v3089_v55 = vshll.u32 %v7465_v34, 16  ;;  %v1247_v22 = vrot.slane %v1245_v60, 1 }
 0x1c4   : > { %v8375_v54 = vadd.f32 %v3254_v62, %v2608_v63 }
 0x1c7   : > { %v1996_v50 = vpop.f32.mrf.mxu2 }
 0x1c8   : > { %v2079_v17 = vadd.f32 %v1996_v50, %v1495_v0  ;;  %v2526_v32 = vpop.f32.mrf.mxu3 }
 0x1c9   : > { %v1415_v30 = vpop.f32.mrf.mxu1 }
 0x1ca   : > { %v2609_v47 = vadd.f32 %v2526_v32, %v2079_v17  ;;  %v3091_v17 = vrot.slane %v3089_v55, 1  ;;  %v883_v32 = vld [vmem:[%s7908_s11 + $0xc0] sm:$0x1]  ;;  %v1249_v55 = vshrl.u32 %v7387_v14, 16 }
 0x1cb   : > { %v3259_v62 = vpop.f32.mrf.mxu0  ;;  %v1034_v49 = vunpack.c.l.b16 %v883_v32  ;;  %v8412_v14 = vld [vmem:[%s8833_s2] ss:$0 sm:$0xff] }
 0x1cc   : > { %6376 = vmatmul.msk.bf16.gmra.mxu1 %vm537_vm0, %v1240_v33  ;;  %6508 = vmatmul.msk.bf16.gmra.mxu2 %vm537_vm0, %v1836_v9  ;;  %v8383_v41 = vadd.f32 %v3256_v42, %v2609_v47  ;;  %v3085_v42 = vshrl.u32 %v7464_v24, 16  ;;  %v767_v33 = vadd.f32 %v8150_v13, %v8077_v20  ;;  %v1248_v47 = vsel %vm1060_vm1, %v1243_v25, %v1247_v22  ;;  %v7438_v62 = vld [vmem:[%s7908_s11 + $0xbc] sm:$0xff] }
 0x1cd   : > { %6640 = vmatmul.msk.bf16.gmra.mxu3 %vm537_vm0, %v7437_v26  ;;  %v1838_v24 = vsel %vm1791_vm2, %v1835_v45, %v1837_v44  ;;  %v1059_v13 = vpack.c.b16 %v1034_v49, %v1034_v49  ;;  %v769_v49 = vadd.f32 %v8412_v14, %v8096_v52 }
 0x1ce   : > { %6772 = vmatmul.msk.bf16.gmra.mxu0 %vm537_vm0, %v3084_v8  ;;  %v3087_v50 = vor.u32 %v3085_v42, %v3083_v31 }
 0x1cf   : > { %v1999_v19 = vpop.f32.mrf.mxu2  ;;  %v1253_v25 = vshll.u32 %v1059_v13, 16  ;;  %v6781_v13 = vld [vmem:[%s7908_s11 + $0xc] sm:$0xe] }
 0x1d0   : > { %v2529_v23 = vpop.f32.mrf.mxu3 }
 0x1d1   : > { %v1417_v15 = vpop.f32.mrf.mxu1  ;;  %v1614_v23 = vld [vmem:[%s7908_s11 + $0xc0] sm:$0x1] }
 0x1d2   : > { %v1497_v63 = vadd.f32 %v1417_v15, %v766_v56  ;;  %v3092_v56 = vsel %vm1060_vm1, %v3087_v50, %v3091_v17  ;;  %v2879_v15 = vunpack.c.l.b16 %v2728_v10  ;;  %v1765_v45 = vunpack.c.l.b16 %v1614_v23 }
 0x1d3   : > { %v3261_v0 = vpop.f32.mrf.mxu0  ;;  %v3093_v10 = vshrl.u32 %v7465_v34, 16 }
 0x1d4   : > { %v2904_v29 = vpack.c.b16 %v2879_v15, %v2879_v15  ;;  %v1790_v50 = vpack.c.b16 %v1765_v45, %v1765_v45  ;;  %v7468_v45 = vld [vmem:[%s7908_s11 + $0xc] sm:$0xf0] }
 0x1d7   : > { %v2001_v30 = vpop.f32.mrf.mxu2 }
 0x1d8   : > { %v2081_v36 = vadd.f32 %v2001_v30, %v1497_v63  ;;  %v2531_v9 = vpop.f32.mrf.mxu3 }
 0x1d9   : > { %v1420_v26 = vpop.f32.mrf.mxu1 }
 0x1da   : > { %v2611_v8 = vadd.f32 %v2531_v9, %v2081_v36  ;;  %v1498_v19 = vadd.f32 %v1420_v26, %v767_v33  ;;  %v1251_v36 = vor.u32 %v1249_v55, %v1247_v22  ;;  %v1255_v9 = vrot.slane %v1253_v25, 1 }
 0x1db   : > { %v3264_v31 = vpop.f32.mrf.mxu0  ;;  %v1839_v26 = vrot.slane %v1790_v50, 1  ;;  %v7469_v50 = vld [vmem:[%s7908_s11 + $0x14] sm:$0xff] }
 0x1dc   : > { %6377 = vmatmul.msk.bf16.gmra.mxu1 %vm537_vm0, %v1248_v47  ;;  %6509 = vmatmul.msk.bf16.gmra.mxu2 %vm537_vm0, %v1838_v24  ;;  %v8403_v20 = vadd.f32 %v3261_v0, %v2611_v8  ;;  %v3097_v0 = vshll.u32 %v2904_v29, 16  ;;  %v3095_v47 = vor.u32 %v3093_v10, %v3091_v17  ;;  %v1256_v22 = vsel %vm1060_vm1, %v1251_v36, %v1255_v9 }
 0x1dd   : > { %6641 = vmatmul.msk.bf16.gmra.mxu3 %vm537_vm0, %v7438_v62  ;;  %v1840_v17 = vsel %vm1791_vm2, %v1837_v44, %v1839_v26  ;;  %v7521_v44 = vld [vmem:[%s7908_s11 + $0x20] sm:$0xff] }
 0x1de   : > { %6773 = vmatmul.msk.bf16.gmra.mxu0 %vm537_vm0, %v3092_v56  ;;  %v3099_v24 = vrot.slane %v3097_v0, 1  ;;  %v4756_v26 = vshll.u32 %v7521_v44, 16 }
 0x1df   : > { %v2004_v60 = vpop.f32.mrf.mxu2 }
 0x1e0   : > { %v2082_v61 = vadd.f32 %v2004_v60, %v1498_v19  ;;  %v2534_v63 = vpop.f32.mrf.mxu3  ;;  %v7439_v19 = vld [vmem:[%s7908_s11 + $0xc4] sm:$0xff]  ;;  %v3100_v15 = vsel %vm1060_vm1, %v3095_v47, %v3099_v24  ;;  %v7177_v60 = vld [vmem:[%s7908_s11 + $0x18] sm:$0xe] }
 0x1e1   : > { %v1422_v42 = vpop.f32.mrf.mxu1  ;;  %v7547_v47 = vld [vmem:[%s7908_s11 + $0x20] sm:$0xff] }
 0x1e2   : > { %v2612_v32 = vadd.f32 %v2534_v63, %v2082_v61  ;;  %v7546_v61 = vld [vmem:[%s7908_s11 + $0x18] sm:$0xf0]  ;;  %v770_v63 = vadd.f32 %v8412_v14, %v8105_v4  ;;  %v4758_v4 = vrot.slane %v4756_v26, 1  ;;  %v7548_v26 = vld [vmem:[%s7908_s11 + $0x28] sm:$0xff] }
 0x1e3   : > { %v3266_v30 = vpop.f32.mrf.mxu0  ;;  %v7178_v24 = vor.u32 %v7546_v61, %v7177_v60 }
 0x1e4   : > { %v8407_v33 = vadd.f32 %v3264_v31, %v2612_v32  ;;  %v7520_v31 = vld [vmem:[%s7908_s11 + $0x18] sm:$0xff]  ;;  %v6782_v32 = vor.u32 %v7468_v45, %v6781_v13 }
 0x1e5   : > { %v4751_v52 = vshll.u32 %v7520_v31, 16  ;;  %v4749_v30 = vshrl.u32 %v7520_v31, 16 }
 0x1e7   : > { %v2006_v62 = vpop.f32.mrf.mxu2  ;;  %v4753_v10 = vrot.slane %v4751_v52, 1 }
 0x1e8   : > { %v2536_v34 = vpop.f32.mrf.mxu3 }
 0x1e9   : > { %v1425_v8 = vpop.f32.mrf.mxu1  ;;  %v3636_v34 = vrot.slane %v7469_v50, 1 }
 0x1ea   : > { %v1500_v56 = vadd.f32 %v1425_v8, %v769_v49  ;;  %v3635_v49 = vrot.slane %v6782_v32, 1  ;;  %v4754_v8 = vor.u32 %v4753_v10, %v4749_v30  ;;  %v7470_v32 = vld [vmem:[%s7908_s11 + $0x1c] sm:$0xff] }
 0x1eb   : > { %v3269_v23 = vpop.f32.mrf.mxu0 }
 0x1ec   : > { %6378 = vmatmul.msk.bf16.gmra.mxu1 %vm537_vm0, %v1256_v22  ;;  %6510 = vmatmul.msk.bf16.gmra.mxu2 %vm537_vm0, %v1840_v17  ;;  %v5478_v22 = vrot.slane %v7178_v24, 1  ;;  %v5479_v17 = vrot.slane %v7547_v47, 1  ;;  %v3637_v13 = vsel %vm1791_vm2, %v3635_v49, %v3636_v34  ;;  %v5481_v49 = vrot.slane %v7548_v26, 1 }
 0x1ed   : > { %6642 = vmatmul.msk.bf16.gmra.mxu3 %vm537_vm0, %v7439_v19 }
 0x1ee   : > { %6774 = vmatmul.msk.bf16.gmra.mxu0 %vm537_vm0, %v3100_v15  ;;  %v7494_v15 = vld [vmem:[%s7908_s11 + $0x18] sm:$0xff]  ;;  %v5480_v60 = vsel %vm1791_vm2, %v5478_v22, %v5479_v17  ;;  %v773_v22 = vadd.f32 %v8412_v14, %v8142_v57 }
 0x1ef   : > { %v2009_v29 = vpop.f32.mrf.mxu2 }
 0x1f0   : > { %v2084_v42 = vadd.f32 %v2009_v29, %v1500_v56  ;;  %v2539_v55 = vpop.f32.mrf.mxu3 }
 0x1f1   : > { %v1427_v25 = vpop.f32.mrf.mxu1 }
 0x1f2   : > { %v2614_v0 = vadd.f32 %v2539_v55, %v2084_v42  ;;  %v1501_v36 = vadd.f32 %v1427_v25, %v770_v63  ;;  %v7522_v63 = vld [vmem:[%s7908_s11 + $0x28] sm:$0xff]  ;;  %v772_v55 = vadd.f32 %v8412_v14, %v8124_v39 }
 0x1f3   : > { %v3271_v9 = vpop.f32.mrf.mxu0 }
 0x1f4   : > { %v8434_v62 = vadd.f32 %v3269_v23, %v2614_v0  ;;  %v4759_v23 = vsel %vm1060_vm1, %v4754_v8, %v4758_v4  ;;  %v4760_v0 = vshrl.u32 %v7521_v44, 16 }
 0x1f6   : > { %v4762_v47 = vor.u32 %v4760_v0, %v4758_v4  ;;  %v5482_v4 = vsel %vm1791_vm2, %v5479_v17, %v5481_v49 }
 0x1f7   : > { %v2011_v19 = vpop.f32.mrf.mxu2 }
 0x1f8   : > { %v2085_v56 = vadd.f32 %v2011_v19, %v1501_v36  ;;  %v2541_v31 = vpop.f32.mrf.mxu3  ;;  %v4764_v36 = vshll.u32 %v7522_v63, 16 }
 0x1f9   : > { %v1430_v52 = vpop.f32.mrf.mxu1 }
 0x1fa   : > { %v2615_v45 = vadd.f32 %v2541_v31, %v2085_v56  ;;  %v4766_v24 = vrot.slane %v4764_v36, 1  ;;  %v7495_v56 = vld [vmem:[%s7908_s11 + $0x20] sm:$0xff] }
 0x1fb   : > { %v3274_v29 = vpop.f32.mrf.mxu0 }
 0x1fc   : > { %6883 = vmatmul.msk.bf16.vlgmr.msra.gmra.mxu1 %vm537_vm0, %v3637_v13  ;;  %7015 = vmatmul.msk.bf16.vlgmr.msra.gmra.mxu2 %vm537_vm0, %v7494_v15  ;;  %v8442_v61 = vadd.f32 %v3271_v9, %v2615_v45  ;;  %v3638_v9 = vrot.slane %v7470_v32, 1  ;;  %v4767_v45 = vsel %vm1060_vm1, %v4762_v47, %v4766_v24 }
 0x1fd   : > { %7147 = vmatmul.msk.bf16.vlgmr.msra.gmra.mxu3 %vm537_vm0, %v4759_v23 }
 0x1fe   : > { %7279 = vmatmul.msk.bf16.vlgmr.msra.gmra.mxu0 %vm537_vm0, %v5480_v60  ;;  %v3639_v15 = vsel %vm1791_vm2, %v3636_v34, %v3638_v9  ;;  %v7523_v34 = vld [vmem:[%s7908_s11 + $0x30] sm:$0xff] }
 0x1ff   : > { %v2014_v42 = vpop.f32.mrf.mxu2  ;;  %v4772_v32 = vshll.u32 %v7523_v34, 16 }
 0x200   : > { %v2544_v25 = vpop.f32.mrf.mxu3 }
 0x201   : > { %v1432_v50 = vpop.f32.mrf.mxu1  ;;  %v4774_v26 = vrot.slane %v4772_v32, 1 }
 0x202   : > { %v1503_v30 = vadd.f32 %v1432_v50, %v772_v55  ;;  %v7471_v55 = vld [vmem:[%s7908_s11 + $0x24] sm:$0xff]  ;;  %v4768_v50 = vshrl.u32 %v7522_v63, 16 }
 0x203   : > { %v3276_v10 = vpop.f32.mrf.mxu0 }
 0x204   : > { %v4770_v36 = vor.u32 %v4768_v50, %v4766_v24 }
 0x207   : > { %v2016_v8 = vpop.f32.mrf.mxu2 }
 0x208   : > { %v2087_v19 = vadd.f32 %v2016_v8, %v1503_v30  ;;  %v2546_v39 = vpop.f32.mrf.mxu3  ;;  %v7549_v30 = vld [vmem:[%s7908_s11 + $0x30] sm:$0xff] }
 0x209   : > { %v1435_v31 = vpop.f32.mrf.mxu1  ;;  %v5483_v47 = vrot.slane %v7549_v30, 1 }
 0x20a   : > { %v2617_v52 = vadd.f32 %v2546_v39, %v2087_v19  ;;  %v1504_v44 = vadd.f32 %v1435_v31, %v773_v22  ;;  %v775_v22 = vadd.f32 %v8412_v14, %v8033_v37  ;;  %v7496_v39 = vld [vmem:[%s7908_s11 + $0x28] sm:$0xff]  ;;  %v7524_v37 = vld [vmem:[%s7908_s11 + $0x38] sm:$0xff] }
 0x20b   : > { %v3279_v13 = vpop.f32.mrf.mxu0 }
 0x20c   : > { %6884 = vmatmul.msk.bf16.gmra.mxu1 %vm537_vm0, %v3639_v15  ;;  %7016 = vmatmul.msk.bf16.gmra.mxu2 %vm537_vm0, %v7495_v56  ;;  %v8459_v57 = vadd.f32 %v3276_v10, %v2617_v52  ;;  %v3640_v10 = vrot.slane %v7471_v55, 1  ;;  %v4775_v52 = vsel %vm1060_vm1, %v4770_v36, %v4774_v26  ;;  %v4780_v55 = vshll.u32 %v7524_v37, 16 }
 0x20d   : > { %7148 = vmatmul.msk.bf16.gmra.mxu3 %vm537_vm0, %v4767_v45 }
 0x20e   : > { %7280 = vmatmul.msk.bf16.gmra.mxu0 %vm537_vm0, %v5482_v4  ;;  %v3641_v31 = vsel %vm1791_vm2, %v3638_v9, %v3640_v10  ;;  %v776_v9 = vadd.f32 %v8412_v14, %v8042_v51  ;;  %v4782_v30 = vrot.slane %v4780_v55, 1 }
 0x20f   : > { %v2019_v29 = vpop.f32.mrf.mxu2 }
 0x210   : > { %v2088_v23 = vadd.f32 %v2019_v29, %v1504_v44  ;;  %v2549_v60 = vpop.f32.mrf.mxu3  ;;  %v5484_v44 = vsel %vm1791_vm2, %v5481_v49, %v5483_v47  ;;  %v7472_v29 = vld [vmem:[%s7908_s11 + $0x2c] sm:$0xff] }
 0x211   : > { %v1437_v42 = vpop.f32.mrf.mxu1  ;;  %v3642_v50 = vrot.slane %v7472_v29, 1 }
 0x212   : > { %v2618_v25 = vadd.f32 %v2549_v60, %v2088_v23  ;;  %v4776_v42 = vshrl.u32 %v7523_v34, 16 }
 0x213   : > { %v3281_v17 = vpop.f32.mrf.mxu0 }
 0x214   : > { %v8466_v0 = vadd.f32 %v3279_v13, %v2618_v25  ;;  %v7550_v25 = vld [vmem:[%s7908_s11 + $0x38] sm:$0xff]  ;;  %v4778_v32 = vor.u32 %v4776_v42, %v4774_v26 }
 0x215   : > { %v5485_v36 = vrot.slane %v7550_v25, 1 }
 0x216   : > { %v4783_v34 = vsel %vm1060_vm1, %v4778_v32, %v4782_v30  ;;  %v779_v32 = vadd.f32 %v8412_v14, %v8079_v21 }
 0x217   : > { %v2021_v8 = vpop.f32.mrf.mxu2 }
 0x218   : > { %v2551_v19 = vpop.f32.mrf.mxu3 }
 0x219   : > { %v1440_v56 = vpop.f32.mrf.mxu1  ;;  %v7497_v19 = vld [vmem:[%s7908_s11 + $0x30] sm:$0xff] }
 0x21a   : > { %v1506_v63 = vadd.f32 %v1440_v56, %v775_v22  ;;  %v3643_v56 = vsel %vm1791_vm2, %v3640_v10, %v3642_v50  ;;  %v778_v10 = vadd.f32 %v8412_v14, %v8061_v11 }
 0x21b   : > { %v3284_v15 = vpop.f32.mrf.mxu0 }
 0x21c   : > { %6885 = vmatmul.msk.bf16.gmra.mxu1 %vm537_vm0, %v3641_v31  ;;  %7017 = vmatmul.msk.bf16.gmra.mxu2 %vm537_vm0, %v7496_v39 }
 0x21d   : > { %7149 = vmatmul.msk.bf16.gmra.mxu3 %vm537_vm0, %v4775_v52  ;;  %v7525_v52 = vld [vmem:[%s7908_s11 + $0x40] sm:$0xff] }
 0x21e   : > { %7281 = vmatmul.msk.bf16.gmra.mxu0 %vm537_vm0, %v5484_v44  ;;  %v4788_v29 = vshll.u32 %v7525_v52, 16 }
 0x21f   : > { %v2024_v24 = vpop.f32.mrf.mxu2 }
 0x220   : > { %v2090_v13 = vadd.f32 %v2024_v24, %v1506_v63  ;;  %v2554_v45 = vpop.f32.mrf.mxu3  ;;  %v4790_v42 = vrot.slane %v4788_v29, 1 }
 0x221   : > { %v1442_v4 = vpop.f32.mrf.mxu1 }
 0x222   : > { %v2620_v49 = vadd.f32 %v2554_v45, %v2090_v13  ;;  %v1507_v23 = vadd.f32 %v1442_v4, %v776_v9  ;;  %v4784_v4 = vshrl.u32 %v7524_v37, 16 }
 0x223   : > { %v3286_v60 = vpop.f32.mrf.mxu0 }
 0x224   : > { %v8483_v17 = vadd.f32 %v3284_v15, %v2620_v49  ;;  %v5486_v15 = vsel %vm1791_vm2, %v5483_v47, %v5485_v36  ;;  %v7473_v47 = vld [vmem:[%s7908_s11 + $0x34] sm:$0xff]  ;;  %v7551_v49 = vld [vmem:[%s7908_s11 + $0x40] sm:$0xff] }
 0x225   : > { %v5487_v55 = vrot.slane %v7551_v49, 1 }
 0x227   : > { %v2026_v8 = vpop.f32.mrf.mxu2 }
 0x228   : > { %v2091_v51 = vadd.f32 %v2026_v8, %v1507_v23  ;;  %v2556_v22 = vpop.f32.mrf.mxu3  ;;  %v3644_v23 = vrot.slane %v7473_v47, 1 }
 0x229   : > { %v1445_v39 = vpop.f32.mrf.mxu1 }
 0x22a   : > { %v2621_v31 = vadd.f32 %v2556_v22, %v2091_v51  ;;  %v7498_v51 = vld [vmem:[%s7908_s11 + $0x38] sm:$0xff] }
 0x22b   : > { %v3289_v63 = vpop.f32.mrf.mxu0 }
 0x22c   : > { %6886 = vmatmul.msk.bf16.gmra.mxu1 %vm537_vm0, %v3643_v56  ;;  %7018 = vmatmul.msk.bf16.gmra.mxu2 %vm537_vm0, %v7497_v19  ;;  %v8491_v26 = vadd.f32 %v3286_v60, %v2621_v31  ;;  %v4786_v60 = vor.u32 %v4784_v4, %v4782_v30  ;;  %v3645_v19 = vsel %vm1791_vm2, %v3642_v50, %v3644_v23  ;;  %v7526_v50 = vld [vmem:[%s7908_s11 + $0x48] sm:$0xff] }
 0x22d   : > { %7150 = vmatmul.msk.bf16.gmra.mxu3 %vm537_vm0, %v4783_v34  ;;  %v5488_v30 = vsel %vm1791_vm2, %v5485_v36, %v5487_v55  ;;  %v4796_v47 = vshll.u32 %v7526_v50, 16 }
 0x22e   : > { %7282 = vmatmul.msk.bf16.gmra.mxu0 %vm537_vm0, %v5486_v15  ;;  %v4791_v31 = vsel %vm1060_vm1, %v4786_v60, %v4790_v42 }
 0x22f   : > { %v2029_v44 = vpop.f32.mrf.mxu2  ;;  %v4798_v49 = vrot.slane %v4796_v47, 1 }
 0x230   : > { %v2559_v24 = vpop.f32.mrf.mxu3 }
 0x231   : > { %v1447_v9 = vpop.f32.mrf.mxu1 }
 0x232   : > { %v1509_v13 = vadd.f32 %v1447_v9, %v778_v10  ;;  %v7474_v10 = vld [vmem:[%s7908_s11 + $0x3c] sm:$0xff]  ;;  %v4792_v9 = vshrl.u32 %v7525_v52, 16 }
 0x233   : > { %v3291_v45 = vpop.f32.mrf.mxu0 }
 0x234   : > { %v4794_v29 = vor.u32 %v4792_v9, %v4790_v42 }
 0x237   : > { %v2031_v25 = vpop.f32.mrf.mxu2 }
 0x238   : > { %v2093_v8 = vadd.f32 %v2031_v25, %v1509_v13  ;;  %v2561_v11 = vpop.f32.mrf.mxu3  ;;  %v7552_v13 = vld [vmem:[%s7908_s11 + $0x48] sm:$0xff] }
 0x239   : > { %v1450_v22 = vpop.f32.mrf.mxu1  ;;  %v5489_v60 = vrot.slane %v7552_v13, 1 }
 0x23a   : > { %v2623_v39 = vadd.f32 %v2561_v11, %v2093_v8  ;;  %v1510_v37 = vadd.f32 %v1450_v22, %v779_v32  ;;  %v781_v32 = vadd.f32 %v8412_v14, %v8098_v53  ;;  %v7499_v11 = vld [vmem:[%s7908_s11 + $0x40] sm:$0xff]  ;;  %v7527_v53 = vld [vmem:[%s7908_s11 + $0x50] sm:$0xff] }
 0x23b   : > { %v3294_v56 = vpop.f32.mrf.mxu0 }
 0x23c   : > { %6887 = vmatmul.msk.bf16.gmra.mxu1 %vm537_vm0, %v3645_v19  ;;  %7019 = vmatmul.msk.bf16.gmra.mxu2 %vm537_vm0, %v7498_v51  ;;  %v8508_v21 = vadd.f32 %v3291_v45, %v2623_v39  ;;  %v3646_v45 = vrot.slane %v7474_v10, 1  ;;  %v4799_v39 = vsel %vm1060_vm1, %v4794_v29, %v4798_v49  ;;  %v4804_v10 = vshll.u32 %v7527_v53, 16 }
 0x23d   : > { %7151 = vmatmul.msk.bf16.gmra.mxu3 %vm537_vm0, %v4791_v31 }
 0x23e   : > { %7283 = vmatmul.msk.bf16.gmra.mxu0 %vm537_vm0, %v5488_v30  ;;  %v3647_v22 = vsel %vm1791_vm2, %v3644_v23, %v3646_v45  ;;  %v782_v23 = vadd.f32 %v8412_v14, %v8107_v5  ;;  %v4806_v13 = vrot.slane %v4804_v10, 1 }
 0x23f   : > { %v2034_v63 = vpop.f32.mrf.mxu2 }
 0x240   : > { %v2094_v34 = vadd.f32 %v2034_v63, %v1510_v37  ;;  %v2564_v15 = vpop.f32.mrf.mxu3  ;;  %v5490_v37 = vsel %vm1791_vm2, %v5487_v55, %v5489_v60  ;;  %v7475_v63 = vld [vmem:[%s7908_s11 + $0x44] sm:$0xff] }
 0x241   : > { %v1452_v44 = vpop.f32.mrf.mxu1  ;;  %v3648_v9 = vrot.slane %v7475_v63, 1 }
 0x242   : > { %v2624_v24 = vadd.f32 %v2564_v15, %v2094_v34  ;;  %v4800_v44 = vshrl.u32 %v7526_v50, 16 }
 0x243   : > { %v3296_v36 = vpop.f32.mrf.mxu0 }
 0x244   : > { %v8515_v4 = vadd.f32 %v3294_v56, %v2624_v24  ;;  %v7553_v24 = vld [vmem:[%s7908_s11 + $0x50] sm:$0xff]  ;;  %v4802_v47 = vor.u32 %v4800_v44, %v4798_v49 }
 0x245   : > { %v5491_v29 = vrot.slane %v7553_v24, 1 }
 0x246   : > { %v4807_v50 = vsel %vm1060_vm1, %v4802_v47, %v4806_v13  ;;  %v785_v47 = vadd.f32 %v8412_v14, %v8144_v59 }
 0x247   : > { %v2036_v25 = vpop.f32.mrf.mxu2 }
 0x248   : > { %v2566_v8 = vpop.f32.mrf.mxu3 }
 0x249   : > { %v1455_v51 = vpop.f32.mrf.mxu1  ;;  %v7500_v8 = vld [vmem:[%s7908_s11 + $0x48] sm:$0xff] }
 0x24a   : > { %v1512_v52 = vadd.f32 %v1455_v51, %v781_v32  ;;  %v3649_v51 = vsel %vm1791_vm2, %v3646_v45, %v3648_v9  ;;  %v784_v45 = vadd.f32 %v8412_v14, %v8126_v40  ;;  %v7529_v14 = vld [vmem:[%s7908_s11 + $0x60] sm:$0xff] }
 0x24b   : > { %v3299_v19 = vpop.f32.mrf.mxu0 }
 0x24c   : > { %6888 = vmatmul.msk.bf16.gmra.mxu1 %vm537_vm0, %v3647_v22  ;;  %7020 = vmatmul.msk.bf16.gmra.mxu2 %vm537_vm0, %v7499_v11 }
 0x24d   : > { %7152 = vmatmul.msk.bf16.gmra.mxu3 %vm537_vm0, %v4799_v39  ;;  %v7528_v39 = vld [vmem:[%s7908_s11 + $0x58] sm:$0xff] }
 0x24e   : > { %7284 = vmatmul.msk.bf16.gmra.mxu0 %vm537_vm0, %v5490_v37  ;;  %v4812_v63 = vshll.u32 %v7528_v39, 16 }
 0x24f   : > { %v2039_v42 = vpop.f32.mrf.mxu2 }
 0x250   : > { %v2096_v56 = vadd.f32 %v2039_v42, %v1512_v52  ;;  %v2569_v31 = vpop.f32.mrf.mxu3  ;;  %v4814_v44 = vrot.slane %v4812_v63, 1 }
 0x251   : > { %v1457_v30 = vpop.f32.mrf.mxu1 }
 0x252   : > { %v2626_v55 = vadd.f32 %v2569_v31, %v2096_v56  ;;  %v1513_v34 = vadd.f32 %v1457_v30, %v782_v23  ;;  %v4808_v30 = vshrl.u32 %v7527_v53, 16 }
 0x253   : > { %v3301_v15 = vpop.f32.mrf.mxu0 }
 0x254   : > { %v8532_v36 = vadd.f32 %v3299_v19, %v2626_v55  ;;  %v5492_v19 = vsel %vm1791_vm2, %v5489_v60, %v5491_v29  ;;  %v7476_v60 = vld [vmem:[%s7908_s11 + $0x4c] sm:$0xff]  ;;  %v7554_v55 = vld [vmem:[%s7908_s11 + $0x58] sm:$0xff] }
 0x255   : > { %v5493_v10 = vrot.slane %v7554_v55, 1 }
 0x257   : > { %v2041_v25 = vpop.f32.mrf.mxu2 }
 0x258   : > { %v2097_v5 = vadd.f32 %v2041_v25, %v1513_v34  ;;  %v2571_v32 = vpop.f32.mrf.mxu3  ;;  %v3650_v34 = vrot.slane %v7476_v60, 1  ;;  %v7555_v60 = vld [vmem:[%s7908_s11 + $0x60] sm:$0xff] }
 0x259   : > { %v1460_v11 = vpop.f32.mrf.mxu1  ;;  %v5495_v55 = vrot.slane %v7555_v60, 1 }
 0x25a   : > { %v2627_v22 = vadd.f32 %v2571_v32, %v2097_v5  ;;  %v7501_v5 = vld [vmem:[%s7908_s11 + $0x50] sm:$0xff] }
 0x25b   : > { %v3304_v52 = vpop.f32.mrf.mxu0 }
 0x25c   : > { %6889 = vmatmul.msk.bf16.gmra.mxu1 %vm537_vm0, %v3649_v51  ;;  %7021 = vmatmul.msk.bf16.gmra.mxu2 %vm537_vm0, %v7500_v8  ;;  %v8540_v49 = vadd.f32 %v3301_v15, %v2627_v22  ;;  %v4810_v15 = vor.u32 %v4808_v30, %v4806_v13  ;;  %v3651_v8 = vsel %vm1791_vm2, %v3648_v9, %v3650_v34 }
 0x25d   : > { %7153 = vmatmul.msk.bf16.gmra.mxu3 %vm537_vm0, %v4807_v50  ;;  %v5494_v13 = vsel %vm1791_vm2, %v5491_v29, %v5493_v10 }
 0x25e   : > { %7285 = vmatmul.msk.bf16.gmra.mxu0 %vm537_vm0, %v5492_v19  ;;  %v4815_v22 = vsel %vm1060_vm1, %v4810_v15, %v4814_v44 }
 0x25f   : > { %v2044_v37 = vpop.f32.mrf.mxu2 }
 0x260   : > { %v2574_v42 = vpop.f32.mrf.mxu3  ;;  %v7477_v37 = vld [vmem:[%s7908_s11 + $0x54] sm:$0xff] }
 0x261   : > { %v1462_v23 = vpop.f32.mrf.mxu1  ;;  %v4816_v42 = vshrl.u32 %v7528_v39, 16  ;;  %v5496_v39 = vsel %vm1791_vm2, %v5493_v10, %v5495_v55 }
 0x262   : > { %v1515_v56 = vadd.f32 %v1462_v23, %v784_v45  ;;  %v4820_v23 = vshll.u32 %v7529_v14, 16 }
 0x263   : > { %v3306_v31 = vpop.f32.mrf.mxu0  ;;  %v4818_v30 = vor.u32 %v4816_v42, %v4814_v44  ;;  %v7530_v44 = vld [vmem:[%s7908_s11 + $0x68] sm:$0xff] }
 0x264   : > { %v4822_v63 = vrot.slane %v4820_v23, 1 }
 0x267   : > { %v2046_v24 = vpop.f32.mrf.mxu2 }
 0x268   : > { %v2099_v25 = vadd.f32 %v2046_v24, %v1515_v56  ;;  %v2576_v40 = vpop.f32.mrf.mxu3 }
 0x269   : > { %v1465_v32 = vpop.f32.mrf.mxu1 }
 0x26a   : > { %v2629_v11 = vadd.f32 %v2576_v40, %v2099_v25  ;;  %v1516_v53 = vadd.f32 %v1465_v32, %v785_v47  ;;  %v7502_v47 = vld [vmem:[%s7908_s11 + $0x58] sm:$0xff]  ;;  %v4823_v32 = vsel %vm1060_vm1, %v4818_v30, %v4822_v63  ;;  %v7503_v30 = vld [vmem:[%s7908_s11 + $0x60] sm:$0xff] }
 0x26b   : > { %v3309_v51 = vpop.f32.mrf.mxu0 }
 0x26c   : > { %6890 = vmatmul.msk.bf16.gmra.mxu1 %vm537_vm0, %v3651_v8  ;;  %7022 = vmatmul.msk.bf16.gmra.mxu2 %vm537_vm0, %v7501_v5  ;;  %v8557_v59 = vadd.f32 %v3306_v31, %v2629_v11  ;;  %v3652_v31 = vrot.slane %v7477_v37, 1 }
 0x26d   : > { %7154 = vmatmul.msk.bf16.gmra.mxu3 %vm537_vm0, %v4815_v22  ;;  %v4824_v22 = vshrl.u32 %v7529_v14, 16 }
 0x26e   : > { %7286 = vmatmul.msk.bf16.gmra.mxu0 %vm537_vm0, %v5494_v13  ;;  %v3653_v40 = vsel %vm1791_vm2, %v3650_v34, %v3652_v31 }
 0x26f   : > { %v2049_v9 = vpop.f32.mrf.mxu2 }
 0x270   : > { %v2100_v52 = vadd.f32 %v2049_v9, %v1516_v53  ;;  %v2579_v50 = vpop.f32.mrf.mxu3  ;;  %v4828_v9 = vshll.u32 %v7530_v44, 16 }
 0x271   : > { %v1467_v19 = vpop.f32.mrf.mxu1 }
 0x272   : > { %v2630_v45 = vadd.f32 %v2579_v50, %v2100_v52  ;;  %v7556_v52 = vld [vmem:[%s7908_s11 + $0x68] sm:$0xff]  ;;  %v4826_v19 = vor.u32 %v4824_v22, %v4822_v63 }
 0x273   : > { %v3311_v29 = vpop.f32.mrf.mxu0  ;;  %v5497_v42 = vrot.slane %v7556_v52, 1 }
 0x274   : > { %v8564_v56 = vadd.f32 %v3309_v51, %v2630_v45  ;;  %v7478_v51 = vld [vmem:[%s7908_s11 + $0x5c] sm:$0xff]  ;;  %v4830_v29 = vrot.slane %v4828_v9, 1 }
 0x275   : > { %v3654_v50 = vrot.slane %v7478_v51, 1  ;;  %v4832_v51 = vshrl.u32 %v7530_v44, 16 }
 0x276   : > { %v4831_v63 = vsel %vm1060_vm1, %v4826_v19, %v4830_v29 }
 0x277   : > { %v2051_v15 = vpop.f32.mrf.mxu2  ;;  %v3655_v14 = vsel %vm1791_vm2, %v3652_v31, %v3654_v50  ;;  %v4834_v9 = vor.u32 %v4832_v51, %v4830_v29 }
 0x278   : > { %v2581_v24 = vpop.f32.mrf.mxu3 }
 0x279   : > { %v3777_v25 = vpop.f32.mrf.mxu1 }
 0x27a   : > { %v3897_v11 = vadd.f32 %v3777_v25, %v8167_v7 }
 0x27b   : > { %v5620_v5 = vpop.f32.mrf.mxu0 }
 0x27c   : > { %6891 = vmatmul.msk.bf16.gmra.mxu1 %vm537_vm0, %v3653_v40  ;;  %7023 = vmatmul.msk.bf16.gmra.mxu2 %vm537_vm0, %v7502_v47  ;;  %v5498_v40 = vsel %vm1791_vm2, %v5495_v55, %v5497_v42 }
 0x27d   : > { %7155 = vmatmul.msk.bf16.gmra.mxu3 %vm537_vm0, %v4823_v32  ;;  %v7531_v32 = vld [vmem:[%s7908_s11 + $0x70] sm:$0xff] }
 0x27e   : > { %7287 = vmatmul.msk.bf16.gmra.mxu0 %vm537_vm0, %v5496_v39  ;;  %v4836_v22 = vshll.u32 %v7531_v32, 16 }
 0x27f   : > { %v4307_v8 = vpop.f32.mrf.mxu2 }
 0x280   : > { %v5037_v53 = vpop.f32.mrf.mxu3  ;;  %v4427_v13 = vadd.f32 %v4307_v8, %v3897_v11  ;;  %v4838_v52 = vrot.slane %v4836_v22, 1 }
 0x281   : > { %v3779_v34 = vpop.f32.mrf.mxu1 }
 0x282   : > { %v5157_v37 = vadd.f32 %v5037_v53, %v4427_v13  ;;  %v3898_v45 = vadd.f32 %v3779_v34, %v8175_v18  ;;  %v7479_v53 = vld [vmem:[%s7908_s11 + $0x64] sm:$0xff]  ;;  %v7557_v13 = vld [vmem:[%s7908_s11 + $0x70] sm:$0xff]  ;;  %v4839_v44 = vsel %vm1060_vm1, %v4834_v9, %v4838_v52 }
 0x283   : > { %v5622_v10 = vpop.f32.mrf.mxu0  ;;  %v5499_v19 = vrot.slane %v7557_v13, 1 }
 0x284   : > { %v5740_v24 = vadd.f32 %v5620_v5, %v5157_v37 }
 0x286   : > { %v5871_v31 = vmax.f32 %v5740_v24, 0.0  ;;  %v5500_v24 = vsel %vm1791_vm2, %v5497_v42, %v5499_v19 }
 0x287   : > { %v4309_v23 = vpop.f32.mrf.mxu2 }
 0x288   : > { %v4428_v7 = vadd.f32 %v4309_v23, %v3898_v45  ;;  %v5039_v60 = vpop.f32.mrf.mxu3 }
 0x289   : > { %v3782_v15 = vpop.f32.mrf.mxu1 }
 0x28a   : > { %v5158_v47 = vadd.f32 %v5039_v60, %v4428_v7  ;;  %v7504_v7 = vld [vmem:[%s7908_s11 + $0x68] sm:$0xff] }
 0x28b   : > { %v5625_v25 = vpop.f32.mrf.mxu0 }
 0x28c   : > { %v5741_v18 = vadd.f32 %v5622_v10, %v5158_v47  ;;  %6892 = vmatmul.msk.bf16.gmra.mxu1 %vm537_vm0, %v3655_v14  ;;  %7024 = vmatmul.msk.bf16.gmra.mxu2 %vm537_vm0, %v7503_v30  ;;  %v3656_v10 = vrot.slane %v7479_v53, 1 }
 0x28d   : > { %7156 = vmatmul.msk.bf16.gmra.mxu3 %vm537_vm0, %v4831_v63 }
 0x28e   : > { %7288 = vmatmul.msk.bf16.gmra.mxu0 %vm537_vm0, %v5498_v40  ;;  %v5872_v5 = vmax.f32 %v5741_v18, 0.0  ;;  %v3657_v30 = vsel %vm1791_vm2, %v3654_v50, %v3656_v10  ;;  %v7532_v50 = vld [vmem:[%s7908_s11 + $0x78] sm:$0xff]  ;;  %v7480_v18 = vld [vmem:[%s7908_s11 + $0x6c] sm:$0xff] }
 0x28f   : > { %v4312_v39 = vpop.f32.mrf.mxu2  ;;  %v3658_v53 = vrot.slane %v7480_v18, 1 }
 0x290   : > { %v7576_v8 = vpack.c.bf16 %v5872_v5, %v5871_v31  ;;  %v5042_v11 = vpop.f32.mrf.mxu3  ;;  %v4840_v31 = vshrl.u32 %v7531_v32, 16 }
 0x291   : > { %v3784_v55 = vpop.f32.mrf.mxu1  ;;  %v7558_v11 = vld [vmem:[%s7908_s11 + $0x78] sm:$0xff] }
 0x292   : > { %7577 = vst [vmem:[%s8592_s21] sm:$0xff] %v7576_v8   ;;  %v3900_v45 = vadd.f32 %v3784_v55, %v8192_v16  ;;  %v4844_v8 = vshll.u32 %v7532_v50, 16  ;;  %v4842_v51 = vor.u32 %v4840_v31, %v4838_v52  ;;  %v5501_v9 = vrot.slane %v7558_v11, 1 }
 0x293   : > { %v5627_v34 = vpop.f32.mrf.mxu0 }
 0x294   : > { %v5502_v52 = vsel %vm1791_vm2, %v5499_v19, %v5501_v9 }
 0x297   : > { %v4314_v37 = vpop.f32.mrf.mxu2 }
 0x298   : > { %v5044_v23 = vpop.f32.mrf.mxu3  ;;  %v4430_v15 = vadd.f32 %v4314_v37, %v3900_v45 }
 0x299   : > { %v3787_v60 = vpop.f32.mrf.mxu1 }
 0x29a   : > { %v5160_v16 = vadd.f32 %v5044_v23, %v4430_v15  ;;  %v3901_v29 = vadd.f32 %v3787_v60, %v8211_v2  ;;  %v4846_v2 = vrot.slane %v4844_v8, 1  ;;  %v7533_v15 = vld [vmem:[%s7908_s11 + $0x80] sm:$0xff] }
 0x29b   : > { %v5630_v14 = vpop.f32.mrf.mxu0  ;;  %v4852_v19 = vshll.u32 %v7533_v15, 16 }
 0x29c   : > { %6893 = vmatmul.msk.bf16.gmra.mxu1 %vm537_vm0, %v3657_v30  ;;  %7025 = vmatmul.msk.bf16.gmra.mxu2 %vm537_vm0, %v7504_v7  ;;  %v5743_v42 = vadd.f32 %v5627_v34, %v5160_v16  ;;  %v7505_v7 = vld [vmem:[%s7908_s11 + $0x70] sm:$0xff]  ;;  %v3659_v34 = vsel %vm1791_vm2, %v3656_v10, %v3658_v53  ;;  %v4847_v30 = vsel %vm1060_vm1, %v4842_v51, %v4846_v2 }
 0x29d   : > { %7157 = vmatmul.msk.bf16.gmra.mxu3 %vm537_vm0, %v4839_v44  ;;  %v7481_v16 = vld [vmem:[%s7908_s11 + $0x74] sm:$0xff] }
 0x29e   : > { %7289 = vmatmul.msk.bf16.gmra.mxu0 %vm537_vm0, %v5500_v24  ;;  %v5873_v22 = vmax.f32 %v5743_v42, 0.0 }
 0x29f   : > { %v4317_v47 = vpop.f32.mrf.mxu2 }
 0x2a0   : > { %v4431_v25 = vadd.f32 %v4317_v47, %v3901_v29  ;;  %v5047_v63 = vpop.f32.mrf.mxu3  ;;  %v4848_v29 = vshrl.u32 %v7532_v50, 16 }
 0x2a1   : > { %v3789_v40 = vpop.f32.mrf.mxu1 }
 0x2a2   : > { %v5161_v5 = vadd.f32 %v5047_v63, %v4431_v25  ;;  %v7559_v63 = vld [vmem:[%s7908_s11 + $0x80] sm:$0xff]  ;;  %v3660_v40 = vrot.slane %v7481_v16, 1  ;;  %v4850_v18 = vor.u32 %v4848_v29, %v4846_v2 }
 0x2a3   : > { %v5632_v39 = vpop.f32.mrf.mxu0 }
 0x2a4   : > { %v5744_v55 = vadd.f32 %v5630_v14, %v5161_v5  ;;  %v4854_v5 = vrot.slane %v4852_v19, 1  ;;  %v5503_v39 = vrot.slane %v7559_v63, 1 }
 0x2a6   : > { %v5874_v13 = vmax.f32 %v5744_v55, 0.0  ;;  %v4855_v2 = vsel %vm1060_vm1, %v4850_v18, %v4854_v5  ;;  %v7507_v18 = vld [vmem:[%s7908_s11 + $0x80] sm:$0xff] }
 0x2a7   : > { %v4319_v37 = vpop.f32.mrf.mxu2 }
 0x2a8   : > { %v7581_v45 = vpack.c.bf16 %v5874_v13, %v5873_v22  ;;  %v5049_v23 = vpop.f32.mrf.mxu3  ;;  %v3661_v22 = vsel %vm1791_vm2, %v3658_v53, %v3660_v40 }
 0x2a9   : > { %v3792_v32 = vpop.f32.mrf.mxu1 }
 0x2aa   : > { %7653 = vst [vmem:[%s8592_s21 + $0x8] sm:$0xff] %v7581_v45   ;;  %v3903_v44 = vadd.f32 %v3792_v32, %v8228_v27  ;;  %v7506_v27 = vld [vmem:[%s7908_s11 + $0x78] sm:$0xff]  ;;  %v5504_v45 = vsel %vm1791_vm2, %v5501_v9, %v5503_v39 }
 0x2ab   : > { %v5635_v60 = vpop.f32.mrf.mxu0 }
 0x2ac   : > { %6894 = vmatmul.msk.bf16.gmra.mxu1 %vm537_vm0, %v3659_v34  ;;  %7026 = vmatmul.msk.bf16.gmra.mxu2 %vm537_vm0, %v7505_v7  ;;  %v7534_v7 = vld [vmem:[%s7908_s11 + $0x88] sm:$0xff] }
 0x2ad   : > { %7158 = vmatmul.msk.bf16.gmra.mxu3 %vm537_vm0, %v4847_v30 }
 0x2ae   : > { %7290 = vmatmul.msk.bf16.gmra.mxu0 %vm537_vm0, %v5502_v52  ;;  %v7482_v52 = vld [vmem:[%s7908_s11 + $0x7c] sm:$0xff] }
 0x2af   : > { %v4322_v14 = vpop.f32.mrf.mxu2 }
 0x2b0   : > { %v5052_v10 = vpop.f32.mrf.mxu3  ;;  %v4433_v47 = vadd.f32 %v4322_v14, %v3903_v44  ;;  %v4856_v14 = vshrl.u32 %v7533_v15, 16  ;;  %v4860_v44 = vshll.u32 %v7534_v7, 16 }
 0x2b1   : > { %v3794_v24 = vpop.f32.mrf.mxu1 }
 0x2b2   : > { %v5163_v31 = vadd.f32 %v5052_v10, %v4433_v47  ;;  %v3904_v42 = vadd.f32 %v3794_v24, %v8236_v35  ;;  %v7560_v10 = vld [vmem:[%s7908_s11 + $0x88] sm:$0xff]  ;;  %v3662_v24 = vrot.slane %v7482_v52, 1  ;;  %v4858_v16 = vor.u32 %v4856_v14, %v4854_v5 }
 0x2b3   : > { %v5637_v25 = vpop.f32.mrf.mxu0  ;;  %v4862_v29 = vrot.slane %v4860_v44, 1  ;;  %v5505_v47 = vrot.slane %v7560_v10, 1 }
 0x2b4   : > { %v5746_v50 = vadd.f32 %v5635_v60, %v5163_v31 }
 0x2b5   : > { %v4863_v15 = vsel %vm1060_vm1, %v4858_v16, %v4862_v29  ;;  %v7508_v16 = vld [vmem:[%s7908_s11 + $0x88] sm:$0xff] }
 0x2b6   : > { %v5875_v53 = vmax.f32 %v5746_v50, 0.0 }
 0x2b7   : > { %v4324_v8 = vpop.f32.mrf.mxu2 }
 0x2b8   : > { %v4434_v11 = vadd.f32 %v4324_v8, %v3904_v42  ;;  %v5054_v55 = vpop.f32.mrf.mxu3  ;;  %v3663_v42 = vsel %vm1791_vm2, %v3660_v40, %v3662_v24  ;;  %v7535_v40 = vld [vmem:[%s7908_s11 + $0x90] sm:$0xff] }
 0x2b9   : > { %v3797_v51 = vpop.f32.mrf.mxu1 }
 0x2ba   : > { %v5164_v13 = vadd.f32 %v5054_v55, %v4434_v11  ;;  %v5506_v55 = vsel %vm1791_vm2, %v5503_v39, %v5505_v47 }
 0x2bb   : > { %v5640_v37 = vpop.f32.mrf.mxu0 }
 0x2bc   : > { %v5747_v35 = vadd.f32 %v5637_v25, %v5164_v13  ;;  %6895 = vmatmul.msk.bf16.gmra.mxu1 %vm537_vm0, %v3661_v22  ;;  %7027 = vmatmul.msk.bf16.gmra.mxu2 %vm537_vm0, %v7506_v27  ;;  %v7483_v13 = vld [vmem:[%s7908_s11 + $0x84] sm:$0xff]  ;;  %v4864_v37 = vshrl.u32 %v7534_v7, 16 }
 0x2bd   : > { %7159 = vmatmul.msk.bf16.gmra.mxu3 %vm537_vm0, %v4855_v2 }
 0x2be   : > { %7291 = vmatmul.msk.bf16.gmra.mxu0 %vm537_vm0, %v5504_v45  ;;  %v5876_v23 = vmax.f32 %v5747_v35, 0.0  ;;  %v4868_v35 = vshll.u32 %v7535_v40, 16 }
 0x2bf   : > { %v4327_v32 = vpop.f32.mrf.mxu2 }
 0x2c0   : > { %v7586_v34 = vpack.c.bf16 %v5876_v23, %v5875_v53  ;;  %v5057_v60 = vpop.f32.mrf.mxu3  ;;  %v7561_v53 = vld [vmem:[%s7908_s11 + $0x90] sm:$0xff]  ;;  %v3664_v32 = vrot.slane %v7483_v13, 1 }
 0x2c1   : > { %v3799_v30 = vpop.f32.mrf.mxu1  ;;  %v5507_v52 = vrot.slane %v7561_v53, 1 }
 0x2c2   : > { %7654 = vst [vmem:[%s8592_s21 + $0x10] sm:$0xff] %v7586_v34   ;;  %v3906_v19 = vadd.f32 %v3799_v30, %v8253_v48  ;;  %v4866_v34 = vor.u32 %v4864_v37, %v4862_v29 }
 0x2c3   : > { %v5642_v9 = vpop.f32.mrf.mxu0  ;;  %v5508_v29 = vsel %vm1791_vm2, %v5505_v47, %v5507_v52 }
 0x2c7   : > { %v4329_v25 = vpop.f32.mrf.mxu2 }
 0x2c8   : > { %v5059_v63 = vpop.f32.mrf.mxu3  ;;  %v4436_v8 = vadd.f32 %v4329_v25, %v3906_v19 }
 0x2c9   : > { %v3802_v31 = vpop.f32.mrf.mxu1 }
 0x2ca   : > { %v5166_v48 = vadd.f32 %v5059_v63, %v4436_v8  ;;  %v3907_v5 = vadd.f32 %v3802_v31, %v8260_v6  ;;  %v4870_v6 = vrot.slane %v4868_v35, 1  ;;  %v7536_v63 = vld [vmem:[%s7908_s11 + $0x98] sm:$0xff]  ;;  %v7484_v8 = vld [vmem:[%s7908_s11 + $0x8c] sm:$0xff] }
 0x2cb   : > { %v5645_v11 = vpop.f32.mrf.mxu0  ;;  %v4876_v47 = vshll.u32 %v7536_v63, 16 }
 0x2cc   : > { %6896 = vmatmul.msk.bf16.gmra.mxu1 %vm537_vm0, %v3663_v42  ;;  %7028 = vmatmul.msk.bf16.gmra.mxu2 %vm537_vm0, %v7507_v18  ;;  %v5749_v39 = vadd.f32 %v5642_v9, %v5166_v48  ;;  %v3665_v9 = vsel %vm1791_vm2, %v3662_v24, %v3664_v32  ;;  %v4871_v19 = vsel %vm1060_vm1, %v4866_v34, %v4870_v6  ;;  %v7562_v48 = vld [vmem:[%s7908_s11 + $0x98] sm:$0xff] }
 0x2cd   : > { %7160 = vmatmul.msk.bf16.gmra.mxu3 %vm537_vm0, %v4863_v15  ;;  %v5509_v13 = vrot.slane %v7562_v48, 1 }
 0x2ce   : > { %7292 = vmatmul.msk.bf16.gmra.mxu0 %vm537_vm0, %v5506_v55  ;;  %v5877_v60 = vmax.f32 %v5749_v39, 0.0 }
 0x2cf   : > { %v4332_v27 = vpop.f32.mrf.mxu2 }
 0x2d0   : > { %v4437_v51 = vadd.f32 %v4332_v27, %v3907_v5  ;;  %v5062_v22 = vpop.f32.mrf.mxu3  ;;  %v3666_v5 = vrot.slane %v7484_v8, 1 }
 0x2d1   : > { %v3804_v50 = vpop.f32.mrf.mxu1 }
 0x2d2   : > { %v5167_v2 = vadd.f32 %v5062_v22, %v4437_v51  ;;  %v4878_v50 = vrot.slane %v4876_v47, 1  ;;  %v3667_v35 = vsel %vm1791_vm2, %v3664_v32, %v3666_v5 }
 0x2d3   : > { %v5647_v45 = vpop.f32.mrf.mxu0 }
 0x2d4   : > { %v5750_v23 = vadd.f32 %v5645_v11, %v5167_v2  ;;  %v4872_v11 = vshrl.u32 %v7535_v40, 16 }
 0x2d6   : > { %v5878_v30 = vmax.f32 %v5750_v23, 0.0  ;;  %v4874_v27 = vor.u32 %v4872_v11, %v4870_v6  ;;  %v7537_v6 = vld [vmem:[%s7908_s11 + $0xa0] sm:$0xff] }
 0x2d7   : > { %v4334_v14 = vpop.f32.mrf.mxu2 }
 0x2d8   : > { %v7591_v44 = vpack.c.bf16 %v5878_v30, %v5877_v60  ;;  %v5064_v10 = vpop.f32.mrf.mxu3  ;;  %v4879_v34 = vsel %vm1060_vm1, %v4874_v27, %v4878_v50  ;;  %v5510_v60 = vsel %vm1791_vm2, %v5507_v52, %v5509_v13 }
 0x2d9   : > { %v3807_v7 = vpop.f32.mrf.mxu1 }
 0x2da   : > { %7655 = vst [vmem:[%s8592_s21 + $0x18] sm:$0xff] %v7591_v44   ;;  %v3909_v31 = vadd.f32 %v3807_v7, %v8277_v58  ;;  %v7509_v58 = vld [vmem:[%s7908_s11 + $0x90] sm:$0xff] }
 0x2db   : > { %v5650_v25 = vpop.f32.mrf.mxu0  ;;  %v7485_v7 = vld [vmem:[%s7908_s11 + $0x94] sm:$0xff] }
 0x2dc   : > { %6897 = vmatmul.msk.bf16.gmra.mxu1 %vm537_vm0, %v3665_v9  ;;  %7029 = vmatmul.msk.bf16.gmra.mxu2 %vm537_vm0, %v7508_v16  ;;  %v4880_v9 = vshrl.u32 %v7536_v63, 16 }
 0x2dd   : > { %7161 = vmatmul.msk.bf16.gmra.mxu3 %vm537_vm0, %v4871_v19  ;;  %v7563_v19 = vld [vmem:[%s7908_s11 + $0xa0] sm:$0xff] }
 0x2de   : > { %7293 = vmatmul.msk.bf16.gmra.mxu0 %vm537_vm0, %v5508_v29  ;;  %v3668_v29 = vrot.slane %v7485_v7, 1  ;;  %v7511_v7 = vld [vmem:[%s7908_s11 + $0xa0] sm:$0xff] }
 0x2df   : > { %v4337_v18 = vpop.f32.mrf.mxu2 }
 0x2e0   : > { %v5067_v24 = vpop.f32.mrf.mxu3  ;;  %v4439_v15 = vadd.f32 %v4337_v18, %v3909_v31  ;;  %v4882_v18 = vor.u32 %v4880_v9, %v4878_v50  ;;  %v3669_v47 = vsel %vm1791_vm2, %v3666_v5, %v3668_v29  ;;  %v7538_v5 = vld [vmem:[%s7908_s11 + $0xa8] sm:$0xff] }
 0x2e1   : > { %v3809_v42 = vpop.f32.mrf.mxu1 }
 0x2e2   : > { %v5169_v51 = vadd.f32 %v5067_v24, %v4439_v15  ;;  %v3910_v22 = vadd.f32 %v3809_v42, %v8285_v46  ;;  %v5511_v24 = vrot.slane %v7563_v19, 1  ;;  %v7510_v15 = vld [vmem:[%s7908_s11 + $0x98] sm:$0xff] }
 0x2e3   : > { %v5652_v55 = vpop.f32.mrf.mxu0 }
 0x2e4   : > { %v5752_v40 = vadd.f32 %v5650_v25, %v5169_v51  ;;  %v4884_v25 = vshll.u32 %v7537_v6, 16  ;;  %v5512_v51 = vsel %vm1791_vm2, %v5509_v13, %v5511_v24 }
 0x2e6   : > { %v5879_v32 = vmax.f32 %v5752_v40, 0.0  ;;  %v4886_v31 = vrot.slane %v4884_v25, 1 }
 0x2e7   : > { %v4339_v37 = vpop.f32.mrf.mxu2 }
 0x2e8   : > { %v4440_v39 = vadd.f32 %v4339_v37, %v3910_v22  ;;  %v5069_v2 = vpop.f32.mrf.mxu3  ;;  %v4887_v63 = vsel %vm1060_vm1, %v4882_v18, %v4886_v31  ;;  %v7539_v18 = vld [vmem:[%s7908_s11 + $0xb0] sm:$0xff] }
 0x2e9   : > { %v3812_v45 = vpop.f32.mrf.mxu1 }
 0x2ea   : > { %v5170_v53 = vadd.f32 %v5069_v2, %v4440_v39  ;;  %v4888_v45 = vshrl.u32 %v7537_v6, 16 }
 0x2eb   : > { %v5655_v23 = vpop.f32.mrf.mxu0 }
 0x2ec   : > { %v5753_v46 = vadd.f32 %v5652_v55, %v5170_v53  ;;  %6898 = vmatmul.msk.bf16.gmra.mxu1 %vm537_vm0, %v3667_v35  ;;  %7030 = vmatmul.msk.bf16.gmra.mxu2 %vm537_vm0, %v7509_v58  ;;  %v7486_v58 = vld [vmem:[%s7908_s11 + $0x9c] sm:$0xff]  ;;  %v4892_v53 = vshll.u32 %v7538_v5, 16  ;;  %v7564_v23 = vld [vmem:[%s7908_s11 + $0xa8] sm:$0xff] }
 0x2ed   : > { %7162 = vmatmul.msk.bf16.gmra.mxu3 %vm537_vm0, %v4879_v34 }
 0x2ee   : > { %7294 = vmatmul.msk.bf16.gmra.mxu0 %vm537_vm0, %v5510_v60  ;;  %v5880_v30 = vmax.f32 %v5753_v46, 0.0  ;;  %v3670_v60 = vrot.slane %v7486_v58, 1  ;;  %v4890_v46 = vor.u32 %v4888_v45, %v4886_v31 }
 0x2ef   : > { %v4342_v14 = vpop.f32.mrf.mxu2 }
 0x2f0   : > { %v7596_v44 = vpack.c.bf16 %v5880_v30, %v5879_v32  ;;  %v5072_v10 = vpop.f32.mrf.mxu3  ;;  %v5513_v14 = vrot.slane %v7564_v23, 1 }
 0x2f1   : > { %v3814_v16 = vpop.f32.mrf.mxu1 }
 0x2f2   : > { %7656 = vst [vmem:[%s8592_s21 + $0x20] sm:$0xff] %v7596_v44   ;;  %v3912_v8 = vadd.f32 %v3814_v16, %v8302_v12  ;;  %v5514_v19 = vsel %vm1791_vm2, %v5511_v24, %v5513_v14  ;;  %v4900_v24 = vshll.u32 %v7539_v18, 16 }
 0x2f3   : > { %v5657_v52 = vpop.f32.mrf.mxu0 }
 0x2f7   : > { %v4344_v42 = vpop.f32.mrf.mxu2 }
 0x2f8   : > { %v5074_v11 = vpop.f32.mrf.mxu3  ;;  %v4442_v48 = vadd.f32 %v4344_v42, %v3912_v8 }
 0x2f9   : > { %v3817_v55 = vpop.f32.mrf.mxu1 }
 0x2fa   : > { %v5172_v12 = vadd.f32 %v5074_v11, %v4442_v48  ;;  %v3913_v22 = vadd.f32 %v3817_v55, %v8309_v3  ;;  %v4894_v3 = vrot.slane %v4892_v53, 1  ;;  %v7487_v11 = vld [vmem:[%s7908_s11 + $0xa4] sm:$0xff]  ;;  %v7565_v48 = vld [vmem:[%s7908_s11 + $0xb0] sm:$0xff] }
 0x2fb   : > { %v5660_v27 = vpop.f32.mrf.mxu0 }
 0x2fc   : > { %6899 = vmatmul.msk.bf16.gmra.mxu1 %vm537_vm0, %v3669_v47  ;;  %7031 = vmatmul.msk.bf16.gmra.mxu2 %vm537_vm0, %v7510_v15  ;;  %v5755_v13 = vadd.f32 %v5657_v52, %v5172_v12  ;;  %v3671_v52 = vsel %vm1791_vm2, %v3668_v29, %v3670_v60  ;;  %v4895_v25 = vsel %vm1060_vm1, %v4890_v46, %v4894_v3  ;;  %v4896_v15 = vshrl.u32 %v7538_v5, 16 }
 0x2fd   : > { %7163 = vmatmul.msk.bf16.gmra.mxu3 %vm537_vm0, %v4887_v63 }
 0x2fe   : > { %7295 = vmatmul.msk.bf16.gmra.mxu0 %vm537_vm0, %v5512_v51  ;;  %v5881_v32 = vmax.f32 %v5755_v13, 0.0  ;;  %v4898_v63 = vor.u32 %v4896_v15, %v4894_v3 }
 0x2ff   : > { %v4347_v50 = vpop.f32.mrf.mxu2 }
 0x300   : > { %v4443_v37 = vadd.f32 %v4347_v50, %v3913_v22  ;;  %v5077_v39 = vpop.f32.mrf.mxu3  ;;  %v4902_v22 = vrot.slane %v4900_v24, 1  ;;  %v5515_v50 = vrot.slane %v7565_v48, 1  ;;  %v7541_v48 = vld [vmem:[%s7908_s11 + $0xc0] sm:$0xff] }
 0x301   : > { %v3819_v2 = vpop.f32.mrf.mxu1 }
 0x302   : > { %v5173_v35 = vadd.f32 %v5077_v39, %v4443_v37  ;;  %v5516_v53 = vsel %vm1791_vm2, %v5513_v14, %v5515_v50 }
 0x303   : > { %v5662_v40 = vpop.f32.mrf.mxu0 }
 0x304   : > { %v5756_v34 = vadd.f32 %v5660_v27, %v5173_v35  ;;  %v3672_v27 = vrot.slane %v7487_v11, 1  ;;  %v4903_v40 = vsel %vm1060_vm1, %v4898_v63, %v4902_v22 }
 0x306   : > { %v5882_v30 = vmax.f32 %v5756_v34, 0.0  ;;  %v3673_v45 = vsel %vm1791_vm2, %v3670_v60, %v3672_v27  ;;  %v7540_v60 = vld [vmem:[%s7908_s11 + $0xb8] sm:$0xff] }
 0x307   : > { %v4349_v44 = vpop.f32.mrf.mxu2 }
 0x308   : > { %v7601_v10 = vpack.c.bf16 %v5882_v30, %v5881_v32  ;;  %v5079_v16 = vpop.f32.mrf.mxu3  ;;  %v7488_v44 = vld [vmem:[%s7908_s11 + $0xac] sm:$0xff] }
 0x309   : > { %v3822_v6 = vpop.f32.mrf.mxu1  ;;  %v4908_v16 = vshll.u32 %v7540_v60, 16 }
 0x30a   : > { %7657 = vst [vmem:[%s8592_s21 + $0x28] sm:$0xff] %v7601_v10   ;;  %v3915_v42 = vadd.f32 %v3822_v6, %v8326_v38  ;;  %v7512_v38 = vld [vmem:[%s7908_s11 + $0xa8] sm:$0xff]  ;;  %v4904_v10 = vshrl.u32 %v7539_v18, 16  ;;  %v3674_v6 = vrot.slane %v7488_v44, 1 }
 0x30b   : > { %v5665_v9 = vpop.f32.mrf.mxu0 }
 0x30c   : > { %6900 = vmatmul.msk.bf16.gmra.mxu1 %vm537_vm0, %v3671_v52  ;;  %7032 = vmatmul.msk.bf16.gmra.mxu2 %vm537_vm0, %v7511_v7  ;;  %v7566_v7 = vld [vmem:[%s7908_s11 + $0xb8] sm:$0xff]  ;;  %v4906_v52 = vor.u32 %v4904_v10, %v4902_v22  ;;  %v3675_v11 = vsel %vm1791_vm2, %v3672_v27, %v3674_v6 }
 0x30d   : > { %7164 = vmatmul.msk.bf16.gmra.mxu3 %vm537_vm0, %v4895_v25  ;;  %v5517_v25 = vrot.slane %v7566_v7, 1  ;;  %v7489_v22 = vld [vmem:[%s7908_s11 + $0xb4] sm:$0xff] }
 0x30e   : > { %7296 = vmatmul.msk.bf16.gmra.mxu0 %vm537_vm0, %v5514_v19 }
 0x30f   : > { %v4352_v31 = vpop.f32.mrf.mxu2 }
 0x310   : > { %v5082_v29 = vpop.f32.mrf.mxu3  ;;  %v4445_v55 = vadd.f32 %v4352_v31, %v3915_v42 }
 0x311   : > { %v3824_v8 = vpop.f32.mrf.mxu1 }
 0x312   : > { %v5175_v51 = vadd.f32 %v5082_v29, %v4445_v55  ;;  %v3916_v12 = vadd.f32 %v3824_v8, %v8334_v28  ;;  %v7513_v29 = vld [vmem:[%s7908_s11 + $0xb0] sm:$0xff] }
 0x313   : > { %v5667_v47 = vpop.f32.mrf.mxu0 }
 0x314   : > { %v5758_v5 = vadd.f32 %v5665_v9, %v5175_v51  ;;  %v4910_v9 = vrot.slane %v4908_v16, 1 }
 0x316   : > { %v5883_v23 = vmax.f32 %v5758_v5, 0.0  ;;  %v4911_v18 = vsel %vm1060_vm1, %v4906_v52, %v4910_v9  ;;  %v3676_v5 = vrot.slane %v7489_v22, 1  ;;  %v7490_v52 = vld [vmem:[%s7908_s11 + $0xbc] sm:$0xff] }
 0x317   : > { %v4354_v37 = vpop.f32.mrf.mxu2 }
 0x318   : > { %v4446_v39 = vadd.f32 %v4354_v37, %v3916_v12  ;;  %v5084_v2 = vpop.f32.mrf.mxu3  ;;  %v4912_v37 = vshrl.u32 %v7540_v60, 16 }
 0x319   : > { %v3827_v58 = vpop.f32.mrf.mxu1 }
 0x31a   : > { %v5176_v13 = vadd.f32 %v5084_v2, %v4446_v39  ;;  %v7567_v58 = vld [vmem:[%s7908_s11 + $0xc0] sm:$0xff] }
 0x31b   : > { %v5670_v35 = vpop.f32.mrf.mxu0 }
 0x31c   : > { %v5759_v28 = vadd.f32 %v5667_v47, %v5176_v13  ;;  %6901 = vmatmul.msk.bf16.gmra.mxu1 %vm537_vm0, %v3673_v45  ;;  %7033 = vmatmul.msk.bf16.gmra.mxu2 %vm537_vm0, %v7512_v38  ;;  %v5518_v47 = vsel %vm1791_vm2, %v5515_v50, %v5517_v25  ;;  %v4916_v38 = vshll.u32 %v7541_v48, 16  ;;  %v4914_v13 = vor.u32 %v4912_v37, %v4910_v9 }
 0x31d   : > { %7165 = vmatmul.msk.bf16.gmra.mxu3 %vm537_vm0, %v4903_v40  ;;  %v4920_v9 = vshrl.u32 %v7541_v48, 16 }
 0x31e   : > { %7297 = vmatmul.msk.bf16.gmra.mxu0 %vm537_vm0, %v5516_v53  ;;  %v5884_v34 = vmax.f32 %v5759_v28, 0.0  ;;  %v5519_v53 = vrot.slane %v7567_v58, 1 }
 0x31f   : > { %v4357_v46 = vpop.f32.mrf.mxu2 }
 0x320   : > { %v7606_v32 = vpack.c.bf16 %v5884_v34, %v5883_v23  ;;  %v5087_v30 = vpop.f32.mrf.mxu3  ;;  %v7514_v46 = vld [vmem:[%s7908_s11 + $0xb8] sm:$0xff]  ;;  %v5520_v44 = vsel %vm1791_vm2, %v5517_v25, %v5519_v53 }
 0x321   : > { %v3829_v3 = vpop.f32.mrf.mxu1 }
 0x322   : > { %7658 = vst [vmem:[%s8592_s21 + $0x30] sm:$0xff] %v7606_v32   ;;  %v3918_v31 = vadd.f32 %v3829_v3, %v8351_v43  ;;  %v3677_v32 = vsel %vm1791_vm2, %v3674_v6, %v3676_v5 }
 0x323   : > { %v5672_v14 = vpop.f32.mrf.mxu0 }
 0x327   : > { %v4359_v19 = vpop.f32.mrf.mxu2 }
 0x328   : > { %v5089_v42 = vpop.f32.mrf.mxu3  ;;  %v4448_v15 = vadd.f32 %v4359_v19, %v3918_v31 }
 0x329   : > { %v3832_v8 = vpop.f32.mrf.mxu1 }
 0x32a   : > { %v5178_v43 = vadd.f32 %v5089_v42, %v4448_v15  ;;  %v3919_v24 = vadd.f32 %v3832_v8, %v8358_v1  ;;  %v4918_v1 = vrot.slane %v4916_v38, 1  ;;  %v7568_v42 = vld [vmem:[%s7908_s11 + $0xc8] sm:$0xff] }
 0x32b   : > { %v5675_v55 = vpop.f32.mrf.mxu0 }
 0x32c   : > { %6902 = vmatmul.msk.bf16.gmra.mxu1 %vm537_vm0, %v3675_v11  ;;  %7034 = vmatmul.msk.bf16.gmra.mxu2 %vm537_vm0, %v7513_v29  ;;  %v5761_v50 = vadd.f32 %v5672_v14, %v5178_v43  ;;  %v4919_v3 = vsel %vm1060_vm1, %v4914_v13, %v4918_v1  ;;  %v7542_v14 = vld [vmem:[%s7908_s11 + $0xc8] sm:$0xff]  ;;  %v3678_v29 = vrot.slane %v7490_v52, 1  ;;  %v4922_v8 = vor.u32 %v4920_v9, %v4918_v1 }
 0x32d   : > { %7166 = vmatmul.msk.bf16.gmra.mxu3 %vm537_vm0, %v4911_v18  ;;  %v4924_v25 = vshll.u32 %v7542_v14, 16  ;;  %v5521_v18 = vrot.slane %v7568_v42, 1  ;;  %v7491_v13 = vld [vmem:[%s7908_s11 + $0xc4] sm:$0xff]  ;;  %v3458_v9 = vld [vmem:[%s7908_s11 + $0xcc] sm:$0x1] }
 0x32e   : > { %7298 = vmatmul.msk.bf16.gmra.mxu0 %vm537_vm0, %v5518_v47  ;;  %v5885_v35 = vmax.f32 %v5761_v50, 0.0 }
 0x32f   : > { %v4362_v27 = vpop.f32.mrf.mxu2  ;;  %v5522_v37 = vsel %vm1791_vm2, %v5519_v53, %v5521_v18  ;;  %v7569_v53 = vld [vmem:[%s7908_s11 + $0xd0] sm:$0xff] }
 0x330   : > { %v4449_v63 = vadd.f32 %v4362_v27, %v3919_v24  ;;  %v5092_v51 = vpop.f32.mrf.mxu3 }
 0x331   : > { %v3834_v12 = vpop.f32.mrf.mxu1 }
 0x332   : > { %v5179_v39 = vadd.f32 %v5092_v51, %v4449_v63  ;;  %v3679_v63 = vsel %vm1791_vm2, %v3676_v5, %v3678_v29 }
 0x333   : > { %v5677_v2 = vpop.f32.mrf.mxu0 }
 0x334   : > { %v5762_v45 = vadd.f32 %v5675_v55, %v5179_v39  ;;  %v4926_v55 = vrot.slane %v4924_v25, 1  ;;  %v7543_v2 = vld [vmem:[%s7908_s11 + $0xd0] sm:$0xff] }
 0x335   : > { %v4932_v1 = vshll.u32 %v7543_v2, 16 }
 0x336   : > { %v5886_v40 = vmax.f32 %v5762_v45, 0.0  ;;  %v4927_v22 = vsel %vm1060_vm1, %v4922_v8, %v4926_v55 }
 0x337   : > { %v4364_v28 = vpop.f32.mrf.mxu2 }
 0x338   : > { %v7611_v23 = vpack.c.bf16 %v5886_v40, %v5885_v35  ;;  %v5094_v34 = vpop.f32.mrf.mxu3  ;;  %v4928_v40 = vshrl.u32 %v7542_v14, 16  ;;  %v3680_v28 = vrot.slane %v7491_v13, 1 }
 0x339   : > { %v3837_v60 = vpop.f32.mrf.mxu1  ;;  %v4934_v34 = vrot.slane %v4932_v1, 1 }
 0x33a   : > { %7659 = vst [vmem:[%s8592_s21 + $0x38] sm:$0xff] %v7611_v23   ;;  %v3921_v16 = vadd.f32 %v3837_v60, %v8375_v54  ;;  %v7515_v54 = vld [vmem:[%s7908_s11 + $0xc0] sm:$0xff]  ;;  %v4930_v23 = vor.u32 %v4928_v40, %v4926_v55 }
 0x33b   : > { %v5680_v30 = vpop.f32.mrf.mxu0 }
 0x33c   : > { %6903 = vmatmul.msk.bf16.gmra.mxu1 %vm537_vm0, %v3677_v32  ;;  %7035 = vmatmul.msk.bf16.gmra.mxu2 %vm537_vm0, %v7514_v46  ;;  %v5523_v46 = vrot.slane %v7569_v53, 1  ;;  %v4571_v32 = vld [vmem:[%s7908_s11 + $0xd8] sm:$0x1]  ;;  %v4935_v14 = vsel %vm1060_vm1, %v4930_v23, %v4934_v34 }
 0x33d   : > { %7167 = vmatmul.msk.bf16.gmra.mxu3 %vm537_vm0, %v4919_v3 }
 0x33e   : > { %7299 = vmatmul.msk.bf16.gmra.mxu0 %vm537_vm0, %v5520_v44  ;;  %v7516_v44 = vld [vmem:[%s7908_s11 + $0xc8] sm:$0xff]  ;;  %v5524_v52 = vsel %vm1791_vm2, %v5521_v18, %v5523_v46 }
 0x33f   : > { %v4367_v10 = vpop.f32.mrf.mxu2 }
 0x340   : > { %v5097_v7 = vpop.f32.mrf.mxu3  ;;  %v4451_v19 = vadd.f32 %v4367_v10, %v3921_v16  ;;  %v3681_v16 = vsel %vm1791_vm2, %v3678_v29, %v3680_v28 }
 0x341   : > { %v3839_v6 = vpop.f32.mrf.mxu1 }
 0x342   : > { %v5181_v11 = vadd.f32 %v5097_v7, %v4451_v19  ;;  %v3922_v15 = vadd.f32 %v3839_v6, %v8383_v41  ;;  %v4722_v19 = vunpack.c.l.b16 %v4571_v32 }
 0x343   : > { %v5682_v31 = vpop.f32.mrf.mxu0 }
 0x344   : > { %v5764_v48 = vadd.f32 %v5680_v30, %v5181_v11  ;;  %v4747_v29 = vpack.c.b16 %v4722_v19, %v4722_v19 }
 0x346   : > { %v5887_v50 = vmax.f32 %v5764_v48, 0.0 }
 0x347   : > { %v4369_v47 = vpop.f32.mrf.mxu2 }
 0x348   : > { %v4452_v43 = vadd.f32 %v4369_v47, %v3922_v15  ;;  %v5099_v24 = vpop.f32.mrf.mxu3 }
 0x349   : > { %v3842_v27 = vpop.f32.mrf.mxu1 }
 0x34a   : > { %v5182_v51 = vadd.f32 %v5099_v24, %v4452_v43  ;;  %v4936_v43 = vshrl.u32 %v7543_v2, 16 }
 0x34b   : > { %v5685_v12 = vpop.f32.mrf.mxu0 }
 0x34c   : > { %v5765_v41 = vadd.f32 %v5682_v31, %v5182_v51  ;;  %6904 = vmatmul.msk.bf16.gmra.mxu1 %vm537_vm0, %v3679_v63  ;;  %7036 = vmatmul.msk.bf16.gmra.mxu2 %vm537_vm0, %v7515_v54  ;;  %v5301_v31 = vld [vmem:[%s7908_s11 + $0xd8] sm:$0x1]  ;;  %v4940_v63 = vshll.u32 %v4747_v29, 16 }
 0x34d   : > { %7168 = vmatmul.msk.bf16.gmra.mxu3 %vm537_vm0, %v4927_v22  ;;  %v5452_v8 = vunpack.c.l.b16 %v5301_v31  ;;  %v4938_v22 = vor.u32 %v4936_v43, %v4934_v34 }
 0x34e   : > { %7300 = vmatmul.msk.bf16.gmra.mxu0 %vm537_vm0, %v5522_v37  ;;  %v5888_v39 = vmax.f32 %v5765_v41, 0.0  ;;  %v4942_v41 = vrot.slane %v4940_v63, 1 }
 0x34f   : > { %v4372_v38 = vpop.f32.mrf.mxu2  ;;  %v5477_v48 = vpack.c.b16 %v5452_v8, %v5452_v8 }
 0x350   : > { %v7616_v58 = vpack.c.bf16 %v5888_v39, %v5887_v50  ;;  %v5102_v45 = vpop.f32.mrf.mxu3 }
 0x351   : > { %v3844_v5 = vpop.f32.mrf.mxu1  ;;  %v5525_v50 = vrot.slane %v5477_v48, 1  ;;  %v7517_v45 = vld [vmem:[%s7908_s11 + $0xd0] sm:$0xff]  ;;  %s7572_s11 = sshll.u32 %s7804_s15, 7  ;;  %s5983_s15 = scalar_lea.sflag [#allocation4], %s225_s18 }
 0x352   : > { %7660 = vst [vmem:[%s8592_s21 + $0x40] sm:$0xff] %v7616_v58   ;;  %v3924_v30 = vadd.f32 %v3844_v5, %v8403_v20  ;;  %v3609_v20 = vunpack.c.l.b16 %v3458_v9  ;;  %s5995_s27 = scalar_lea.hbm %s8834_s3, %s7572_s11 }
 0x353   : > { %v5687_v35 = vpop.f32.mrf.mxu0  ;;  %v5526_v40 = vsel %vm1791_vm2, %v5523_v46, %v5525_v50  ;;  %s5998_s29 = sshll.u32 %s5995_s27, 4  ;;  %s5999_s29 = int_to_ptr.hbm [resolvable:$true] %s5998_s29 }
 0x354   : > { %v3634_v47 = vpack.c.b16 %v3609_v20, %v3609_v20  ;;  %s7748_s30 = sshra.s32 %s5999_s29, 4  ;;  %s7749_s30 = int_to_ptr.hbm [resolvable:$true] %s7748_s30 }
 0x355   : > { %s7750_s4 = scalar_lea.hbm %s7749_s30, 128  ;;  %p7755_p1 = scmp.lt.s32.totalorder %s7749_s30, %s8834_s3 }
 0x356   : > { %v3682_v12 = vrot.slane %v3634_v47, 1  ;;  %p7751_p12 = scmp.ne.s32.totalorder %s7749_s30, %s7750_s4  ;;  %p7756_p2 = scmp.lt.s32.totalorder %s7754_s7, %s7750_s4 }
 0x357   : > { %v4374_v60 = vpop.f32.mrf.mxu2 }
 0x358   : > { %v5104_v3 = vpop.f32.mrf.mxu3  ;;  %v4454_v7 = vadd.f32 %v4374_v60, %v3924_v30  ;;  %v3683_v2 = vsel %vm1791_vm2, %v3680_v28, %v3682_v12  ;;  %p7752_p13 = pnand %p7751_p12, %p7876_p4  ;;  %p7757_p3 = por %p7756_p2, %p7755_p1 }
 0x359   : > { %v3847_v10 = vpop.f32.mrf.mxu1 }
 0x35a   : > { %v5184_v25 = vadd.f32 %v5104_v3, %v4454_v7  ;;  %v3925_v42 = vadd.f32 %v3847_v10, %v8407_v33  ;;  %p7753_p0 = pneg %p7752_p13 }
 0x35b   : > { %v5690_v6 = vpop.f32.mrf.mxu0 }
 0x35c   : > { %6905 = vmatmul.msk.bf16.gmra.mxu1 %vm537_vm0, %v3681_v16  ;;  %7037 = vmatmul.msk.bf16.gmra.mxu2 %vm537_vm0, %v7516_v44  ;;  %v5767_v24 = vadd.f32 %v5687_v35, %v5184_v25  ;;  %v4943_v35 = vsel %vm1060_vm1, %v4938_v22, %v4942_v41  ;;  %p7758_p5 = pnand %p7757_p3, %p7753_p0 }
 0x35d   : > { %7169 = vmatmul.msk.bf16.gmra.mxu3 %vm537_vm0, %v4935_v14 }
 0x35e   : > { %7301 = vmatmul.msk.bf16.gmra.mxu0 %vm537_vm0, %v5524_v52  ;;  %v5889_v37 = vmax.f32 %v5767_v24, 0.0 }
 0x35f   : > { %v4377_v11 = vpop.f32.mrf.mxu2 }
 0x360   : > { %v4455_v15 = vadd.f32 %v4377_v11, %v3925_v42  ;;  %v5107_v55 = vpop.f32.mrf.mxu3 }
 0x361   : > { %v3849_v18 = vpop.f32.mrf.mxu1 }
 0x362   : > { %v5185_v54 = vadd.f32 %v5107_v55, %v4455_v15 }
 0x363   : > { %v5692_v27 = vpop.f32.mrf.mxu0 }
 0x364   : > { %v5768_v51 = vadd.f32 %v5690_v6, %v5185_v54 }
 0x366   : > { %v5890_v33 = vmax.f32 %v5768_v51, 0.0 }
 0x367   : > { %v4379_v39 = vpop.f32.mrf.mxu2 }
 0x368   : > { %v7621_v38 = vpack.c.bf16 %v5890_v33, %v5889_v37  ;;  %v5109_v58 = vpop.f32.mrf.mxu3 }
 0x369   : > { %v3852_v5 = vpop.f32.mrf.mxu1 }
 0x36a   : > { %7661 = vst [vmem:[%s8592_s21 + $0x48] sm:$0xff] %v7621_v38   ;;  %v3927_v53 = vadd.f32 %v3852_v5, %v8434_v62 }
 0x36b   : > { %v5695_v13 = vpop.f32.mrf.mxu0 }
 0x36c   : > { %6906 = vmatmul.msk.bf16.gmra.mxu1 %vm537_vm0, %v3683_v2  ;;  %7038 = vmatmul.msk.bf16.gmra.mxu2 %vm537_vm0, %v7517_v45 }
 0x36d   : > { %7170 = vmatmul.msk.bf16.gmra.mxu3 %vm537_vm0, %v4943_v35 }
 0x36e   : > { %7302 = vmatmul.msk.bf16.gmra.mxu0 %vm537_vm0, %v5526_v40 }
 0x36f   : > { %v4382_v1 = vpop.f32.mrf.mxu2 }
 0x370   : > { %v5112_v23 = vpop.f32.mrf.mxu3  ;;  %v4457_v28 = vadd.f32 %v4382_v1, %v3927_v53 }
 0x371   : > { %v3854_v34 = vpop.f32.mrf.mxu1 }
 0x372   : > { %v5187_v32 = vadd.f32 %v5112_v23, %v4457_v28  ;;  %v3928_v30 = vadd.f32 %v3854_v34, %v8442_v61 }
 0x373   : > { %v5697_v60 = vpop.f32.mrf.mxu0 }
 0x374   : > { %v5770_v16 = vadd.f32 %v5695_v13, %v5187_v32 }
 0x376   : > { %v5891_v52 = vmax.f32 %v5770_v16, 0.0 }
 0x377   : > { %v4384_v46 = vpop.f32.mrf.mxu2 }
 0x378   : > { %v4458_v3 = vadd.f32 %v4384_v46, %v3928_v30  ;;  %v5114_v44 = vpop.f32.mrf.mxu3 }
 0x379   : > { %v3857_v10 = vpop.f32.mrf.mxu1 }
 0x37a   : > { %v5188_v7 = vadd.f32 %v5114_v44, %v4458_v3 }
 0x37b   : > { %v5700_v6 = vpop.f32.mrf.mxu0 }
 0x37c   : > { %v5771_v14 = vadd.f32 %v5697_v60, %v5188_v7 }
 0x37e   : > { %v5892_v9 = vmax.f32 %v5771_v14, 0.0 }
 0x37f   : > { %v4387_v19 = vpop.f32.mrf.mxu2 }
 0x380   : > { %v7626_v62 = vpack.c.bf16 %v5892_v9, %v5891_v52  ;;  %v5117_v31 = vpop.f32.mrf.mxu3 }
 0x381   : > { %v3859_v20 = vpop.f32.mrf.mxu1 }
 0x382   : > { %7662 = vst [vmem:[%s8592_s21 + $0x50] sm:$0xff] %v7626_v62   ;;  %v3930_v29 = vadd.f32 %v3859_v20, %v8459_v57 }
 0x383   : > { %v5702_v25 = vpop.f32.mrf.mxu0 }
 0x387   : > { %v4389_v42 = vpop.f32.mrf.mxu2 }
 0x388   : > { %v5119_v61 = vpop.f32.mrf.mxu3  ;;  %v4460_v11 = vadd.f32 %v4389_v42, %v3930_v29 }
 0x389   : > { %v3862_v8 = vpop.f32.mrf.mxu1 }
 0x38a   : > { %v5190_v55 = vadd.f32 %v5119_v61, %v4460_v11  ;;  %v3931_v18 = vadd.f32 %v3862_v8, %v8466_v0 }
 0x38b   : > { %v5705_v15 = vpop.f32.mrf.mxu0 }
 0x38c   : > { %v5773_v27 = vadd.f32 %v5702_v25, %v5190_v55 }
 0x38e   : > { %v5893_v12 = vmax.f32 %v5773_v27, 0.0 }
 0x38f   : > { %v4392_v47 = vpop.f32.mrf.mxu2 }
 0x390   : > { %v4461_v43 = vadd.f32 %v4392_v47, %v3931_v18  ;;  %v5122_v24 = vpop.f32.mrf.mxu3 }
 0x391   : > { %v3864_v54 = vpop.f32.mrf.mxu1 }
 0x392   : > { %v5191_v63 = vadd.f32 %v5122_v24, %v4461_v43 }
 0x393   : > { %v5707_v48 = vpop.f32.mrf.mxu0 }
 0x394   : > { %v5774_v51 = vadd.f32 %v5705_v15, %v5191_v63 }
 0x396   : > { %v5894_v22 = vmax.f32 %v5774_v51, 0.0 }
 0x397   : > { %v4394_v37 = vpop.f32.mrf.mxu2 }
 0x398   : > { %v7631_v57 = vpack.c.bf16 %v5894_v22, %v5893_v12  ;;  %v5124_v33 = vpop.f32.mrf.mxu3 }
 0x399   : > { %v3867_v41 = vpop.f32.mrf.mxu1 }
 0x39a   : > { %7663 = vst [vmem:[%s8592_s21 + $0x58] sm:$0xff] %v7631_v57   ;;  %v3933_v38 = vadd.f32 %v3867_v41, %v8483_v17 }
 0x39b   : > { %v5710_v50 = vpop.f32.mrf.mxu0 }
 0x39f   : > { %v4397_v39 = vpop.f32.mrf.mxu2 }
 0x3a0   : > { %v5127_v0 = vpop.f32.mrf.mxu3  ;;  %v4463_v45 = vadd.f32 %v4397_v39, %v3933_v38 }
 0x3a1   : > { %v3869_v58 = vpop.f32.mrf.mxu1 }
 0x3a2   : > { %v5193_v2 = vadd.f32 %v5127_v0, %v4463_v45  ;;  %v3934_v13 = vadd.f32 %v3869_v58, %v8491_v26 }
 0x3a3   : > { %v5712_v5 = vpop.f32.mrf.mxu0 }
 0x3a4   : > { %v5776_v23 = vadd.f32 %v5710_v50, %v5193_v2 }
 0x3a6   : > { %v5895_v32 = vmax.f32 %v5776_v23, 0.0 }
 0x3a7   : > { %v4399_v35 = vpop.f32.mrf.mxu2 }
 0x3a8   : > { %v4464_v40 = vadd.f32 %v4399_v35, %v3934_v13  ;;  %v5129_v1 = vpop.f32.mrf.mxu3 }
 0x3a9   : > { %v3872_v53 = vpop.f32.mrf.mxu1 }
 0x3aa   : > { %v5194_v34 = vadd.f32 %v5129_v1, %v4464_v40 }
 0x3ab   : > { %v5715_v28 = vpop.f32.mrf.mxu0 }
 0x3ac   : > { %v5777_v60 = vadd.f32 %v5712_v5, %v5194_v34 }
 0x3ae   : > { %v5896_v30 = vmax.f32 %v5777_v60, 0.0 }
 0x3af   : > { %v4402_v46 = vpop.f32.mrf.mxu2 }
 0x3b0   : > { %v7636_v17 = vpack.c.bf16 %v5896_v30, %v5895_v32  ;;  %v5132_v3 = vpop.f32.mrf.mxu3 }
 0x3b1   : > { %v3874_v44 = vpop.f32.mrf.mxu1 }
 0x3b2   : > { %7664 = vst [vmem:[%s8592_s21 + $0x60] sm:$0xff] %v7636_v17   ;;  %v3936_v7 = vadd.f32 %v3874_v44, %v8508_v21 }
 0x3b3   : > { %v5717_v10 = vpop.f32.mrf.mxu0 }
 0x3b7   : > { %v4404_v16 = vpop.f32.mrf.mxu2 }
 0x3b8   : > { %v5134_v26 = vpop.f32.mrf.mxu3  ;;  %v4466_v14 = vadd.f32 %v4404_v16, %v3936_v7 }
 0x3b9   : > { %v3877_v6 = vpop.f32.mrf.mxu1 }
 0x3ba   : > { %v5196_v9 = vadd.f32 %v5134_v26, %v4466_v14  ;;  %v3937_v19 = vadd.f32 %v3877_v6, %v8515_v4 }
 0x3bb   : > { %v5720_v52 = vpop.f32.mrf.mxu0 }
 0x3bc   : > { %v5779_v42 = vadd.f32 %v5717_v10, %v5196_v9 }
 0x3be   : > { %v5897_v11 = vmax.f32 %v5779_v42, 0.0 }
 0x3bf   : > { %v4407_v62 = vpop.f32.mrf.mxu2 }
 0x3c0   : > { %v4467_v31 = vadd.f32 %v4407_v62, %v3937_v19  ;;  %v5137_v20 = vpop.f32.mrf.mxu3 }
 0x3c1   : > { %v3879_v25 = vpop.f32.mrf.mxu1 }
 0x3c2   : > { %v5197_v29 = vadd.f32 %v5137_v20, %v4467_v31 }
 0x3c3   : > { %v5722_v61 = vpop.f32.mrf.mxu0 }
 0x3c4   : > { %v5780_v8 = vadd.f32 %v5720_v52, %v5197_v29 }
 0x3c6   : > { %v5898_v15 = vmax.f32 %v5780_v8, 0.0 }
 0x3c7   : > { %v4409_v55 = vpop.f32.mrf.mxu2 }
 0x3c8   : > { %v7641_v21 = vpack.c.bf16 %v5898_v15, %v5897_v11  ;;  %v5139_v18 = vpop.f32.mrf.mxu3 }
 0x3c9   : > { %v3882_v47 = vpop.f32.mrf.mxu1 }
 0x3ca   : > { %7665 = vst [vmem:[%s8592_s21 + $0x68] sm:$0xff] %v7641_v21   ;;  %v3939_v54 = vadd.f32 %v3882_v47, %v8532_v36 }
 0x3cb   : > { %v5725_v43 = vpop.f32.mrf.mxu0 }
 0x3cf   : > { %v4412_v24 = vpop.f32.mrf.mxu2 }
 0x3d0   : > { %v5142_v4 = vpop.f32.mrf.mxu3  ;;  %v4469_v63 = vadd.f32 %v4412_v24, %v3939_v54 }
 0x3d1   : > { %v3884_v27 = vpop.f32.mrf.mxu1 }
 0x3d2   : > { %v5199_v51 = vadd.f32 %v5142_v4, %v4469_v63  ;;  %v3940_v12 = vadd.f32 %v3884_v27, %v8540_v49 }
 0x3d3   : > { %v5727_v48 = vpop.f32.mrf.mxu0 }
 0x3d4   : > { %v5782_v41 = vadd.f32 %v5725_v43, %v5199_v51 }
 0x3d6   : > { %v5899_v0 = vmax.f32 %v5782_v41, 0.0 }
 0x3d7   : > { %v4414_v22 = vpop.f32.mrf.mxu2 }
 0x3d8   : > { %v4470_v37 = vadd.f32 %v4414_v22, %v3940_v12  ;;  %v5144_v57 = vpop.f32.mrf.mxu3 }
 0x3d9   : > { %v3887_v33 = vpop.f32.mrf.mxu1 }
 0x3da   : > { %v5200_v50 = vadd.f32 %v5144_v57, %v4470_v37 }
 0x3db   : > { %v5730_v39 = vpop.f32.mrf.mxu0 }
 0x3dc   : > { %v5783_v38 = vadd.f32 %v5727_v48, %v5200_v50 }
 0x3de   : > { %v5900_v58 = vmax.f32 %v5783_v38, 0.0 }
 0x3df   : > { %v4417_v36 = vpop.f32.mrf.mxu2 }
 0x3e0   : > { %v7646_v45 = vpack.c.bf16 %v5900_v58, %v5899_v0  ;;  %v5147_v5 = vpop.f32.mrf.mxu3 }
 0x3e1   : > { %v3889_v2 = vpop.f32.mrf.mxu1 }
 0x3e2   : > { %7666 = vst [vmem:[%s8592_s21 + $0x70] sm:$0xff] %v7646_v45   ;;  %v3942_v49 = vadd.f32 %v3889_v2, %v8557_v59 }
 0x3e3   : > { %v5732_v13 = vpop.f32.mrf.mxu0 }
 0x3e7   : > { %v4419_v35 = vpop.f32.mrf.mxu2 }
 0x3e8   : > { %v5149_v40 = vpop.f32.mrf.mxu3  ;;  %v4472_v53 = vadd.f32 %v4419_v35, %v3942_v49 }
 0x3e9   : > { %v3892_v1 = vpop.f32.mrf.mxu1 }
 0x3ea   : > { %v5202_v34 = vadd.f32 %v5149_v40, %v4472_v53  ;;  %v3943_v28 = vadd.f32 %v3892_v1, %v8564_v56 }
 0x3eb   : > { %v5735_v23 = vpop.f32.mrf.mxu0 }
 0x3ec   : > { %v5785_v59 = vadd.f32 %v5732_v13, %v5202_v34 }
 0x3ee   : > { %v5901_v10 = vmax.f32 %v5785_v59, 0.0 }
 0x3ef   : > { %v4422_v60 = vpop.f32.mrf.mxu2 }
 0x3f0   : > { %v4473_v32 = vadd.f32 %v4422_v60, %v3943_v28  ;;  %v5152_v30 = vpop.f32.mrf.mxu3 }
 0x3f1   : > { %v3894_v46 = vpop.f32.mrf.mxu1 }
 0x3f2   : > { %v5203_v17 = vadd.f32 %v5152_v30, %v4473_v32 }
 0x3f3   : > { %v5737_v3 = vpop.f32.mrf.mxu0 }
 0x3f4   : > { %v5786_v44 = vadd.f32 %v5735_v23, %v5203_v17 }
 0x3f6   : > { %v5902_v56 = vmax.f32 %v5786_v44, 0.0 }
 0x3f7   : > { %v4424_v16 = vpop.f32.mrf.mxu2 }
 0x3f8   : > { %v7651_v7 = vpack.c.bf16 %v5902_v56, %v5901_v10  ;;  %v5154_v26 = vpop.f32.mrf.mxu3 }
 0x3fa   : > { %7667 = vst [vmem:[%s8592_s21 + $0x78] sm:$0xff] %v7651_v7  }
 0x3fb   : > { %7761 = shalt.err (!%p7758_p5)
}
 0x3fc   : > { %s7814_s10 = smov 64   ;;  %s7815_s18 = smov 4  }
 0x3fd   : > { %7675 = dma.vmem_to_hbm [thread:$0]  (%p7876_p4), %s5997_s28, 2048, %s5999_s29, %s5983_s15, %s7814_s10, %s7814_s10, %s7815_s18  }
 0x3fe PF: > { %p7681_p6 = scmp.ge.s32.totalorder %s7812_s17, 2  ;;  %s6013_s19 = sand.u32 1, %s7792_s12  }
 0x3ff   : > { %s6014_s21 = scalar_lea.sflag [#allocation4], %s6013_s19 }
 0x400   : > { %p7678_p7 = pnand %p7681_p6, %p7883_p8 }
 0x402   : > { %p7679_p9 = pneg %p7678_p7 }
 0x404   : > { %7787 = dma.done.wait (%p7679_p9), %s6014_s21, 2048  }
 0x405   : > { %7789 = vsyncadd (%p7679_p9), %s6014_s21, 4294965248  ;;  %s16_s17 = sadd.s32 1, %s7812_s17   ;;  %s8837_s12 = smov %s7796_s13 }
 0x406   : > { %p13_p10 = scmp.ge.s32.totalorder %s16_s17, 4   ;;  %s8838_s13 = smov %s7800_s14 }
 0x407   : > { %s8839_s14 = smov %s7889_s25  ;;  %s8840_s15 = smov %s7808_s16 }
 0x408   : > { %s8841_s16 = smov %s8843_s20  ;;  %15 = sbr.rel (!%p13_p10) target bundleno = 4 (0x4), region = 104 }
 0x40d   :  { %6020 = vsyncpa [#allocation4], 1 }
 0x40e   :  { %6022 = vsyncpa [#allocation4 + $0x1], 1 }

</bundles_post_ra>
